<compile_context>
chip_gen: v7x
topology: tpu7x:2x2x1
jax: 0.10.0
libtpu: 0.0.40
codegen_flags: <defaults>
</compile_context>

<pallas_src>
import math
import functools

import jax
import jax.numpy as jnp
from jax.experimental import pallas as pl
from jax.experimental.pallas import tpu as pltpu

_NEG_INF = -1.0e9  # finite "masked" value: avoids inf - inf -> NaN inside softmax


# ----------------------------------------------------------------------------
# In-kernel helpers (operate on loaded jnp values inside a Pallas kernel body)
# ----------------------------------------------------------------------------

def _linear(x_f32, w_bf16, b_f32):
    """x: (M, K) f32, w: (K, N) bf16 (pre-transposed), b: (1, N) f32 -> (M, N) f32."""
    return jnp.dot(x_f32.astype(jnp.bfloat16), w_bf16,
                   preferred_element_type=jnp.float32) + b_f32


def _layernorm(z, g, b):
    """PyTorch LayerNorm over last dim, eps=1e-5; statistics in f32."""
    mu = jnp.mean(z, axis=-1, keepdims=True)
    var = jnp.mean((z - mu) ** 2, axis=-1, keepdims=True)
    return (z - mu) * jax.lax.rsqrt(var + 1e-5) * g + b


def _softmax(s):
    s = s - jnp.max(s, axis=-1, keepdims=True)
    p = jnp.exp(s)
    return p * pl.reciprocal(jnp.sum(p, axis=-1, keepdims=True), approx=True)


def _mha(q, k, v, add_mask, num_heads, head_dim):
    """q: (Lq, E), k/v: (Lk, E), add_mask: (Lq, Lk) additive f32.
    1/sqrt(head_dim) is already folded into the q projection weights."""
    head_outs = []
    for h in range(num_heads):
        sl = slice(h * head_dim, (h + 1) * head_dim)
        qh = q[:, sl].astype(jnp.bfloat16)
        kh = k[:, sl].astype(jnp.bfloat16)
        vh = v[:, sl].astype(jnp.bfloat16)
        # q @ k.T without an explicit transpose (contract last dims on the MXU)
        s = jax.lax.dot_general(qh, kh, (((1,), (1,)), ((), ())),
                                preferred_element_type=jnp.float32)
        p = _softmax(s + add_mask)
        head_outs.append(jnp.dot(p.astype(jnp.bfloat16), vh,
                                 preferred_element_type=jnp.float32))
    return jnp.concatenate(head_outs, axis=-1)           # (Lq, E)


# ----------------------------------------------------------------------------
# Fused layer kernels (one pallas_call per transformer layer, grid over batch)
# ----------------------------------------------------------------------------

def _encoder_layer_kernel(x_ref, mask_ref,
                          sa_wqkv, sa_bqkv, sa_wo, sa_bo, ln1_g, ln1_b,
                          ff_w1, ff_b1, ff_w2, ff_b2, ln2_g, ln2_b,
                          o_ref, *, num_heads):
    _, L, E = x_ref.shape
    d = E // num_heads
    x = x_ref[0]                                          # (L, E) f32
    mask = mask_ref[0]                                    # (L, L) f32

    # --- fused QKV projection (one matmul) + multi-head self-attention ---
    qkv = _linear(x, sa_wqkv[...], sa_bqkv[...])          # (L, 3E)
    q, k, v = qkv[:, :E], qkv[:, E:2 * E], qkv[:, 2 * E:]
    attn = _mha(q, k, v, mask, num_heads, d)
    attn = _linear(attn, sa_wo[...], sa_bo[...])
    h1 = _layernorm(x + attn, ln1_g[...], ln1_b[...])

    # --- feed-forward ---
    ff = jnp.maximum(_linear(h1, ff_w1[...], ff_b1[...]), 0.0)
    ff = _linear(ff, ff_w2[...], ff_b2[...])
    o_ref[0] = _layernorm(h1 + ff, ln2_g[...], ln2_b[...])


def _decoder_layer_kernel(x_ref, mem_ref, smask_ref, cmask_ref,
                          sa_wqkv, sa_bqkv, sa_wo, sa_bo, ln1_g, ln1_b,
                          ca_wq, ca_bq, ca_wkv, ca_bkv, ca_wo, ca_bo, ln2_g, ln2_b,
                          ff_w1, ff_b1, ff_w2, ff_b2, ln3_g, ln3_b,
                          o_ref, *, num_heads):
    _, T, E = x_ref.shape
    d = E // num_heads
    x = x_ref[0]                                          # (T, E)
    mem = mem_ref[0]                                      # (S, E)
    smask = smask_ref[0]                                  # (T, T)
    cmask = cmask_ref[0]                                  # (T, S)

    # --- masked self-attention ---
    qkv = _linear(x, sa_wqkv[...], sa_bqkv[...])
    q, k, v = qkv[:, :E], qkv[:, E:2 * E], qkv[:, 2 * E:]
    sa = _mha(q, k, v, smask, num_heads, d)
    sa = _linear(sa, sa_wo[...], sa_bo[...])
    h1 = _layernorm(x + sa, ln1_g[...], ln1_b[...])

    # --- cross-attention (fused K/V projection of memory) ---
    q = _linear(h1, ca_wq[...], ca_bq[...])               # (T, E)
    kv = _linear(mem, ca_wkv[...], ca_bkv[...])           # (S, 2E)
    k, v = kv[:, :E], kv[:, E:]
    ca = _mha(q, k, v, cmask, num_heads, d)
    ca = _linear(ca, ca_wo[...], ca_bo[...])
    h2 = _layernorm(h1 + ca, ln2_g[...], ln2_b[...])

    # --- feed-forward ---
    ff = jnp.maximum(_linear(h2, ff_w1[...], ff_b1[...]), 0.0)
    ff = _linear(ff, ff_w2[...], ff_b2[...])
    o_ref[0] = _layernorm(h2 + ff, ln3_g[...], ln3_b[...])


def _generator_kernel(x_ref, w_ref, b_ref, o_ref):
    o_ref[...] = (jnp.dot(x_ref[...].astype(jnp.bfloat16), w_ref[...],
                          preferred_element_type=jnp.float32) + b_ref[...])


# ----------------------------------------------------------------------------
# Pallas wrappers
# ----------------------------------------------------------------------------

def _whole_spec(a):
    """Whole-array block that never changes with the grid index (stays in VMEM)."""
    zeros = (0,) * a.ndim
    return pl.BlockSpec(tuple(a.shape), lambda n, _z=zeros: _z)


def _batch_spec(a):
    """Per-batch-element block of a batch-major rank-3 array."""
    zeros = (0,) * (a.ndim - 1)
    return pl.BlockSpec((1,) + tuple(a.shape[1:]), lambda n, _z=zeros: (n,) + _z)


def encoder_layer(x, mask, p, num_heads):
    """x: (N, S, E) f32, mask: (N, S, S) additive f32."""
    N, L, E = x.shape
    weights = (p['sa_wqkv'], p['sa_bqkv'], p['sa_wo'], p['sa_bo'],
               p['ln1_g'], p['ln1_b'],
               p['ff_w1'], p['ff_b1'], p['ff_w2'], p['ff_b2'],
               p['ln2_g'], p['ln2_b'])
    return pl.pallas_call(
        functools.partial(_encoder_layer_kernel, num_heads=num_heads),
        out_shape=jax.ShapeDtypeStruct((N, L, E), jnp.float32),
        grid=(N,),
        in_specs=[_batch_spec(x), _batch_spec(mask)] + [_whole_spec(w) for w in weights],
        out_specs=_batch_spec(x),
        compiler_params=pltpu.CompilerParams(dimension_semantics=("parallel",)),
    )(x, mask, *weights)


def decoder_layer(x, memory, smask, cmask, p, num_heads):
    """x: (N, T, E), memory: (N, S, E), smask: (N, T, T), cmask: (N, T, S)."""
    N, T, E = x.shape
    weights = (p['sa_wqkv'], p['sa_bqkv'], p['sa_wo'], p['sa_bo'],
               p['ln1_g'], p['ln1_b'],
               p['ca_wq'], p['ca_bq'], p['ca_wkv'], p['ca_bkv'],
               p['ca_wo'], p['ca_bo'], p['ln2_g'], p['ln2_b'],
               p['ff_w1'], p['ff_b1'], p['ff_w2'], p['ff_b2'],
               p['ln3_g'], p['ln3_b'])
    return pl.pallas_call(
        functools.partial(_decoder_layer_kernel, num_heads=num_heads),
        out_shape=jax.ShapeDtypeStruct((N, T, E), jnp.float32),
        grid=(N,),
        in_specs=[_batch_spec(x), _batch_spec(memory), _batch_spec(smask),
                  _batch_spec(cmask)] + [_whole_spec(w) for w in weights],
        out_specs=_batch_spec(x),
        compiler_params=pltpu.CompilerParams(dimension_semantics=("parallel",)),
    )(x, memory, smask, cmask, *weights)


def pallas_generator(x2d, w_bf16, b_f32):
    """x2d: (M, E) f32, w: (E, Vp) bf16 (Vp multiple of 128), b: (1, Vp) f32."""
    M, K = x2d.shape
    Vp = w_bf16.shape[1]
    tn = 512 if Vp % 512 == 0 else Vp        # lane-dense vocab tiles, multiple of 128
    return pl.pallas_call(
        _generator_kernel,
        out_shape=jax.ShapeDtypeStruct((M, Vp), jnp.float32),
        grid=(Vp // tn,),
        in_specs=[pl.BlockSpec((M, K), lambda j: (0, 0)),
                  pl.BlockSpec((K, tn), lambda j: (0, j)),
                  pl.BlockSpec((1, tn), lambda j: (0, j))],
        out_specs=pl.BlockSpec((M, tn), lambda j: (0, j)),
        compiler_params=pltpu.CompilerParams(dimension_semantics=("parallel",)),
    )(x2d, w_bf16, b_f32)


# ----------------------------------------------------------------------------
# Model glue (embedding gather, positional encoding, mask building in plain JAX)
# ----------------------------------------------------------------------------

def build_additive_mask(attn_mask, key_padding_mask, N, Lq, Ls):
    """Combine float attn_mask (Lq,Ls) and boolean key_padding_mask (N,Ls) into a
    per-batch additive mask (N, Lq, Ls).  Heads share it (broadcast in-kernel).
    -inf in the incoming mask is clamped to a large finite negative."""
    m = jnp.zeros((N, Lq, Ls), jnp.float32)
    if attn_mask is not None:
        m = m + jnp.maximum(attn_mask.astype(jnp.float32), _NEG_INF)[None, :, :]
    if key_padding_mask is not None:
        m = m + jnp.where(key_padding_mask, _NEG_INF, 0.0).astype(jnp.float32)[:, None, :]
    return jnp.maximum(m, _NEG_INF)


def morpheme_restore_forward(prep, source, target, source_mask, target_mask,
                             source_padding_mask, target_padding_mask,
                             memory_key_padding_mask):
    E = prep['emb_dim']
    H = prep['num_heads']
    S, N = source.shape
    T = target.shape[0]

    # TODO(synk): embedding gather + positional add stay in XLA (tiny, no Pallas win).
    scale = math.sqrt(E)
    src = jnp.take(prep['src_emb'], source, axis=0) * scale + prep['pos_emb'][:S]  # (S,N,E)
    tgt = jnp.take(prep['tgt_emb'], target, axis=0) * scale + prep['pos_emb'][:T]  # (T,N,E)

    # Kernels run batch-major; one transpose in, one out.
    src = src.transpose(1, 0, 2)                                                   # (N,S,E)
    tgt = tgt.transpose(1, 0, 2)                                                   # (N,T,E)

    enc_mask = build_additive_mask(source_mask, source_padding_mask, N, S, S)
    dec_self_mask = build_additive_mask(target_mask, target_padding_mask, N, T, T)
    dec_cross_mask = build_additive_mask(None, memory_key_padding_mask, N, T, S)

    memory = src
    for lp in prep['enc_layers']:
        memory = encoder_layer(memory, enc_mask, lp, H)

    x = tgt
    for lp in prep['dec_layers']:
        x = decoder_layer(x, memory, dec_self_mask, dec_cross_mask, lp, H)

    logits = pallas_generator(x.reshape(N * T, E), prep['gen_w'], prep['gen_b'])
    logits = logits.reshape(N, T, -1).transpose(1, 0, 2)[:, :, :prep['tgt_vocab']]
    return logits                                                                  # (T,N,V)


# ----------------------------------------------------------------------------
# Parameter construction (PyTorch layout) and kernel-friendly preparation
# ----------------------------------------------------------------------------

def make_positional_encoding(emb_size, maxlen):
    den = jnp.exp(-jnp.arange(0, emb_size, 2, dtype=jnp.float32)
                  * math.log(10000.0) / emb_size)
    pos = jnp.arange(0, maxlen, dtype=jnp.float32).reshape(maxlen, 1)
    pe = jnp.zeros((maxlen, emb_size), jnp.float32)
    pe = pe.at[:, 0::2].set(jnp.sin(pos * den))
    pe = pe.at[:, 1::2].set(jnp.cos(pos * den))
    return pe[:, None, :]   # (maxlen, 1, emb)


def make_params(key, *, num_encoder_layers, num_decoder_layers, embedding_dim,
                source_vocab_size, target_vocab_size, num_heads,
                feedforward_dim, maxlen=64):
    keys = iter(jax.random.split(key, 256))

    def w(shape, scale=0.02):
        return jax.random.normal(next(keys), shape, jnp.float32) * scale

    E, FF = embedding_dim, feedforward_dim

    def attn_block(prefix):
        return {prefix + '_in_w': w((3 * E, E)),
                prefix + '_in_b': jnp.zeros((3 * E,), jnp.float32),
                prefix + '_out_w': w((E, E)),
                prefix + '_out_b': jnp.zeros((E,), jnp.float32)}

    def ffn_block():
        return {'l1_w': w((FF, E)), 'l1_b': jnp.zeros((FF,), jnp.float32),
                'l2_w': w((E, FF)), 'l2_b': jnp.zeros((E,), jnp.float32)}

    def ln(name):
        return {name + '_g': jnp.ones((E,), jnp.float32),
                name + '_b': jnp.zeros((E,), jnp.float32)}

    enc_layers = []
    for _ in range(num_encoder_layers):
        p = {}
        p.update(attn_block('sa')); p.update(ffn_block())
        p.update(ln('ln1')); p.update(ln('ln2'))
        enc_layers.append(p)

    dec_layers = []
    for _ in range(num_decoder_layers):
        p = {}
        p.update(attn_block('sa')); p.update(attn_block('ca')); p.update(ffn_block())
        p.update(ln('ln1')); p.update(ln('ln2')); p.update(ln('ln3'))
        dec_layers.append(p)

    return {'emb_dim': E, 'num_heads': num_heads,
            'src_emb': w((source_vocab_size, E), scale=1.0),
            'tgt_emb': w((target_vocab_size, E), scale=1.0),
            'pos_emb': make_positional_encoding(E, maxlen),
            'enc_layers': enc_layers, 'dec_layers': dec_layers,
            'gen_w': w((target_vocab_size, E)),
            'gen_b': jnp.zeros((target_vocab_size,), jnp.float32)}


def prepare_params(params):
    """One-time conversion to kernel layout: weights pre-transposed to (K, N) bf16,
    biases/LN params as (1, N) f32, 1/sqrt(head_dim) folded into Q projections,
    generator vocab padded to a multiple of 128 (lane-dense logits store)."""
    E = params['emb_dim']
    H = params['num_heads']
    qs = 1.0 / math.sqrt(E // H)

    def lin(w, b):
        return w.T.astype(jnp.bfloat16), b.reshape(1, -1).astype(jnp.float32)

    def lnp(g, b):
        return g.reshape(1, -1).astype(jnp.float32), b.reshape(1, -1).astype(jnp.float32)

    def enc(p):
        sa_wqkv, sa_bqkv = lin(p['sa_in_w'].at[:E].multiply(qs),
                               p['sa_in_b'].at[:E].multiply(qs))
        sa_wo, sa_bo = lin(p['sa_out_w'], p['sa_out_b'])
        ff_w1, ff_b1 = lin(p['l1_w'], p['l1_b'])
        ff_w2, ff_b2 = lin(p['l2_w'], p['l2_b'])
        g1, b1 = lnp(p['ln1_g'], p['ln1_b'])
        g2, b2 = lnp(p['ln2_g'], p['ln2_b'])
        return dict(sa_wqkv=sa_wqkv, sa_bqkv=sa_bqkv, sa_wo=sa_wo, sa_bo=sa_bo,
                    ln1_g=g1, ln1_b=b1, ff_w1=ff_w1, ff_b1=ff_b1,
                    ff_w2=ff_w2, ff_b2=ff_b2, ln2_g=g2, ln2_b=b2)

    def dec(p):
        sa_wqkv, sa_bqkv = lin(p['sa_in_w'].at[:E].multiply(qs),
                               p['sa_in_b'].at[:E].multiply(qs))
        sa_wo, sa_bo = lin(p['sa_out_w'], p['sa_out_b'])
        ca_wq, ca_bq = lin(p['ca_in_w'][:E] * qs, p['ca_in_b'][:E] * qs)
        ca_wkv, ca_bkv = lin(p['ca_in_w'][E:], p['ca_in_b'][E:])
        ca_wo, ca_bo = lin(p['ca_out_w'], p['ca_out_b'])
        ff_w1, ff_b1 = lin(p['l1_w'], p['l1_b'])
        ff_w2, ff_b2 = lin(p['l2_w'], p['l2_b'])
        g1, b1 = lnp(p['ln1_g'], p['ln1_b'])
        g2, b2 = lnp(p['ln2_g'], p['ln2_b'])
        g3, b3 = lnp(p['ln3_g'], p['ln3_b'])
        return dict(sa_wqkv=sa_wqkv, sa_bqkv=sa_bqkv, sa_wo=sa_wo, sa_bo=sa_bo,
                    ln1_g=g1, ln1_b=b1,
                    ca_wq=ca_wq, ca_bq=ca_bq, ca_wkv=ca_wkv, ca_bkv=ca_bkv,
                    ca_wo=ca_wo, ca_bo=ca_bo, ln2_g=g2, ln2_b=b2,
                    ff_w1=ff_w1, ff_b1=ff_b1, ff_w2=ff_w2, ff_b2=ff_b2,
                    ln3_g=g3, ln3_b=b3)

    V = params['gen_w'].shape[0]
    Vp = ((V + 127) // 128) * 128
    gen_w = jnp.zeros((E, Vp), jnp.bfloat16).at[:, :V].set(
        params['gen_w'].T.astype(jnp.bfloat16))
    gen_b = jnp.zeros((1, Vp), jnp.float32).at[:, :V].set(
        params['gen_b'].reshape(1, -1))

    return {'emb_dim': E, 'num_heads': H, 'tgt_vocab': V,
            'src_emb': params['src_emb'], 'tgt_emb': params['tgt_emb'],
            'pos_emb': params['pos_emb'],
            'enc_layers': [enc(p) for p in params['enc_layers']],
            'dec_layers': [dec(p) for p in params['dec_layers']],
            'gen_w': gen_w, 'gen_b': gen_b}


# ----------------------------------------------------------------------------
# Main
# ----------------------------------------------------------------------------

if __name__ == "__main__":
    NUM_ENC_LAYERS = 2
    NUM_DEC_LAYERS = 2
    EMB_DIM = 32
    SRC_VOCAB = 50
    TGT_VOCAB = 40
    NUM_HEADS = 4
    FF_DIM = 64
    S_LEN, T_LEN, BATCH = 8, 8, 2

    root = jax.random.PRNGKey(0)
    k_param, k_src, k_tgt = jax.random.split(root, 3)

    params = make_params(
        k_param,
        num_encoder_layers=NUM_ENC_LAYERS,
        num_decoder_layers=NUM_DEC_LAYERS,
        embedding_dim=EMB_DIM,
        source_vocab_size=SRC_VOCAB,
        target_vocab_size=TGT_VOCAB,
        num_heads=NUM_HEADS,
        feedforward_dim=FF_DIM,
    )
    prep = prepare_params(params)

    # Inputs: (seq, batch) tokens, PyTorch batch_first=False convention
    source = jax.random.randint(k_src, (S_LEN, BATCH), 0, SRC_VOCAB, jnp.int32)
    target = jax.random.randint(k_tgt, (T_LEN, BATCH), 0, TGT_VOCAB, jnp.int32)

    # source_mask: zeros (no masking); target_mask: causal (-inf above diagonal,
    # clamped to a finite negative inside build_additive_mask)
    source_mask = jnp.zeros((S_LEN, S_LEN), jnp.float32)
    causal = jnp.triu(jnp.ones((T_LEN, T_LEN), jnp.bool_), k=1)
    target_mask = jnp.where(causal, -jnp.inf, 0.0).astype(jnp.float32)

    # Padding masks (True = ignore); pad the tail of batch element 1
    src_pad = jnp.zeros((BATCH, S_LEN), jnp.bool_).at[1, -2:].set(True)
    tgt_pad = jnp.zeros((BATCH, T_LEN), jnp.bool_).at[1, -1:].set(True)
    mem_pad = src_pad

    fwd = jax.jit(functools.partial(morpheme_restore_forward, prep))
    logits = fwd(source, target, source_mask, target_mask, src_pad, tgt_pad, mem_pad)
    jax.block_until_ready(logits)

    assert logits.shape == (T_LEN, BATCH, TGT_VOCAB)
    assert bool(jnp.all(jnp.isfinite(logits)))
    print("KERNEL_OK")
</pallas_src>

<mosaic_0001>
module attributes {stable_mosaic.version = 11 : i64} {
  func.func @_encoder_layer_kernel(%arg0: i32, %arg1: memref<1x8x32xf32, #tpu.memory_space<vmem>>, %arg2: memref<1x8x8xf32, #tpu.memory_space<vmem>>, %arg3: memref<32x96xbf16, #tpu.memory_space<vmem>>, %arg4: memref<1x96xf32, #tpu.memory_space<vmem>>, %arg5: memref<32x32xbf16, #tpu.memory_space<vmem>>, %arg6: memref<1x32xf32, #tpu.memory_space<vmem>>, %arg7: memref<1x32xf32, #tpu.memory_space<vmem>>, %arg8: memref<1x32xf32, #tpu.memory_space<vmem>>, %arg9: memref<32x64xbf16, #tpu.memory_space<vmem>>, %arg10: memref<1x64xf32, #tpu.memory_space<vmem>>, %arg11: memref<64x32xbf16, #tpu.memory_space<vmem>>, %arg12: memref<1x32xf32, #tpu.memory_space<vmem>>, %arg13: memref<1x32xf32, #tpu.memory_space<vmem>>, %arg14: memref<1x32xf32, #tpu.memory_space<vmem>>, %arg15: memref<1x8x32xf32, #tpu.memory_space<vmem>>) attributes {dimension_semantics = [#tpu.dimension_semantics<parallel>], iteration_bounds = array<i64: 2>, scalar_prefetch = 0 : i64, scratch_operands = 0 : i64, tpu.core_type = #tpu.core_type<tc>, window_params = [{transform_indices = @transform_0, window_bounds = array<i64: 1, 8, 32>}, {transform_indices = @transform_1, window_bounds = array<i64: 1, 8, 8>}, {pipeline_mode = #tpu.pipeline_mode<synchronous>, transform_indices = @transform_2, window_bounds = array<i64: 32, 96>}, {pipeline_mode = #tpu.pipeline_mode<synchronous>, transform_indices = @transform_3, window_bounds = array<i64: 1, 96>}, {pipeline_mode = #tpu.pipeline_mode<synchronous>, transform_indices = @transform_4, window_bounds = array<i64: 32, 32>}, {pipeline_mode = #tpu.pipeline_mode<synchronous>, transform_indices = @transform_5, window_bounds = array<i64: 1, 32>}, {pipeline_mode = #tpu.pipeline_mode<synchronous>, transform_indices = @transform_6, window_bounds = array<i64: 1, 32>}, {pipeline_mode = #tpu.pipeline_mode<synchronous>, transform_indices = @transform_7, window_bounds = array<i64: 1, 32>}, {pipeline_mode = #tpu.pipeline_mode<synchronous>, transform_indices = @transform_8, window_bounds = array<i64: 32, 64>}, {pipeline_mode = #tpu.pipeline_mode<synchronous>, transform_indices = @transform_9, window_bounds = array<i64: 1, 64>}, {pipeline_mode = #tpu.pipeline_mode<synchronous>, transform_indices = @transform_10, window_bounds = array<i64: 64, 32>}, {pipeline_mode = #tpu.pipeline_mode<synchronous>, transform_indices = @transform_11, window_bounds = array<i64: 1, 32>}, {pipeline_mode = #tpu.pipeline_mode<synchronous>, transform_indices = @transform_12, window_bounds = array<i64: 1, 32>}, {pipeline_mode = #tpu.pipeline_mode<synchronous>, transform_indices = @transform_13, window_bounds = array<i64: 1, 32>}, {transform_indices = @transform_14, window_bounds = array<i64: 1, 8, 32>}]} {
    %c0 = arith.constant 0 : index
    %c0_0 = arith.constant 0 : index
    %c0_1 = arith.constant 0 : index
    %0 = vector.load %arg1[%c0, %c0_0, %c0_1] : memref<1x8x32xf32, #tpu.memory_space<vmem>>, vector<1x8x32xf32>
    %1 = vector.shape_cast %0 : vector<1x8x32xf32> to vector<8x32xf32>
    %c0_2 = arith.constant 0 : index
    %c0_3 = arith.constant 0 : index
    %c0_4 = arith.constant 0 : index
    %2 = vector.load %arg2[%c0_2, %c0_3, %c0_4] : memref<1x8x8xf32, #tpu.memory_space<vmem>>, vector<1x8x8xf32>
    %3 = vector.shape_cast %2 : vector<1x8x8xf32> to vector<8x8xf32>
    %c0_5 = arith.constant 0 : index
    %c0_6 = arith.constant 0 : index
    %4 = vector.load %arg3[%c0_5, %c0_6] : memref<32x96xbf16, #tpu.memory_space<vmem>>, vector<32x96xbf16>
    %c0_7 = arith.constant 0 : index
    %c0_8 = arith.constant 0 : index
    %5 = vector.load %arg4[%c0_7, %c0_8] : memref<1x96xf32, #tpu.memory_space<vmem>>, vector<1x96xf32>
    %6 = arith.truncf %1 : vector<8x32xf32> to vector<8x32xbf16>
    %cst = arith.constant dense<0.000000e+00> : vector<8x96xf32>
    %7 = tpu.matmul %6, %4, %cst {dimension_numbers = #tpu.dot_dimension_numbers<[1], [0], [0], [1], [0, 0, 1, 1], [], []>} : vector<8x32xbf16>, vector<32x96xbf16>, vector<8x96xf32> -> vector<8x96xf32>
    %8 = vector.broadcast %5 : vector<1x96xf32> to vector<8x96xf32>
    %9 = arith.addf %7, %8 : vector<8x96xf32>
    %10 = vector.extract_strided_slice %9 {offsets = [0, 0], sizes = [8, 32], strides = [1, 1]} : vector<8x96xf32> to vector<8x32xf32>
    %11 = vector.extract_strided_slice %9 {offsets = [0, 32], sizes = [8, 32], strides = [1, 1]} : vector<8x96xf32> to vector<8x32xf32>
    %12 = vector.extract_strided_slice %9 {offsets = [0, 64], sizes = [8, 32], strides = [1, 1]} : vector<8x96xf32> to vector<8x32xf32>
    %13 = vector.extract_strided_slice %10 {offsets = [0, 0], sizes = [8, 8], strides = [1, 1]} : vector<8x32xf32> to vector<8x8xf32>
    %14 = arith.truncf %13 : vector<8x8xf32> to vector<8x8xbf16>
    %15 = vector.extract_strided_slice %11 {offsets = [0, 0], sizes = [8, 8], strides = [1, 1]} : vector<8x32xf32> to vector<8x8xf32>
    %16 = arith.truncf %15 : vector<8x8xf32> to vector<8x8xbf16>
    %17 = vector.extract_strided_slice %12 {offsets = [0, 0], sizes = [8, 8], strides = [1, 1]} : vector<8x32xf32> to vector<8x8xf32>
    %18 = arith.truncf %17 : vector<8x8xf32> to vector<8x8xbf16>
    %cst_9 = arith.constant dense<0.000000e+00> : vector<8x8xf32>
    %19 = tpu.matmul %14, %16, %cst_9 {dimension_numbers = #tpu.dot_dimension_numbers<[1], [1], [0], [0], [0, 0, 1, 0], [], []>} : vector<8x8xbf16>, vector<8x8xbf16>, vector<8x8xf32> -> vector<8x8xf32>
    %20 = arith.addf %19, %3 : vector<8x8xf32>
    %cst_10 = arith.constant dense<0xFF800000> : vector<8xf32>
    %21 = vector.multi_reduction <maximumf>, %20, %cst_10 [1] : vector<8x8xf32> to vector<8xf32>
    %22 = vector.shape_cast %21 : vector<8xf32> to vector<8x1xf32>
    %23 = vector.broadcast %22 : vector<8x1xf32> to vector<8x8xf32>
    %24 = arith.subf %20, %23 : vector<8x8xf32>
    %25 = math.exp %24 : vector<8x8xf32>
    %cst_11 = arith.constant dense<0.000000e+00> : vector<8xf32>
    %26 = vector.multi_reduction <add>, %25, %cst_11 [1] : vector<8x8xf32> to vector<8xf32>
    %27 = vector.shape_cast %26 : vector<8xf32> to vector<8x1xf32>
    %28 = tpu.reciprocal %27 {approx = true} : vector<8x1xf32> -> vector<8x1xf32>
    %29 = vector.broadcast %28 : vector<8x1xf32> to vector<8x8xf32>
    %30 = arith.mulf %25, %29 : vector<8x8xf32>
    %31 = arith.truncf %30 : vector<8x8xf32> to vector<8x8xbf16>
    %cst_12 = arith.constant dense<0.000000e+00> : vector<8x8xf32>
    %32 = tpu.matmul %31, %18, %cst_12 {dimension_numbers = #tpu.dot_dimension_numbers<[1], [0], [0], [1], [0, 0, 1, 1], [], []>} : vector<8x8xbf16>, vector<8x8xbf16>, vector<8x8xf32> -> vector<8x8xf32>
    %33 = vector.extract_strided_slice %10 {offsets = [0, 8], sizes = [8, 8], strides = [1, 1]} : vector<8x32xf32> to vector<8x8xf32>
    %34 = arith.truncf %33 : vector<8x8xf32> to vector<8x8xbf16>
    %35 = vector.extract_strided_slice %11 {offsets = [0, 8], sizes = [8, 8], strides = [1, 1]} : vector<8x32xf32> to vector<8x8xf32>
    %36 = arith.truncf %35 : vector<8x8xf32> to vector<8x8xbf16>
    %37 = vector.extract_strided_slice %12 {offsets = [0, 8], sizes = [8, 8], strides = [1, 1]} : vector<8x32xf32> to vector<8x8xf32>
    %38 = arith.truncf %37 : vector<8x8xf32> to vector<8x8xbf16>
    %cst_13 = arith.constant dense<0.000000e+00> : vector<8x8xf32>
    %39 = tpu.matmul %34, %36, %cst_13 {dimension_numbers = #tpu.dot_dimension_numbers<[1], [1], [0], [0], [0, 0, 1, 0], [], []>} : vector<8x8xbf16>, vector<8x8xbf16>, vector<8x8xf32> -> vector<8x8xf32>
    %40 = arith.addf %39, %3 : vector<8x8xf32>
    %cst_14 = arith.constant dense<0xFF800000> : vector<8xf32>
    %41 = vector.multi_reduction <maximumf>, %40, %cst_14 [1] : vector<8x8xf32> to vector<8xf32>
    %42 = vector.shape_cast %41 : vector<8xf32> to vector<8x1xf32>
    %43 = vector.broadcast %42 : vector<8x1xf32> to vector<8x8xf32>
    %44 = arith.subf %40, %43 : vector<8x8xf32>
    %45 = math.exp %44 : vector<8x8xf32>
    %cst_15 = arith.constant dense<0.000000e+00> : vector<8xf32>
    %46 = vector.multi_reduction <add>, %45, %cst_15 [1] : vector<8x8xf32> to vector<8xf32>
    %47 = vector.shape_cast %46 : vector<8xf32> to vector<8x1xf32>
    %48 = tpu.reciprocal %47 {approx = true} : vector<8x1xf32> -> vector<8x1xf32>
    %49 = vector.broadcast %48 : vector<8x1xf32> to vector<8x8xf32>
    %50 = arith.mulf %45, %49 : vector<8x8xf32>
    %51 = arith.truncf %50 : vector<8x8xf32> to vector<8x8xbf16>
    %cst_16 = arith.constant dense<0.000000e+00> : vector<8x8xf32>
    %52 = tpu.matmul %51, %38, %cst_16 {dimension_numbers = #tpu.dot_dimension_numbers<[1], [0], [0], [1], [0, 0, 1, 1], [], []>} : vector<8x8xbf16>, vector<8x8xbf16>, vector<8x8xf32> -> vector<8x8xf32>
    %53 = vector.extract_strided_slice %10 {offsets = [0, 16], sizes = [8, 8], strides = [1, 1]} : vector<8x32xf32> to vector<8x8xf32>
    %54 = arith.truncf %53 : vector<8x8xf32> to vector<8x8xbf16>
    %55 = vector.extract_strided_slice %11 {offsets = [0, 16], sizes = [8, 8], strides = [1, 1]} : vector<8x32xf32> to vector<8x8xf32>
    %56 = arith.truncf %55 : vector<8x8xf32> to vector<8x8xbf16>
    %57 = vector.extract_strided_slice %12 {offsets = [0, 16], sizes = [8, 8], strides = [1, 1]} : vector<8x32xf32> to vector<8x8xf32>
    %58 = arith.truncf %57 : vector<8x8xf32> to vector<8x8xbf16>
    %cst_17 = arith.constant dense<0.000000e+00> : vector<8x8xf32>
    %59 = tpu.matmul %54, %56, %cst_17 {dimension_numbers = #tpu.dot_dimension_numbers<[1], [1], [0], [0], [0, 0, 1, 0], [], []>} : vector<8x8xbf16>, vector<8x8xbf16>, vector<8x8xf32> -> vector<8x8xf32>
    %60 = arith.addf %59, %3 : vector<8x8xf32>
    %cst_18 = arith.constant dense<0xFF800000> : vector<8xf32>
    %61 = vector.multi_reduction <maximumf>, %60, %cst_18 [1] : vector<8x8xf32> to vector<8xf32>
    %62 = vector.shape_cast %61 : vector<8xf32> to vector<8x1xf32>
    %63 = vector.broadcast %62 : vector<8x1xf32> to vector<8x8xf32>
    %64 = arith.subf %60, %63 : vector<8x8xf32>
    %65 = math.exp %64 : vector<8x8xf32>
    %cst_19 = arith.constant dense<0.000000e+00> : vector<8xf32>
    %66 = vector.multi_reduction <add>, %65, %cst_19 [1] : vector<8x8xf32> to vector<8xf32>
    %67 = vector.shape_cast %66 : vector<8xf32> to vector<8x1xf32>
    %68 = tpu.reciprocal %67 {approx = true} : vector<8x1xf32> -> vector<8x1xf32>
    %69 = vector.broadcast %68 : vector<8x1xf32> to vector<8x8xf32>
    %70 = arith.mulf %65, %69 : vector<8x8xf32>
    %71 = arith.truncf %70 : vector<8x8xf32> to vector<8x8xbf16>
    %cst_20 = arith.constant dense<0.000000e+00> : vector<8x8xf32>
    %72 = tpu.matmul %71, %58, %cst_20 {dimension_numbers = #tpu.dot_dimension_numbers<[1], [0], [0], [1], [0, 0, 1, 1], [], []>} : vector<8x8xbf16>, vector<8x8xbf16>, vector<8x8xf32> -> vector<8x8xf32>
    %73 = vector.extract_strided_slice %10 {offsets = [0, 24], sizes = [8, 8], strides = [1, 1]} : vector<8x32xf32> to vector<8x8xf32>
    %74 = arith.truncf %73 : vector<8x8xf32> to vector<8x8xbf16>
    %75 = vector.extract_strided_slice %11 {offsets = [0, 24], sizes = [8, 8], strides = [1, 1]} : vector<8x32xf32> to vector<8x8xf32>
    %76 = arith.truncf %75 : vector<8x8xf32> to vector<8x8xbf16>
    %77 = vector.extract_strided_slice %12 {offsets = [0, 24], sizes = [8, 8], strides = [1, 1]} : vector<8x32xf32> to vector<8x8xf32>
    %78 = arith.truncf %77 : vector<8x8xf32> to vector<8x8xbf16>
    %cst_21 = arith.constant dense<0.000000e+00> : vector<8x8xf32>
    %79 = tpu.matmul %74, %76, %cst_21 {dimension_numbers = #tpu.dot_dimension_numbers<[1], [1], [0], [0], [0, 0, 1, 0], [], []>} : vector<8x8xbf16>, vector<8x8xbf16>, vector<8x8xf32> -> vector<8x8xf32>
    %80 = arith.addf %79, %3 : vector<8x8xf32>
    %cst_22 = arith.constant dense<0xFF800000> : vector<8xf32>
    %81 = vector.multi_reduction <maximumf>, %80, %cst_22 [1] : vector<8x8xf32> to vector<8xf32>
    %82 = vector.shape_cast %81 : vector<8xf32> to vector<8x1xf32>
    %83 = vector.broadcast %82 : vector<8x1xf32> to vector<8x8xf32>
    %84 = arith.subf %80, %83 : vector<8x8xf32>
    %85 = math.exp %84 : vector<8x8xf32>
    %cst_23 = arith.constant dense<0.000000e+00> : vector<8xf32>
    %86 = vector.multi_reduction <add>, %85, %cst_23 [1] : vector<8x8xf32> to vector<8xf32>
    %87 = vector.shape_cast %86 : vector<8xf32> to vector<8x1xf32>
    %88 = tpu.reciprocal %87 {approx = true} : vector<8x1xf32> -> vector<8x1xf32>
    %89 = vector.broadcast %88 : vector<8x1xf32> to vector<8x8xf32>
    %90 = arith.mulf %85, %89 : vector<8x8xf32>
    %91 = arith.truncf %90 : vector<8x8xf32> to vector<8x8xbf16>
    %cst_24 = arith.constant dense<0.000000e+00> : vector<8x8xf32>
    %92 = tpu.matmul %91, %78, %cst_24 {dimension_numbers = #tpu.dot_dimension_numbers<[1], [0], [0], [1], [0, 0, 1, 1], [], []>} : vector<8x8xbf16>, vector<8x8xbf16>, vector<8x8xf32> -> vector<8x8xf32>
    %93 = tpu.concatenate %32, %52, %72, %92 in 1 : vector<8x8xf32>, vector<8x8xf32>, vector<8x8xf32>, vector<8x8xf32> -> vector<8x32xf32>
    %c0_25 = arith.constant 0 : index
    %c0_26 = arith.constant 0 : index
    %94 = vector.load %arg5[%c0_25, %c0_26] : memref<32x32xbf16, #tpu.memory_space<vmem>>, vector<32x32xbf16>
    %c0_27 = arith.constant 0 : index
    %c0_28 = arith.constant 0 : index
    %95 = vector.load %arg6[%c0_27, %c0_28] : memref<1x32xf32, #tpu.memory_space<vmem>>, vector<1x32xf32>
    %96 = arith.truncf %93 : vector<8x32xf32> to vector<8x32xbf16>
    %cst_29 = arith.constant dense<0.000000e+00> : vector<8x32xf32>
    %97 = tpu.matmul %96, %94, %cst_29 {dimension_numbers = #tpu.dot_dimension_numbers<[1], [0], [0], [1], [0, 0, 1, 1], [], []>} : vector<8x32xbf16>, vector<32x32xbf16>, vector<8x32xf32> -> vector<8x32xf32>
    %98 = vector.broadcast %95 : vector<1x32xf32> to vector<8x32xf32>
    %99 = arith.addf %97, %98 : vector<8x32xf32>
    %100 = arith.addf %1, %99 : vector<8x32xf32>
    %c0_30 = arith.constant 0 : index
    %c0_31 = arith.constant 0 : index
    %101 = vector.load %arg7[%c0_30, %c0_31] : memref<1x32xf32, #tpu.memory_space<vmem>>, vector<1x32xf32>
    %c0_32 = arith.constant 0 : index
    %c0_33 = arith.constant 0 : index
    %102 = vector.load %arg8[%c0_32, %c0_33] : memref<1x32xf32, #tpu.memory_space<vmem>>, vector<1x32xf32>
    %cst_34 = arith.constant dense<0.000000e+00> : vector<8xf32>
    %103 = vector.multi_reduction <add>, %100, %cst_34 [1] : vector<8x32xf32> to vector<8xf32>
    %104 = vector.shape_cast %103 : vector<8xf32> to vector<8x1xf32>
    %cst_35 = arith.constant 3.200000e+01 : f32
    %105 = vector.broadcast %cst_35 : f32 to vector<8x1xf32>
    %106 = arith.divf %104, %105 : vector<8x1xf32>
    %107 = vector.broadcast %106 : vector<8x1xf32> to vector<8x32xf32>
    %108 = arith.subf %100, %107 : vector<8x32xf32>
    %109 = arith.mulf %108, %108 : vector<8x32xf32>
    %cst_36 = arith.constant dense<0.000000e+00> : vector<8xf32>
    %110 = vector.multi_reduction <add>, %109, %cst_36 [1] : vector<8x32xf32> to vector<8xf32>
    %111 = vector.shape_cast %110 : vector<8xf32> to vector<8x1xf32>
    %cst_37 = arith.constant 3.200000e+01 : f32
    %112 = vector.broadcast %cst_37 : f32 to vector<8x1xf32>
    %113 = arith.divf %111, %112 : vector<8x1xf32>
    %114 = vector.broadcast %106 : vector<8x1xf32> to vector<8x32xf32>
    %115 = arith.subf %100, %114 : vector<8x32xf32>
    %cst_38 = arith.constant 9.99999974E-6 : f32
    %116 = vector.broadcast %cst_38 : f32 to vector<8x1xf32>
    %117 = arith.addf %113, %116 : vector<8x1xf32>
    %118 = math.rsqrt %117 : vector<8x1xf32>
    %119 = vector.broadcast %118 : vector<8x1xf32> to vector<8x32xf32>
    %120 = arith.mulf %115, %119 : vector<8x32xf32>
    %121 = vector.broadcast %101 : vector<1x32xf32> to vector<8x32xf32>
    %122 = arith.mulf %120, %121 : vector<8x32xf32>
    %123 = vector.broadcast %102 : vector<1x32xf32> to vector<8x32xf32>
    %124 = arith.addf %122, %123 : vector<8x32xf32>
    %c0_39 = arith.constant 0 : index
    %c0_40 = arith.constant 0 : index
    %125 = vector.load %arg9[%c0_39, %c0_40] : memref<32x64xbf16, #tpu.memory_space<vmem>>, vector<32x64xbf16>
    %c0_41 = arith.constant 0 : index
    %c0_42 = arith.constant 0 : index
    %126 = vector.load %arg10[%c0_41, %c0_42] : memref<1x64xf32, #tpu.memory_space<vmem>>, vector<1x64xf32>
    %127 = arith.truncf %124 : vector<8x32xf32> to vector<8x32xbf16>
    %cst_43 = arith.constant dense<0.000000e+00> : vector<8x64xf32>
    %128 = tpu.matmul %127, %125, %cst_43 {dimension_numbers = #tpu.dot_dimension_numbers<[1], [0], [0], [1], [0, 0, 1, 1], [], []>} : vector<8x32xbf16>, vector<32x64xbf16>, vector<8x64xf32> -> vector<8x64xf32>
    %129 = vector.broadcast %126 : vector<1x64xf32> to vector<8x64xf32>
    %130 = arith.addf %128, %129 : vector<8x64xf32>
    %cst_44 = arith.constant 0.000000e+00 : f32
    %131 = vector.broadcast %cst_44 : f32 to vector<8x64xf32>
    %132 = arith.maximumf %130, %131 : vector<8x64xf32>
    %c0_45 = arith.constant 0 : index
    %c0_46 = arith.constant 0 : index
    %133 = vector.load %arg11[%c0_45, %c0_46] : memref<64x32xbf16, #tpu.memory_space<vmem>>, vector<64x32xbf16>
    %c0_47 = arith.constant 0 : index
    %c0_48 = arith.constant 0 : index
    %134 = vector.load %arg12[%c0_47, %c0_48] : memref<1x32xf32, #tpu.memory_space<vmem>>, vector<1x32xf32>
    %135 = arith.truncf %132 : vector<8x64xf32> to vector<8x64xbf16>
    %cst_49 = arith.constant dense<0.000000e+00> : vector<8x32xf32>
    %136 = tpu.matmul %135, %133, %cst_49 {dimension_numbers = #tpu.dot_dimension_numbers<[1], [0], [0], [1], [0, 0, 1, 1], [], []>} : vector<8x64xbf16>, vector<64x32xbf16>, vector<8x32xf32> -> vector<8x32xf32>
    %137 = vector.broadcast %134 : vector<1x32xf32> to vector<8x32xf32>
    %138 = arith.addf %136, %137 : vector<8x32xf32>
    %139 = arith.addf %124, %138 : vector<8x32xf32>
    %c0_50 = arith.constant 0 : index
    %c0_51 = arith.constant 0 : index
    %140 = vector.load %arg13[%c0_50, %c0_51] : memref<1x32xf32, #tpu.memory_space<vmem>>, vector<1x32xf32>
    %c0_52 = arith.constant 0 : index
    %c0_53 = arith.constant 0 : index
    %141 = vector.load %arg14[%c0_52, %c0_53] : memref<1x32xf32, #tpu.memory_space<vmem>>, vector<1x32xf32>
    %cst_54 = arith.constant dense<0.000000e+00> : vector<8xf32>
    %142 = vector.multi_reduction <add>, %139, %cst_54 [1] : vector<8x32xf32> to vector<8xf32>
    %143 = vector.shape_cast %142 : vector<8xf32> to vector<8x1xf32>
    %cst_55 = arith.constant 3.200000e+01 : f32
    %144 = vector.broadcast %cst_55 : f32 to vector<8x1xf32>
    %145 = arith.divf %143, %144 : vector<8x1xf32>
    %146 = vector.broadcast %145 : vector<8x1xf32> to vector<8x32xf32>
    %147 = arith.subf %139, %146 : vector<8x32xf32>
    %148 = arith.mulf %147, %147 : vector<8x32xf32>
    %cst_56 = arith.constant dense<0.000000e+00> : vector<8xf32>
    %149 = vector.multi_reduction <add>, %148, %cst_56 [1] : vector<8x32xf32> to vector<8xf32>
    %150 = vector.shape_cast %149 : vector<8xf32> to vector<8x1xf32>
    %cst_57 = arith.constant 3.200000e+01 : f32
    %151 = vector.broadcast %cst_57 : f32 to vector<8x1xf32>
    %152 = arith.divf %150, %151 : vector<8x1xf32>
    %153 = vector.broadcast %145 : vector<8x1xf32> to vector<8x32xf32>
    %154 = arith.subf %139, %153 : vector<8x32xf32>
    %cst_58 = arith.constant 9.99999974E-6 : f32
    %155 = vector.broadcast %cst_58 : f32 to vector<8x1xf32>
    %156 = arith.addf %152, %155 : vector<8x1xf32>
    %157 = math.rsqrt %156 : vector<8x1xf32>
    %158 = vector.broadcast %157 : vector<8x1xf32> to vector<8x32xf32>
    %159 = arith.mulf %154, %158 : vector<8x32xf32>
    %160 = vector.broadcast %140 : vector<1x32xf32> to vector<8x32xf32>
    %161 = arith.mulf %159, %160 : vector<8x32xf32>
    %162 = vector.broadcast %141 : vector<1x32xf32> to vector<8x32xf32>
    %163 = arith.addf %161, %162 : vector<8x32xf32>
    %c0_59 = arith.constant 0 : index
    %c0_60 = arith.constant 0 : index
    %c0_61 = arith.constant 0 : index
    %164 = vector.load %arg15[%c0_59, %c0_60, %c0_61] : memref<1x8x32xf32, #tpu.memory_space<vmem>>, vector<1x8x32xf32>
    %165 = vector.shape_cast %164 : vector<1x8x32xf32> to vector<8x32xf32>
    %166 = vector.shape_cast %163 : vector<8x32xf32> to vector<1x8x32xf32>
    tpu.vector_store %arg15[%c0_59, %c0_60, %c0_61], %166 {strides = array<i32>} : memref<1x8x32xf32, #tpu.memory_space<vmem>>, vector<1x8x32xf32>,
    return
  }
  func.func @transform_0(%arg0: i32) -> (i32, i32, i32) {
    %c0_i32 = arith.constant 0 : i32
    %c0_i32_0 = arith.constant 0 : i32
    %c0_i32_1 = arith.constant 0 : i32
    return %arg0, %c0_i32, %c0_i32_0 : i32, i32, i32
  }
  func.func @transform_1(%arg0: i32) -> (i32, i32, i32) {
    %c0_i32 = arith.constant 0 : i32
    %c0_i32_0 = arith.constant 0 : i32
    %c0_i32_1 = arith.constant 0 : i32
    return %arg0, %c0_i32, %c0_i32_0 : i32, i32, i32
  }
  func.func @transform_2(%arg0: i32) -> (i32, i32) {
    %c0_i32 = arith.constant 0 : i32
    %c0_i32_0 = arith.constant 0 : i32
    %c0_i32_1 = arith.constant 0 : i32
    return %c0_i32, %c0_i32_0 : i32, i32
  }
  func.func @transform_3(%arg0: i32) -> (i32, i32) {
    %c0_i32 = arith.constant 0 : i32
    %c0_i32_0 = arith.constant 0 : i32
    %c0_i32_1 = arith.constant 0 : i32
    return %c0_i32, %c0_i32_0 : i32, i32
  }
  func.func @transform_4(%arg0: i32) -> (i32, i32) {
    %c0_i32 = arith.constant 0 : i32
    %c0_i32_0 = arith.constant 0 : i32
    %c0_i32_1 = arith.constant 0 : i32
    return %c0_i32, %c0_i32_0 : i32, i32
  }
  func.func @transform_5(%arg0: i32) -> (i32, i32) {
    %c0_i32 = arith.constant 0 : i32
    %c0_i32_0 = arith.constant 0 : i32
    %c0_i32_1 = arith.constant 0 : i32
    return %c0_i32, %c0_i32_0 : i32, i32
  }
  func.func @transform_6(%arg0: i32) -> (i32, i32) {
    %c0_i32 = arith.constant 0 : i32
    %c0_i32_0 = arith.constant 0 : i32
    %c0_i32_1 = arith.constant 0 : i32
    return %c0_i32, %c0_i32_0 : i32, i32
  }
  func.func @transform_7(%arg0: i32) -> (i32, i32) {
    %c0_i32 = arith.constant 0 : i32
    %c0_i32_0 = arith.constant 0 : i32
    %c0_i32_1 = arith.constant 0 : i32
    return %c0_i32, %c0_i32_0 : i32, i32
  }
  func.func @transform_8(%arg0: i32) -> (i32, i32) {
    %c0_i32 = arith.constant 0 : i32
    %c0_i32_0 = arith.constant 0 : i32
    %c0_i32_1 = arith.constant 0 : i32
    return %c0_i32, %c0_i32_0 : i32, i32
  }
  func.func @transform_9(%arg0: i32) -> (i32, i32) {
    %c0_i32 = arith.constant 0 : i32
    %c0_i32_0 = arith.constant 0 : i32
    %c0_i32_1 = arith.constant 0 : i32
    return %c0_i32, %c0_i32_0 : i32, i32
  }
  func.func @transform_10(%arg0: i32) -> (i32, i32) {
    %c0_i32 = arith.constant 0 : i32
    %c0_i32_0 = arith.constant 0 : i32
    %c0_i32_1 = arith.constant 0 : i32
    return %c0_i32, %c0_i32_0 : i32, i32
  }
  func.func @transform_11(%arg0: i32) -> (i32, i32) {
    %c0_i32 = arith.constant 0 : i32
    %c0_i32_0 = arith.constant 0 : i32
    %c0_i32_1 = arith.constant 0 : i32
    return %c0_i32, %c0_i32_0 : i32, i32
  }
  func.func @transform_12(%arg0: i32) -> (i32, i32) {
    %c0_i32 = arith.constant 0 : i32
    %c0_i32_0 = arith.constant 0 : i32
    %c0_i32_1 = arith.constant 0 : i32
    return %c0_i32, %c0_i32_0 : i32, i32
  }
  func.func @transform_13(%arg0: i32) -> (i32, i32) {
    %c0_i32 = arith.constant 0 : i32
    %c0_i32_0 = arith.constant 0 : i32
    %c0_i32_1 = arith.constant 0 : i32
    return %c0_i32, %c0_i32_0 : i32, i32
  }
  func.func @transform_14(%arg0: i32) -> (i32, i32, i32) {
    %c0_i32 = arith.constant 0 : i32
    %c0_i32_0 = arith.constant 0 : i32
    %c0_i32_1 = arith.constant 0 : i32
    return %arg0, %c0_i32, %c0_i32_0 : i32, i32, i32
  }
}

module attributes {stable_mosaic.version = 11 : i64} {
  func.func @_generator_kernel(%arg0: i32, %arg1: memref<16x32xf32, #tpu.memory_space<vmem>>, %arg2: memref<32x128xbf16, #tpu.memory_space<vmem>>, %arg3: memref<1x128xf32, #tpu.memory_space<vmem>>, %arg4: memref<16x128xf32, #tpu.memory_space<vmem>>) attributes {dimension_semantics = [#tpu.dimension_semantics<parallel>], iteration_bounds = array<i64: 1>, scalar_prefetch = 0 : i64, scratch_operands = 0 : i64, tpu.core_type = #tpu.core_type<tc>, window_params = [{pipeline_mode = #tpu.pipeline_mode<synchronous>, transform_indices = @transform_0, window_bounds = array<i64: 16, 32>}, {transform_indices = @transform_1, window_bounds = array<i64: 32, 128>}, {transform_indices = @transform_2, window_bounds = array<i64: 1, 128>}, {transform_indices = @transform_3, window_bounds = array<i64: 16, 128>}]} {
    %c0 = arith.constant 0 : index
    %c0_0 = arith.constant 0 : index
    %0 = vector.load %arg1[%c0, %c0_0] : memref<16x32xf32, #tpu.memory_space<vmem>>, vector<16x32xf32>
    %1 = arith.truncf %0 : vector<16x32xf32> to vector<16x32xbf16>
    %c0_1 = arith.constant 0 : index
    %c0_2 = arith.constant 0 : index
    %2 = vector.load %arg2[%c0_1, %c0_2] : memref<32x128xbf16, #tpu.memory_space<vmem>>, vector<32x128xbf16>
    %cst = arith.constant dense<0.000000e+00> : vector<16x128xf32>
    %3 = tpu.matmul %1, %2, %cst {dimension_numbers = #tpu.dot_dimension_numbers<[1], [0], [0], [1], [0, 0, 1, 1], [], []>} : vector<16x32xbf16>, vector<32x128xbf16>, vector<16x128xf32> -> vector<16x128xf32>
    %c0_3 = arith.constant 0 : index
    %c0_4 = arith.constant 0 : index
    %4 = vector.load %arg3[%c0_3, %c0_4] : memref<1x128xf32, #tpu.memory_space<vmem>>, vector<1x128xf32>
    %5 = vector.broadcast %4 : vector<1x128xf32> to vector<16x128xf32>
    %6 = arith.addf %3, %5 : vector<16x128xf32>
    %c0_5 = arith.constant 0 : index
    %c0_6 = arith.constant 0 : index
    %7 = vector.load %arg4[%c0_5, %c0_6] : memref<16x128xf32, #tpu.memory_space<vmem>>, vector<16x128xf32>
    tpu.vector_store %arg4[%c0_5, %c0_6], %6 {strides = array<i32>} : memref<16x128xf32, #tpu.memory_space<vmem>>, vector<16x128xf32>,
    return
  }
  func.func @transform_0(%arg0: i32) -> (i32, i32) {
    %c0_i32 = arith.constant 0 : i32
    %c0_i32_0 = arith.constant 0 : i32
    %c0_i32_1 = arith.constant 0 : i32
    return %c0_i32, %c0_i32_0 : i32, i32
  }
  func.func @transform_1(%arg0: i32) -> (i32, i32) {
    %c0_i32 = arith.constant 0 : i32
    %c0_i32_0 = arith.constant 0 : i32
    return %c0_i32, %arg0 : i32, i32
  }
  func.func @transform_2(%arg0: i32) -> (i32, i32) {
    %c0_i32 = arith.constant 0 : i32
    %c0_i32_0 = arith.constant 0 : i32
    return %c0_i32, %arg0 : i32, i32
  }
  func.func @transform_3(%arg0: i32) -> (i32, i32) {
    %c0_i32 = arith.constant 0 : i32
    %c0_i32_0 = arith.constant 0 : i32
    return %c0_i32, %arg0 : i32, i32
  }
}

module attributes {stable_mosaic.version = 11 : i64} {
  func.func @_decoder_layer_kernel(%arg0: i32, %arg1: memref<1x8x32xf32, #tpu.memory_space<vmem>>, %arg2: memref<1x8x32xf32, #tpu.memory_space<vmem>>, %arg3: memref<1x8x8xf32, #tpu.memory_space<vmem>>, %arg4: memref<1x8x8xf32, #tpu.memory_space<vmem>>, %arg5: memref<32x96xbf16, #tpu.memory_space<vmem>>, %arg6: memref<1x96xf32, #tpu.memory_space<vmem>>, %arg7: memref<32x32xbf16, #tpu.memory_space<vmem>>, %arg8: memref<1x32xf32, #tpu.memory_space<vmem>>, %arg9: memref<1x32xf32, #tpu.memory_space<vmem>>, %arg10: memref<1x32xf32, #tpu.memory_space<vmem>>, %arg11: memref<32x32xbf16, #tpu.memory_space<vmem>>, %arg12: memref<1x32xf32, #tpu.memory_space<vmem>>, %arg13: memref<32x64xbf16, #tpu.memory_space<vmem>>, %arg14: memref<1x64xf32, #tpu.memory_space<vmem>>, %arg15: memref<32x32xbf16, #tpu.memory_space<vmem>>, %arg16: memref<1x32xf32, #tpu.memory_space<vmem>>, %arg17: memref<1x32xf32, #tpu.memory_space<vmem>>, %arg18: memref<1x32xf32, #tpu.memory_space<vmem>>, %arg19: memref<32x64xbf16, #tpu.memory_space<vmem>>, %arg20: memref<1x64xf32, #tpu.memory_space<vmem>>, %arg21: memref<64x32xbf16, #tpu.memory_space<vmem>>, %arg22: memref<1x32xf32, #tpu.memory_space<vmem>>, %arg23: memref<1x32xf32, #tpu.memory_space<vmem>>, %arg24: memref<1x32xf32, #tpu.memory_space<vmem>>, %arg25: memref<1x8x32xf32, #tpu.memory_space<vmem>>) attributes {dimension_semantics = [#tpu.dimension_semantics<parallel>], iteration_bounds = array<i64: 2>, scalar_prefetch = 0 : i64, scratch_operands = 0 : i64, tpu.core_type = #tpu.core_type<tc>, window_params = [{transform_indices = @transform_0, window_bounds = array<i64: 1, 8, 32>}, {transform_indices = @transform_1, window_bounds = array<i64: 1, 8, 32>}, {transform_indices = @transform_2, window_bounds = array<i64: 1, 8, 8>}, {transform_indices = @transform_3, window_bounds = array<i64: 1, 8, 8>}, {pipeline_mode = #tpu.pipeline_mode<synchronous>, transform_indices = @transform_4, window_bounds = array<i64: 32, 96>}, {pipeline_mode = #tpu.pipeline_mode<synchronous>, transform_indices = @transform_5, window_bounds = array<i64: 1, 96>}, {pipeline_mode = #tpu.pipeline_mode<synchronous>, transform_indices = @transform_6, window_bounds = array<i64: 32, 32>}, {pipeline_mode = #tpu.pipeline_mode<synchronous>, transform_indices = @transform_7, window_bounds = array<i64: 1, 32>}, {pipeline_mode = #tpu.pipeline_mode<synchronous>, transform_indices = @transform_8, window_bounds = array<i64: 1, 32>}, {pipeline_mode = #tpu.pipeline_mode<synchronous>, transform_indices = @transform_9, window_bounds = array<i64: 1, 32>}, {pipeline_mode = #tpu.pipeline_mode<synchronous>, transform_indices = @transform_10, window_bounds = array<i64: 32, 32>}, {pipeline_mode = #tpu.pipeline_mode<synchronous>, transform_indices = @transform_11, window_bounds = array<i64: 1, 32>}, {pipeline_mode = #tpu.pipeline_mode<synchronous>, transform_indices = @transform_12, window_bounds = array<i64: 32, 64>}, {pipeline_mode = #tpu.pipeline_mode<synchronous>, transform_indices = @transform_13, window_bounds = array<i64: 1, 64>}, {pipeline_mode = #tpu.pipeline_mode<synchronous>, transform_indices = @transform_14, window_bounds = array<i64: 32, 32>}, {pipeline_mode = #tpu.pipeline_mode<synchronous>, transform_indices = @transform_15, window_bounds = array<i64: 1, 32>}, {pipeline_mode = #tpu.pipeline_mode<synchronous>, transform_indices = @transform_16, window_bounds = array<i64: 1, 32>}, {pipeline_mode = #tpu.pipeline_mode<synchronous>, transform_indices = @transform_17, window_bounds = array<i64: 1, 32>}, {pipeline_mode = #tpu.pipeline_mode<synchronous>, transform_indices = @transform_18, window_bounds = array<i64: 32, 64>}, {pipeline_mode = #tpu.pipeline_mode<synchronous>, transform_indices = @transform_19, window_bounds = array<i64: 1, 64>}, {pipeline_mode = #tpu.pipeline_mode<synchronous>, transform_indices = @transform_20, window_bounds = array<i64: 64, 32>}, {pipeline_mode = #tpu.pipeline_mode<synchronous>, transform_indices = @transform_21, window_bounds = array<i64: 1, 32>}, {pipeline_mode = #tpu.pipeline_mode<synchronous>, transform_indices = @transform_22, window_bounds = array<i64: 1, 32>}, {pipeline_mode = #tpu.pipeline_mode<synchronous>, transform_indices = @transform_23, window_bounds = array<i64: 1, 32>}, {transform_indices = @transform_24, window_bounds = array<i64: 1, 8, 32>}]} {
    %c0 = arith.constant 0 : index
    %c0_0 = arith.constant 0 : index
    %c0_1 = arith.constant 0 : index
    %0 = vector.load %arg1[%c0, %c0_0, %c0_1] : memref<1x8x32xf32, #tpu.memory_space<vmem>>, vector<1x8x32xf32>
    %1 = vector.shape_cast %0 : vector<1x8x32xf32> to vector<8x32xf32>
    %c0_2 = arith.constant 0 : index
    %c0_3 = arith.constant 0 : index
    %c0_4 = arith.constant 0 : index
    %2 = vector.load %arg2[%c0_2, %c0_3, %c0_4] : memref<1x8x32xf32, #tpu.memory_space<vmem>>, vector<1x8x32xf32>
    %3 = vector.shape_cast %2 : vector<1x8x32xf32> to vector<8x32xf32>
    %c0_5 = arith.constant 0 : index
    %c0_6 = arith.constant 0 : index
    %c0_7 = arith.constant 0 : index
    %4 = vector.load %arg3[%c0_5, %c0_6, %c0_7] : memref<1x8x8xf32, #tpu.memory_space<vmem>>, vector<1x8x8xf32>
    %5 = vector.shape_cast %4 : vector<1x8x8xf32> to vector<8x8xf32>
    %c0_8 = arith.constant 0 : index
    %c0_9 = arith.constant 0 : index
    %c0_10 = arith.constant 0 : index
    %6 = vector.load %arg4[%c0_8, %c0_9, %c0_10] : memref<1x8x8xf32, #tpu.memory_space<vmem>>, vector<1x8x8xf32>
    %7 = vector.shape_cast %6 : vector<1x8x8xf32> to vector<8x8xf32>
    %c0_11 = arith.constant 0 : index
    %c0_12 = arith.constant 0 : index
    %8 = vector.load %arg5[%c0_11, %c0_12] : memref<32x96xbf16, #tpu.memory_space<vmem>>, vector<32x96xbf16>
    %c0_13 = arith.constant 0 : index
    %c0_14 = arith.constant 0 : index
    %9 = vector.load %arg6[%c0_13, %c0_14] : memref<1x96xf32, #tpu.memory_space<vmem>>, vector<1x96xf32>
    %10 = arith.truncf %1 : vector<8x32xf32> to vector<8x32xbf16>
    %cst = arith.constant dense<0.000000e+00> : vector<8x96xf32>
    %11 = tpu.matmul %10, %8, %cst {dimension_numbers = #tpu.dot_dimension_numbers<[1], [0], [0], [1], [0, 0, 1, 1], [], []>} : vector<8x32xbf16>, vector<32x96xbf16>, vector<8x96xf32> -> vector<8x96xf32>
    %12 = vector.broadcast %9 : vector<1x96xf32> to vector<8x96xf32>
    %13 = arith.addf %11, %12 : vector<8x96xf32>
    %14 = vector.extract_strided_slice %13 {offsets = [0, 0], sizes = [8, 32], strides = [1, 1]} : vector<8x96xf32> to vector<8x32xf32>
    %15 = vector.extract_strided_slice %13 {offsets = [0, 32], sizes = [8, 32], strides = [1, 1]} : vector<8x96xf32> to vector<8x32xf32>
    %16 = vector.extract_strided_slice %13 {offsets = [0, 64], sizes = [8, 32], strides = [1, 1]} : vector<8x96xf32> to vector<8x32xf32>
    %17 = vector.extract_strided_slice %14 {offsets = [0, 0], sizes = [8, 8], strides = [1, 1]} : vector<8x32xf32> to vector<8x8xf32>
    %18 = arith.truncf %17 : vector<8x8xf32> to vector<8x8xbf16>
    %19 = vector.extract_strided_slice %15 {offsets = [0, 0], sizes = [8, 8], strides = [1, 1]} : vector<8x32xf32> to vector<8x8xf32>
    %20 = arith.truncf %19 : vector<8x8xf32> to vector<8x8xbf16>
    %21 = vector.extract_strided_slice %16 {offsets = [0, 0], sizes = [8, 8], strides = [1, 1]} : vector<8x32xf32> to vector<8x8xf32>
    %22 = arith.truncf %21 : vector<8x8xf32> to vector<8x8xbf16>
    %cst_15 = arith.constant dense<0.000000e+00> : vector<8x8xf32>
    %23 = tpu.matmul %18, %20, %cst_15 {dimension_numbers = #tpu.dot_dimension_numbers<[1], [1], [0], [0], [0, 0, 1, 0], [], []>} : vector<8x8xbf16>, vector<8x8xbf16>, vector<8x8xf32> -> vector<8x8xf32>
    %24 = arith.addf %23, %5 : vector<8x8xf32>
    %cst_16 = arith.constant dense<0xFF800000> : vector<8xf32>
    %25 = vector.multi_reduction <maximumf>, %24, %cst_16 [1] : vector<8x8xf32> to vector<8xf32>
    %26 = vector.shape_cast %25 : vector<8xf32> to vector<8x1xf32>
    %27 = vector.broadcast %26 : vector<8x1xf32> to vector<8x8xf32>
    %28 = arith.subf %24, %27 : vector<8x8xf32>
    %29 = math.exp %28 : vector<8x8xf32>
    %cst_17 = arith.constant dense<0.000000e+00> : vector<8xf32>
    %30 = vector.multi_reduction <add>, %29, %cst_17 [1] : vector<8x8xf32> to vector<8xf32>
    %31 = vector.shape_cast %30 : vector<8xf32> to vector<8x1xf32>
    %32 = tpu.reciprocal %31 {approx = true} : vector<8x1xf32> -> vector<8x1xf32>
    %33 = vector.broadcast %32 : vector<8x1xf32> to vector<8x8xf32>
    %34 = arith.mulf %29, %33 : vector<8x8xf32>
    %35 = arith.truncf %34 : vector<8x8xf32> to vector<8x8xbf16>
    %cst_18 = arith.constant dense<0.000000e+00> : vector<8x8xf32>
    %36 = tpu.matmul %35, %22, %cst_18 {dimension_numbers = #tpu.dot_dimension_numbers<[1], [0], [0], [1], [0, 0, 1, 1], [], []>} : vector<8x8xbf16>, vector<8x8xbf16>, vector<8x8xf32> -> vector<8x8xf32>
    %37 = vector.extract_strided_slice %14 {offsets = [0, 8], sizes = [8, 8], strides = [1, 1]} : vector<8x32xf32> to vector<8x8xf32>
    %38 = arith.truncf %37 : vector<8x8xf32> to vector<8x8xbf16>
    %39 = vector.extract_strided_slice %15 {offsets = [0, 8], sizes = [8, 8], strides = [1, 1]} : vector<8x32xf32> to vector<8x8xf32>
    %40 = arith.truncf %39 : vector<8x8xf32> to vector<8x8xbf16>
    %41 = vector.extract_strided_slice %16 {offsets = [0, 8], sizes = [8, 8], strides = [1, 1]} : vector<8x32xf32> to vector<8x8xf32>
    %42 = arith.truncf %41 : vector<8x8xf32> to vector<8x8xbf16>
    %cst_19 = arith.constant dense<0.000000e+00> : vector<8x8xf32>
    %43 = tpu.matmul %38, %40, %cst_19 {dimension_numbers = #tpu.dot_dimension_numbers<[1], [1], [0], [0], [0, 0, 1, 0], [], []>} : vector<8x8xbf16>, vector<8x8xbf16>, vector<8x8xf32> -> vector<8x8xf32>
    %44 = arith.addf %43, %5 : vector<8x8xf32>
    %cst_20 = arith.constant dense<0xFF800000> : vector<8xf32>
    %45 = vector.multi_reduction <maximumf>, %44, %cst_20 [1] : vector<8x8xf32> to vector<8xf32>
    %46 = vector.shape_cast %45 : vector<8xf32> to vector<8x1xf32>
    %47 = vector.broadcast %46 : vector<8x1xf32> to vector<8x8xf32>
    %48 = arith.subf %44, %47 : vector<8x8xf32>
    %49 = math.exp %48 : vector<8x8xf32>
    %cst_21 = arith.constant dense<0.000000e+00> : vector<8xf32>
    %50 = vector.multi_reduction <add>, %49, %cst_21 [1] : vector<8x8xf32> to vector<8xf32>
    %51 = vector.shape_cast %50 : vector<8xf32> to vector<8x1xf32>
    %52 = tpu.reciprocal %51 {approx = true} : vector<8x1xf32> -> vector<8x1xf32>
    %53 = vector.broadcast %52 : vector<8x1xf32> to vector<8x8xf32>
    %54 = arith.mulf %49, %53 : vector<8x8xf32>
    %55 = arith.truncf %54 : vector<8x8xf32> to vector<8x8xbf16>
    %cst_22 = arith.constant dense<0.000000e+00> : vector<8x8xf32>
    %56 = tpu.matmul %55, %42, %cst_22 {dimension_numbers = #tpu.dot_dimension_numbers<[1], [0], [0], [1], [0, 0, 1, 1], [], []>} : vector<8x8xbf16>, vector<8x8xbf16>, vector<8x8xf32> -> vector<8x8xf32>
    %57 = vector.extract_strided_slice %14 {offsets = [0, 16], sizes = [8, 8], strides = [1, 1]} : vector<8x32xf32> to vector<8x8xf32>
    %58 = arith.truncf %57 : vector<8x8xf32> to vector<8x8xbf16>
    %59 = vector.extract_strided_slice %15 {offsets = [0, 16], sizes = [8, 8], strides = [1, 1]} : vector<8x32xf32> to vector<8x8xf32>
    %60 = arith.truncf %59 : vector<8x8xf32> to vector<8x8xbf16>
    %61 = vector.extract_strided_slice %16 {offsets = [0, 16], sizes = [8, 8], strides = [1, 1]} : vector<8x32xf32> to vector<8x8xf32>
    %62 = arith.truncf %61 : vector<8x8xf32> to vector<8x8xbf16>
    %cst_23 = arith.constant dense<0.000000e+00> : vector<8x8xf32>
    %63 = tpu.matmul %58, %60, %cst_23 {dimension_numbers = #tpu.dot_dimension_numbers<[1], [1], [0], [0], [0, 0, 1, 0], [], []>} : vector<8x8xbf16>, vector<8x8xbf16>, vector<8x8xf32> -> vector<8x8xf32>
    %64 = arith.addf %63, %5 : vector<8x8xf32>
    %cst_24 = arith.constant dense<0xFF800000> : vector<8xf32>
    %65 = vector.multi_reduction <maximumf>, %64, %cst_24 [1] : vector<8x8xf32> to vector<8xf32>
    %66 = vector.shape_cast %65 : vector<8xf32> to vector<8x1xf32>
    %67 = vector.broadcast %66 : vector<8x1xf32> to vector<8x8xf32>
    %68 = arith.subf %64, %67 : vector<8x8xf32>
    %69 = math.exp %68 : vector<8x8xf32>
    %cst_25 = arith.constant dense<0.000000e+00> : vector<8xf32>
    %70 = vector.multi_reduction <add>, %69, %cst_25 [1] : vector<8x8xf32> to vector<8xf32>
    %71 = vector.shape_cast %70 : vector<8xf32> to vector<8x1xf32>
    %72 = tpu.reciprocal %71 {approx = true} : vector<8x1xf32> -> vector<8x1xf32>
    %73 = vector.broadcast %72 : vector<8x1xf32> to vector<8x8xf32>
    %74 = arith.mulf %69, %73 : vector<8x8xf32>
    %75 = arith.truncf %74 : vector<8x8xf32> to vector<8x8xbf16>
    %cst_26 = arith.constant dense<0.000000e+00> : vector<8x8xf32>
    %76 = tpu.matmul %75, %62, %cst_26 {dimension_numbers = #tpu.dot_dimension_numbers<[1], [0], [0], [1], [0, 0, 1, 1], [], []>} : vector<8x8xbf16>, vector<8x8xbf16>, vector<8x8xf32> -> vector<8x8xf32>
    %77 = vector.extract_strided_slice %14 {offsets = [0, 24], sizes = [8, 8], strides = [1, 1]} : vector<8x32xf32> to vector<8x8xf32>
    %78 = arith.truncf %77 : vector<8x8xf32> to vector<8x8xbf16>
    %79 = vector.extract_strided_slice %15 {offsets = [0, 24], sizes = [8, 8], strides = [1, 1]} : vector<8x32xf32> to vector<8x8xf32>
    %80 = arith.truncf %79 : vector<8x8xf32> to vector<8x8xbf16>
    %81 = vector.extract_strided_slice %16 {offsets = [0, 24], sizes = [8, 8], strides = [1, 1]} : vector<8x32xf32> to vector<8x8xf32>
    %82 = arith.truncf %81 : vector<8x8xf32> to vector<8x8xbf16>
    %cst_27 = arith.constant dense<0.000000e+00> : vector<8x8xf32>
    %83 = tpu.matmul %78, %80, %cst_27 {dimension_numbers = #tpu.dot_dimension_numbers<[1], [1], [0], [0], [0, 0, 1, 0], [], []>} : vector<8x8xbf16>, vector<8x8xbf16>, vector<8x8xf32> -> vector<8x8xf32>
    %84 = arith.addf %83, %5 : vector<8x8xf32>
    %cst_28 = arith.constant dense<0xFF800000> : vector<8xf32>
    %85 = vector.multi_reduction <maximumf>, %84, %cst_28 [1] : vector<8x8xf32> to vector<8xf32>
    %86 = vector.shape_cast %85 : vector<8xf32> to vector<8x1xf32>
    %87 = vector.broadcast %86 : vector<8x1xf32> to vector<8x8xf32>
    %88 = arith.subf %84, %87 : vector<8x8xf32>
    %89 = math.exp %88 : vector<8x8xf32>
    %cst_29 = arith.constant dense<0.000000e+00> : vector<8xf32>
    %90 = vector.multi_reduction <add>, %89, %cst_29 [1] : vector<8x8xf32> to vector<8xf32>
    %91 = vector.shape_cast %90 : vector<8xf32> to vector<8x1xf32>
    %92 = tpu.reciprocal %91 {approx = true} : vector<8x1xf32> -> vector<8x1xf32>
    %93 = vector.broadcast %92 : vector<8x1xf32> to vector<8x8xf32>
    %94 = arith.mulf %89, %93 : vector<8x8xf32>
    %95 = arith.truncf %94 : vector<8x8xf32> to vector<8x8xbf16>
    %cst_30 = arith.constant dense<0.000000e+00> : vector<8x8xf32>
    %96 = tpu.matmul %95, %82, %cst_30 {dimension_numbers = #tpu.dot_dimension_numbers<[1], [0], [0], [1], [0, 0, 1, 1], [], []>} : vector<8x8xbf16>, vector<8x8xbf16>, vector<8x8xf32> -> vector<8x8xf32>
    %97 = tpu.concatenate %36, %56, %76, %96 in 1 : vector<8x8xf32>, vector<8x8xf32>, vector<8x8xf32>, vector<8x8xf32> -> vector<8x32xf32>
    %c0_31 = arith.constant 0 : index
    %c0_32 = arith.constant 0 : index
    %98 = vector.load %arg7[%c0_31, %c0_32] : memref<32x32xbf16, #tpu.memory_space<vmem>>, vector<32x32xbf16>
    %c0_33 = arith.constant 0 : index
    %c0_34 = arith.constant 0 : index
    %99 = vector.load %arg8[%c0_33, %c0_34] : memref<1x32xf32, #tpu.memory_space<vmem>>, vector<1x32xf32>
    %100 = arith.truncf %97 : vector<8x32xf32> to vector<8x32xbf16>
    %cst_35 = arith.constant dense<0.000000e+00> : vector<8x32xf32>
    %101 = tpu.matmul %100, %98, %cst_35 {dimension_numbers = #tpu.dot_dimension_numbers<[1], [0], [0], [1], [0, 0, 1, 1], [], []>} : vector<8x32xbf16>, vector<32x32xbf16>, vector<8x32xf32> -> vector<8x32xf32>
    %102 = vector.broadcast %99 : vector<1x32xf32> to vector<8x32xf32>
    %103 = arith.addf %101, %102 : vector<8x32xf32>
    %104 = arith.addf %1, %103 : vector<8x32xf32>
    %c0_36 = arith.constant 0 : index
    %c0_37 = arith.constant 0 : index
    %105 = vector.load %arg9[%c0_36, %c0_37] : memref<1x32xf32, #tpu.memory_space<vmem>>, vector<1x32xf32>
    %c0_38 = arith.constant 0 : index
    %c0_39 = arith.constant 0 : index
    %106 = vector.load %arg10[%c0_38, %c0_39] : memref<1x32xf32, #tpu.memory_space<vmem>>, vector<1x32xf32>
    %cst_40 = arith.constant dense<0.000000e+00> : vector<8xf32>
    %107 = vector.multi_reduction <add>, %104, %cst_40 [1] : vector<8x32xf32> to vector<8xf32>
    %108 = vector.shape_cast %107 : vector<8xf32> to vector<8x1xf32>
    %cst_41 = arith.constant 3.200000e+01 : f32
    %109 = vector.broadcast %cst_41 : f32 to vector<8x1xf32>
    %110 = arith.divf %108, %109 : vector<8x1xf32>
    %111 = vector.broadcast %110 : vector<8x1xf32> to vector<8x32xf32>
    %112 = arith.subf %104, %111 : vector<8x32xf32>
    %113 = arith.mulf %112, %112 : vector<8x32xf32>
    %cst_42 = arith.constant dense<0.000000e+00> : vector<8xf32>
    %114 = vector.multi_reduction <add>, %113, %cst_42 [1] : vector<8x32xf32> to vector<8xf32>
    %115 = vector.shape_cast %114 : vector<8xf32> to vector<8x1xf32>
    %cst_43 = arith.constant 3.200000e+01 : f32
    %116 = vector.broadcast %cst_43 : f32 to vector<8x1xf32>
    %117 = arith.divf %115, %116 : vector<8x1xf32>
    %118 = vector.broadcast %110 : vector<8x1xf32> to vector<8x32xf32>
    %119 = arith.subf %104, %118 : vector<8x32xf32>
    %cst_44 = arith.constant 9.99999974E-6 : f32
    %120 = vector.broadcast %cst_44 : f32 to vector<8x1xf32>
    %121 = arith.addf %117, %120 : vector<8x1xf32>
    %122 = math.rsqrt %121 : vector<8x1xf32>
    %123 = vector.broadcast %122 : vector<8x1xf32> to vector<8x32xf32>
    %124 = arith.mulf %119, %123 : vector<8x32xf32>
    %125 = vector.broadcast %105 : vector<1x32xf32> to vector<8x32xf32>
    %126 = arith.mulf %124, %125 : vector<8x32xf32>
    %127 = vector.broadcast %106 : vector<1x32xf32> to vector<8x32xf32>
    %128 = arith.addf %126, %127 : vector<8x32xf32>
    %c0_45 = arith.constant 0 : index
    %c0_46 = arith.constant 0 : index
    %129 = vector.load %arg11[%c0_45, %c0_46] : memref<32x32xbf16, #tpu.memory_space<vmem>>, vector<32x32xbf16>
    %c0_47 = arith.constant 0 : index
    %c0_48 = arith.constant 0 : index
    %130 = vector.load %arg12[%c0_47, %c0_48] : memref<1x32xf32, #tpu.memory_space<vmem>>, vector<1x32xf32>
    %131 = arith.truncf %128 : vector<8x32xf32> to vector<8x32xbf16>
    %cst_49 = arith.constant dense<0.000000e+00> : vector<8x32xf32>
    %132 = tpu.matmul %131, %129, %cst_49 {dimension_numbers = #tpu.dot_dimension_numbers<[1], [0], [0], [1], [0, 0, 1, 1], [], []>} : vector<8x32xbf16>, vector<32x32xbf16>, vector<8x32xf32> -> vector<8x32xf32>
    %133 = vector.broadcast %130 : vector<1x32xf32> to vector<8x32xf32>
    %134 = arith.addf %132, %133 : vector<8x32xf32>
    %c0_50 = arith.constant 0 : index
    %c0_51 = arith.constant 0 : index
    %135 = vector.load %arg13[%c0_50, %c0_51] : memref<32x64xbf16, #tpu.memory_space<vmem>>, vector<32x64xbf16>
    %c0_52 = arith.constant 0 : index
    %c0_53 = arith.constant 0 : index
    %136 = vector.load %arg14[%c0_52, %c0_53] : memref<1x64xf32, #tpu.memory_space<vmem>>, vector<1x64xf32>
    %137 = arith.truncf %3 : vector<8x32xf32> to vector<8x32xbf16>
    %cst_54 = arith.constant dense<0.000000e+00> : vector<8x64xf32>
    %138 = tpu.matmul %137, %135, %cst_54 {dimension_numbers = #tpu.dot_dimension_numbers<[1], [0], [0], [1], [0, 0, 1, 1], [], []>} : vector<8x32xbf16>, vector<32x64xbf16>, vector<8x64xf32> -> vector<8x64xf32>
    %139 = vector.broadcast %136 : vector<1x64xf32> to vector<8x64xf32>
    %140 = arith.addf %138, %139 : vector<8x64xf32>
    %141 = vector.extract_strided_slice %140 {offsets = [0, 0], sizes = [8, 32], strides = [1, 1]} : vector<8x64xf32> to vector<8x32xf32>
    %142 = vector.extract_strided_slice %140 {offsets = [0, 32], sizes = [8, 32], strides = [1, 1]} : vector<8x64xf32> to vector<8x32xf32>
    %143 = vector.extract_strided_slice %134 {offsets = [0, 0], sizes = [8, 8], strides = [1, 1]} : vector<8x32xf32> to vector<8x8xf32>
    %144 = arith.truncf %143 : vector<8x8xf32> to vector<8x8xbf16>
    %145 = vector.extract_strided_slice %141 {offsets = [0, 0], sizes = [8, 8], strides = [1, 1]} : vector<8x32xf32> to vector<8x8xf32>
    %146 = arith.truncf %145 : vector<8x8xf32> to vector<8x8xbf16>
    %147 = vector.extract_strided_slice %142 {offsets = [0, 0], sizes = [8, 8], strides = [1, 1]} : vector<8x32xf32> to vector<8x8xf32>
    %148 = arith.truncf %147 : vector<8x8xf32> to vector<8x8xbf16>
    %cst_55 = arith.constant dense<0.000000e+00> : vector<8x8xf32>
    %149 = tpu.matmul %144, %146, %cst_55 {dimension_numbers = #tpu.dot_dimension_numbers<[1], [1], [0], [0], [0, 0, 1, 0], [], []>} : vector<8x8xbf16>, vector<8x8xbf16>, vector<8x8xf32> -> vector<8x8xf32>
    %150 = arith.addf %149, %7 : vector<8x8xf32>
    %cst_56 = arith.constant dense<0xFF800000> : vector<8xf32>
    %151 = vector.multi_reduction <maximumf>, %150, %cst_56 [1] : vector<8x8xf32> to vector<8xf32>
    %152 = vector.shape_cast %151 : vector<8xf32> to vector<8x1xf32>
    %153 = vector.broadcast %152 : vector<8x1xf32> to vector<8x8xf32>
    %154 = arith.subf %150, %153 : vector<8x8xf32>
    %155 = math.exp %154 : vector<8x8xf32>
    %cst_57 = arith.constant dense<0.000000e+00> : vector<8xf32>
    %156 = vector.multi_reduction <add>, %155, %cst_57 [1] : vector<8x8xf32> to vector<8xf32>
    %157 = vector.shape_cast %156 : vector<8xf32> to vector<8x1xf32>
    %158 = tpu.reciprocal %157 {approx = true} : vector<8x1xf32> -> vector<8x1xf32>
    %159 = vector.broadcast %158 : vector<8x1xf32> to vector<8x8xf32>
    %160 = arith.mulf %155, %159 : vector<8x8xf32>
    %161 = arith.truncf %160 : vector<8x8xf32> to vector<8x8xbf16>
    %cst_58 = arith.constant dense<0.000000e+00> : vector<8x8xf32>
    %162 = tpu.matmul %161, %148, %cst_58 {dimension_numbers = #tpu.dot_dimension_numbers<[1], [0], [0], [1], [0, 0, 1, 1], [], []>} : vector<8x8xbf16>, vector<8x8xbf16>, vector<8x8xf32> -> vector<8x8xf32>
    %163 = vector.extract_strided_slice %134 {offsets = [0, 8], sizes = [8, 8], strides = [1, 1]} : vector<8x32xf32> to vector<8x8xf32>
    %164 = arith.truncf %163 : vector<8x8xf32> to vector<8x8xbf16>
    %165 = vector.extract_strided_slice %141 {offsets = [0, 8], sizes = [8, 8], strides = [1, 1]} : vector<8x32xf32> to vector<8x8xf32>
    %166 = arith.truncf %165 : vector<8x8xf32> to vector<8x8xbf16>
    %167 = vector.extract_strided_slice %142 {offsets = [0, 8], sizes = [8, 8], strides = [1, 1]} : vector<8x32xf32> to vector<8x8xf32>
    %168 = arith.truncf %167 : vector<8x8xf32> to vector<8x8xbf16>
    %cst_59 = arith.constant dense<0.000000e+00> : vector<8x8xf32>
    %169 = tpu.matmul %164, %166, %cst_59 {dimension_numbers = #tpu.dot_dimension_numbers<[1], [1], [0], [0], [0, 0, 1, 0], [], []>} : vector<8x8xbf16>, vector<8x8xbf16>, vector<8x8xf32> -> vector<8x8xf32>
    %170 = arith.addf %169, %7 : vector<8x8xf32>
    %cst_60 = arith.constant dense<0xFF800000> : vector<8xf32>
    %171 = vector.multi_reduction <maximumf>, %170, %cst_60 [1] : vector<8x8xf32> to vector<8xf32>
    %172 = vector.shape_cast %171 : vector<8xf32> to vector<8x1xf32>
    %173 = vector.broadcast %172 : vector<8x1xf32> to vector<8x8xf32>
    %174 = arith.subf %170, %173 : vector<8x8xf32>
    %175 = math.exp %174 : vector<8x8xf32>
    %cst_61 = arith.constant dense<0.000000e+00> : vector<8xf32>
    %176 = vector.multi_reduction <add>, %175, %cst_61 [1] : vector<8x8xf32> to vector<8xf32>
    %177 = vector.shape_cast %176 : vector<8xf32> to vector<8x1xf32>
    %178 = tpu.reciprocal %177 {approx = true} : vector<8x1xf32> -> vector<8x1xf32>
    %179 = vector.broadcast %178 : vector<8x1xf32> to vector<8x8xf32>
    %180 = arith.mulf %175, %179 : vector<8x8xf32>
    %181 = arith.truncf %180 : vector<8x8xf32> to vector<8x8xbf16>
    %cst_62 = arith.constant dense<0.000000e+00> : vector<8x8xf32>
    %182 = tpu.matmul %181, %168, %cst_62 {dimension_numbers = #tpu.dot_dimension_numbers<[1], [0], [0], [1], [0, 0, 1, 1], [], []>} : vector<8x8xbf16>, vector<8x8xbf16>, vector<8x8xf32> -> vector<8x8xf32>
    %183 = vector.extract_strided_slice %134 {offsets = [0, 16], sizes = [8, 8], strides = [1, 1]} : vector<8x32xf32> to vector<8x8xf32>
    %184 = arith.truncf %183 : vector<8x8xf32> to vector<8x8xbf16>
    %185 = vector.extract_strided_slice %141 {offsets = [0, 16], sizes = [8, 8], strides = [1, 1]} : vector<8x32xf32> to vector<8x8xf32>
    %186 = arith.truncf %185 : vector<8x8xf32> to vector<8x8xbf16>
    %187 = vector.extract_strided_slice %142 {offsets = [0, 16], sizes = [8, 8], strides = [1, 1]} : vector<8x32xf32> to vector<8x8xf32>
    %188 = arith.truncf %187 : vector<8x8xf32> to vector<8x8xbf16>
    %cst_63 = arith.constant dense<0.000000e+00> : vector<8x8xf32>
    %189 = tpu.matmul %184, %186, %cst_63 {dimension_numbers = #tpu.dot_dimension_numbers<[1], [1], [0], [0], [0, 0, 1, 0], [], []>} : vector<8x8xbf16>, vector<8x8xbf16>, vector<8x8xf32> -> vector<8x8xf32>
    %190 = arith.addf %189, %7 : vector<8x8xf32>
    %cst_64 = arith.constant dense<0xFF800000> : vector<8xf32>
    %191 = vector.multi_reduction <maximumf>, %190, %cst_64 [1] : vector<8x8xf32> to vector<8xf32>
    %192 = vector.shape_cast %191 : vector<8xf32> to vector<8x1xf32>
    %193 = vector.broadcast %192 : vector<8x1xf32> to vector<8x8xf32>
    %194 = arith.subf %190, %193 : vector<8x8xf32>
    %195 = math.exp %194 : vector<8x8xf32>
    %cst_65 = arith.constant dense<0.000000e+00> : vector<8xf32>
    %196 = vector.multi_reduction <add>, %195, %cst_65 [1] : vector<8x8xf32> to vector<8xf32>
    %197 = vector.shape_cast %196 : vector<8xf32> to vector<8x1xf32>
    %198 = tpu.reciprocal %197 {approx = true} : vector<8x1xf32> -> vector<8x1xf32>
    %199 = vector.broadcast %198 : vector<8x1xf32> to vector<8x8xf32>
    %200 = arith.mulf %195, %199 : vector<8x8xf32>
    %201 = arith.truncf %200 : vector<8x8xf32> to vector<8x8xbf16>
    %cst_66 = arith.constant dense<0.000000e+00> : vector<8x8xf32>
    %202 = tpu.matmul %201, %188, %cst_66 {dimension_numbers = #tpu.dot_dimension_numbers<[1], [0], [0], [1], [0, 0, 1, 1], [], []>} : vector<8x8xbf16>, vector<8x8xbf16>, vector<8x8xf32> -> vector<8x8xf32>
    %203 = vector.extract_strided_slice %134 {offsets = [0, 24], sizes = [8, 8], strides = [1, 1]} : vector<8x32xf32> to vector<8x8xf32>
    %204 = arith.truncf %203 : vector<8x8xf32> to vector<8x8xbf16>
    %205 = vector.extract_strided_slice %141 {offsets = [0, 24], sizes = [8, 8], strides = [1, 1]} : vector<8x32xf32> to vector<8x8xf32>
    %206 = arith.truncf %205 : vector<8x8xf32> to vector<8x8xbf16>
    %207 = vector.extract_strided_slice %142 {offsets = [0, 24], sizes = [8, 8], strides = [1, 1]} : vector<8x32xf32> to vector<8x8xf32>
    %208 = arith.truncf %207 : vector<8x8xf32> to vector<8x8xbf16>
    %cst_67 = arith.constant dense<0.000000e+00> : vector<8x8xf32>
    %209 = tpu.matmul %204, %206, %cst_67 {dimension_numbers = #tpu.dot_dimension_numbers<[1], [1], [0], [0], [0, 0, 1, 0], [], []>} : vector<8x8xbf16>, vector<8x8xbf16>, vector<8x8xf32> -> vector<8x8xf32>
    %210 = arith.addf %209, %7 : vector<8x8xf32>
    %cst_68 = arith.constant dense<0xFF800000> : vector<8xf32>
    %211 = vector.multi_reduction <maximumf>, %210, %cst_68 [1] : vector<8x8xf32> to vector<8xf32>
    %212 = vector.shape_cast %211 : vector<8xf32> to vector<8x1xf32>
    %213 = vector.broadcast %212 : vector<8x1xf32> to vector<8x8xf32>
    %214 = arith.subf %210, %213 : vector<8x8xf32>
    %215 = math.exp %214 : vector<8x8xf32>
    %cst_69 = arith.constant dense<0.000000e+00> : vector<8xf32>
    %216 = vector.multi_reduction <add>, %215, %cst_69 [1] : vector<8x8xf32> to vector<8xf32>
    %217 = vector.shape_cast %216 : vector<8xf32> to vector<8x1xf32>
    %218 = tpu.reciprocal %217 {approx = true} : vector<8x1xf32> -> vector<8x1xf32>
    %219 = vector.broadcast %218 : vector<8x1xf32> to vector<8x8xf32>
    %220 = arith.mulf %215, %219 : vector<8x8xf32>
    %221 = arith.truncf %220 : vector<8x8xf32> to vector<8x8xbf16>
    %cst_70 = arith.constant dense<0.000000e+00> : vector<8x8xf32>
    %222 = tpu.matmul %221, %208, %cst_70 {dimension_numbers = #tpu.dot_dimension_numbers<[1], [0], [0], [1], [0, 0, 1, 1], [], []>} : vector<8x8xbf16>, vector<8x8xbf16>, vector<8x8xf32> -> vector<8x8xf32>
    %223 = tpu.concatenate %162, %182, %202, %222 in 1 : vector<8x8xf32>, vector<8x8xf32>, vector<8x8xf32>, vector<8x8xf32> -> vector<8x32xf32>
    %c0_71 = arith.constant 0 : index
    %c0_72 = arith.constant 0 : index
    %224 = vector.load %arg15[%c0_71, %c0_72] : memref<32x32xbf16, #tpu.memory_space<vmem>>, vector<32x32xbf16>
    %c0_73 = arith.constant 0 : index
    %c0_74 = arith.constant 0 : index
    %225 = vector.load %arg16[%c0_73, %c0_74] : memref<1x32xf32, #tpu.memory_space<vmem>>, vector<1x32xf32>
    %226 = arith.truncf %223 : vector<8x32xf32> to vector<8x32xbf16>
    %cst_75 = arith.constant dense<0.000000e+00> : vector<8x32xf32>
    %227 = tpu.matmul %226, %224, %cst_75 {dimension_numbers = #tpu.dot_dimension_numbers<[1], [0], [0], [1], [0, 0, 1, 1], [], []>} : vector<8x32xbf16>, vector<32x32xbf16>, vector<8x32xf32> -> vector<8x32xf32>
    %228 = vector.broadcast %225 : vector<1x32xf32> to vector<8x32xf32>
    %229 = arith.addf %227, %228 : vector<8x32xf32>
    %230 = arith.addf %128, %229 : vector<8x32xf32>
    %c0_76 = arith.constant 0 : index
    %c0_77 = arith.constant 0 : index
    %231 = vector.load %arg17[%c0_76, %c0_77] : memref<1x32xf32, #tpu.memory_space<vmem>>, vector<1x32xf32>
    %c0_78 = arith.constant 0 : index
    %c0_79 = arith.constant 0 : index
    %232 = vector.load %arg18[%c0_78, %c0_79] : memref<1x32xf32, #tpu.memory_space<vmem>>, vector<1x32xf32>
    %cst_80 = arith.constant dense<0.000000e+00> : vector<8xf32>
    %233 = vector.multi_reduction <add>, %230, %cst_80 [1] : vector<8x32xf32> to vector<8xf32>
    %234 = vector.shape_cast %233 : vector<8xf32> to vector<8x1xf32>
    %cst_81 = arith.constant 3.200000e+01 : f32
    %235 = vector.broadcast %cst_81 : f32 to vector<8x1xf32>
    %236 = arith.divf %234, %235 : vector<8x1xf32>
    %237 = vector.broadcast %236 : vector<8x1xf32> to vector<8x32xf32>
    %238 = arith.subf %230, %237 : vector<8x32xf32>
    %239 = arith.mulf %238, %238 : vector<8x32xf32>
    %cst_82 = arith.constant dense<0.000000e+00> : vector<8xf32>
    %240 = vector.multi_reduction <add>, %239, %cst_82 [1] : vector<8x32xf32> to vector<8xf32>
    %241 = vector.shape_cast %240 : vector<8xf32> to vector<8x1xf32>
    %cst_83 = arith.constant 3.200000e+01 : f32
    %242 = vector.broadcast %cst_83 : f32 to vector<8x1xf32>
    %243 = arith.divf %241, %242 : vector<8x1xf32>
    %244 = vector.broadcast %236 : vector<8x1xf32> to vector<8x32xf32>
    %245 = arith.subf %230, %244 : vector<8x32xf32>
    %cst_84 = arith.constant 9.99999974E-6 : f32
    %246 = vector.broadcast %cst_84 : f32 to vector<8x1xf32>
    %247 = arith.addf %243, %246 : vector<8x1xf32>
    %248 = math.rsqrt %247 : vector<8x1xf32>
    %249 = vector.broadcast %248 : vector<8x1xf32> to vector<8x32xf32>
    %250 = arith.mulf %245, %249 : vector<8x32xf32>
    %251 = vector.broadcast %231 : vector<1x32xf32> to vector<8x32xf32>
    %252 = arith.mulf %250, %251 : vector<8x32xf32>
    %253 = vector.broadcast %232 : vector<1x32xf32> to vector<8x32xf32>
    %254 = arith.addf %252, %253 : vector<8x32xf32>
    %c0_85 = arith.constant 0 : index
    %c0_86 = arith.constant 0 : index
    %255 = vector.load %arg19[%c0_85, %c0_86] : memref<32x64xbf16, #tpu.memory_space<vmem>>, vector<32x64xbf16>
    %c0_87 = arith.constant 0 : index
    %c0_88 = arith.constant 0 : index
    %256 = vector.load %arg20[%c0_87, %c0_88] : memref<1x64xf32, #tpu.memory_space<vmem>>, vector<1x64xf32>
    %257 = arith.truncf %254 : vector<8x32xf32> to vector<8x32xbf16>
    %cst_89 = arith.constant dense<0.000000e+00> : vector<8x64xf32>
    %258 = tpu.matmul %257, %255, %cst_89 {dimension_numbers = #tpu.dot_dimension_numbers<[1], [0], [0], [1], [0, 0, 1, 1], [], []>} : vector<8x32xbf16>, vector<32x64xbf16>, vector<8x64xf32> -> vector<8x64xf32>
    %259 = vector.broadcast %256 : vector<1x64xf32> to vector<8x64xf32>
    %260 = arith.addf %258, %259 : vector<8x64xf32>
    %cst_90 = arith.constant 0.000000e+00 : f32
    %261 = vector.broadcast %cst_90 : f32 to vector<8x64xf32>
    %262 = arith.maximumf %260, %261 : vector<8x64xf32>
    %c0_91 = arith.constant 0 : index
    %c0_92 = arith.constant 0 : index
    %263 = vector.load %arg21[%c0_91, %c0_92] : memref<64x32xbf16, #tpu.memory_space<vmem>>, vector<64x32xbf16>
    %c0_93 = arith.constant 0 : index
    %c0_94 = arith.constant 0 : index
    %264 = vector.load %arg22[%c0_93, %c0_94] : memref<1x32xf32, #tpu.memory_space<vmem>>, vector<1x32xf32>
    %265 = arith.truncf %262 : vector<8x64xf32> to vector<8x64xbf16>
    %cst_95 = arith.constant dense<0.000000e+00> : vector<8x32xf32>
    %266 = tpu.matmul %265, %263, %cst_95 {dimension_numbers = #tpu.dot_dimension_numbers<[1], [0], [0], [1], [0, 0, 1, 1], [], []>} : vector<8x64xbf16>, vector<64x32xbf16>, vector<8x32xf32> -> vector<8x32xf32>
    %267 = vector.broadcast %264 : vector<1x32xf32> to vector<8x32xf32>
    %268 = arith.addf %266, %267 : vector<8x32xf32>
    %269 = arith.addf %254, %268 : vector<8x32xf32>
    %c0_96 = arith.constant 0 : index
    %c0_97 = arith.constant 0 : index
    %270 = vector.load %arg23[%c0_96, %c0_97] : memref<1x32xf32, #tpu.memory_space<vmem>>, vector<1x32xf32>
    %c0_98 = arith.constant 0 : index
    %c0_99 = arith.constant 0 : index
    %271 = vector.load %arg24[%c0_98, %c0_99] : memref<1x32xf32, #tpu.memory_space<vmem>>, vector<1x32xf32>
    %cst_100 = arith.constant dense<0.000000e+00> : vector<8xf32>
    %272 = vector.multi_reduction <add>, %269, %cst_100 [1] : vector<8x32xf32> to vector<8xf32>
    %273 = vector.shape_cast %272 : vector<8xf32> to vector<8x1xf32>
    %cst_101 = arith.constant 3.200000e+01 : f32
    %274 = vector.broadcast %cst_101 : f32 to vector<8x1xf32>
    %275 = arith.divf %273, %274 : vector<8x1xf32>
    %276 = vector.broadcast %275 : vector<8x1xf32> to vector<8x32xf32>
    %277 = arith.subf %269, %276 : vector<8x32xf32>
    %278 = arith.mulf %277, %277 : vector<8x32xf32>
    %cst_102 = arith.constant dense<0.000000e+00> : vector<8xf32>
    %279 = vector.multi_reduction <add>, %278, %cst_102 [1] : vector<8x32xf32> to vector<8xf32>
    %280 = vector.shape_cast %279 : vector<8xf32> to vector<8x1xf32>
    %cst_103 = arith.constant 3.200000e+01 : f32
    %281 = vector.broadcast %cst_103 : f32 to vector<8x1xf32>
    %282 = arith.divf %280, %281 : vector<8x1xf32>
    %283 = vector.broadcast %275 : vector<8x1xf32> to vector<8x32xf32>
    %284 = arith.subf %269, %283 : vector<8x32xf32>
    %cst_104 = arith.constant 9.99999974E-6 : f32
    %285 = vector.broadcast %cst_104 : f32 to vector<8x1xf32>
    %286 = arith.addf %282, %285 : vector<8x1xf32>
    %287 = math.rsqrt %286 : vector<8x1xf32>
    %288 = vector.broadcast %287 : vector<8x1xf32> to vector<8x32xf32>
    %289 = arith.mulf %284, %288 : vector<8x32xf32>
    %290 = vector.broadcast %270 : vector<1x32xf32> to vector<8x32xf32>
    %291 = arith.mulf %289, %290 : vector<8x32xf32>
    %292 = vector.broadcast %271 : vector<1x32xf32> to vector<8x32xf32>
    %293 = arith.addf %291, %292 : vector<8x32xf32>
    %c0_105 = arith.constant 0 : index
    %c0_106 = arith.constant 0 : index
    %c0_107 = arith.constant 0 : index
    %294 = vector.load %arg25[%c0_105, %c0_106, %c0_107] : memref<1x8x32xf32, #tpu.memory_space<vmem>>, vector<1x8x32xf32>
    %295 = vector.shape_cast %294 : vector<1x8x32xf32> to vector<8x32xf32>
    %296 = vector.shape_cast %293 : vector<8x32xf32> to vector<1x8x32xf32>
    tpu.vector_store %arg25[%c0_105, %c0_106, %c0_107], %296 {strides = array<i32>} : memref<1x8x32xf32, #tpu.memory_space<vmem>>, vector<1x8x32xf32>,
    return
  }
  func.func @transform_0(%arg0: i32) -> (i32, i32, i32) {
    %c0_i32 = arith.constant 0 : i32
    %c0_i32_0 = arith.constant 0 : i32
    %c0_i32_1 = arith.constant 0 : i32
    return %arg0, %c0_i32, %c0_i32_0 : i32, i32, i32
  }
  func.func @transform_1(%arg0: i32) -> (i32, i32, i32) {
    %c0_i32 = arith.constant 0 : i32
    %c0_i32_0 = arith.constant 0 : i32
    %c0_i32_1 = arith.constant 0 : i32
    return %arg0, %c0_i32, %c0_i32_0 : i32, i32, i32
  }
  func.func @transform_2(%arg0: i32) -> (i32, i32, i32) {
    %c0_i32 = arith.constant 0 : i32
    %c0_i32_0 = arith.constant 0 : i32
    %c0_i32_1 = arith.constant 0 : i32
    return %arg0, %c0_i32, %c0_i32_0 : i32, i32, i32
  }
  func.func @transform_3(%arg0: i32) -> (i32, i32, i32) {
    %c0_i32 = arith.constant 0 : i32
    %c0_i32_0 = arith.constant 0 : i32
    %c0_i32_1 = arith.constant 0 : i32
    return %arg0, %c0_i32, %c0_i32_0 : i32, i32, i32
  }
  func.func @transform_4(%arg0: i32) -> (i32, i32) {
    %c0_i32 = arith.constant 0 : i32
    %c0_i32_0 = arith.constant 0 : i32
    %c0_i32_1 = arith.constant 0 : i32
    return %c0_i32, %c0_i32_0 : i32, i32
  }
  func.func @transform_5(%arg0: i32) -> (i32, i32) {
    %c0_i32 = arith.constant 0 : i32
    %c0_i32_0 = arith.constant 0 : i32
    %c0_i32_1 = arith.constant 0 : i32
    return %c0_i32, %c0_i32_0 : i32, i32
  }
  func.func @transform_6(%arg0: i32) -> (i32, i32) {
    %c0_i32 = arith.constant 0 : i32
    %c0_i32_0 = arith.constant 0 : i32
    %c0_i32_1 = arith.constant 0 : i32
    return %c0_i32, %c0_i32_0 : i32, i32
  }
  func.func @transform_7(%arg0: i32) -> (i32, i32) {
    %c0_i32 = arith.constant 0 : i32
    %c0_i32_0 = arith.constant 0 : i32
    %c0_i32_1 = arith.constant 0 : i32
    return %c0_i32, %c0_i32_0 : i32, i32
  }
  func.func @transform_8(%arg0: i32) -> (i32, i32) {
    %c0_i32 = arith.constant 0 : i32
    %c0_i32_0 = arith.constant 0 : i32
    %c0_i32_1 = arith.constant 0 : i32
    return %c0_i32, %c0_i32_0 : i32, i32
  }
  func.func @transform_9(%arg0: i32) -> (i32, i32) {
    %c0_i32 = arith.constant 0 : i32
    %c0_i32_0 = arith.constant 0 : i32
    %c0_i32_1 = arith.constant 0 : i32
    return %c0_i32, %c0_i32_0 : i32, i32
  }
  func.func @transform_10(%arg0: i32) -> (i32, i32) {
    %c0_i32 = arith.constant 0 : i32
    %c0_i32_0 = arith.constant 0 : i32
    %c0_i32_1 = arith.constant 0 : i32
    return %c0_i32, %c0_i32_0 : i32, i32
  }
  func.func @transform_11(%arg0: i32) -> (i32, i32) {
    %c0_i32 = arith.constant 0 : i32
    %c0_i32_0 = arith.constant 0 : i32
    %c0_i32_1 = arith.constant 0 : i32
    return %c0_i32, %c0_i32_0 : i32, i32
  }
  func.func @transform_12(%arg0: i32) -> (i32, i32) {
    %c0_i32 = arith.constant 0 : i32
    %c0_i32_0 = arith.constant 0 : i32
    %c0_i32_1 = arith.constant 0 : i32
    return %c0_i32, %c0_i32_0 : i32, i32
  }
  func.func @transform_13(%arg0: i32) -> (i32, i32) {
    %c0_i32 = arith.constant 0 : i32
    %c0_i32_0 = arith.constant 0 : i32
    %c0_i32_1 = arith.constant 0 : i32
    return %c0_i32, %c0_i32_0 : i32, i32
  }
  func.func @transform_14(%arg0: i32) -> (i32, i32) {
    %c0_i32 = arith.constant 0 : i32
    %c0_i32_0 = arith.constant 0 : i32
    %c0_i32_1 = arith.constant 0 : i32
    return %c0_i32, %c0_i32_0 : i32, i32
  }
  func.func @transform_15(%arg0: i32) -> (i32, i32) {
    %c0_i32 = arith.constant 0 : i32
    %c0_i32_0 = arith.constant 0 : i32
    %c0_i32_1 = arith.constant 0 : i32
    return %c0_i32, %c0_i32_0 : i32, i32
  }
  func.func @transform_16(%arg0: i32) -> (i32, i32) {
    %c0_i32 = arith.constant 0 : i32
    %c0_i32_0 = arith.constant 0 : i32
    %c0_i32_1 = arith.constant 0 : i32
    return %c0_i32, %c0_i32_0 : i32, i32
  }
  func.func @transform_17(%arg0: i32) -> (i32, i32) {
    %c0_i32 = arith.constant 0 : i32
    %c0_i32_0 = arith.constant 0 : i32
    %c0_i32_1 = arith.constant 0 : i32
    return %c0_i32, %c0_i32_0 : i32, i32
  }
  func.func @transform_18(%arg0: i32) -> (i32, i32) {
    %c0_i32 = arith.constant 0 : i32
    %c0_i32_0 = arith.constant 0 : i32
    %c0_i32_1 = arith.constant 0 : i32
    return %c0_i32, %c0_i32_0 : i32, i32
  }
  func.func @transform_19(%arg0: i32) -> (i32, i32) {
    %c0_i32 = arith.constant 0 : i32
    %c0_i32_0 = arith.constant 0 : i32
    %c0_i32_1 = arith.constant 0 : i32
    return %c0_i32, %c0_i32_0 : i32, i32
  }
  func.func @transform_20(%arg0: i32) -> (i32, i32) {
    %c0_i32 = arith.constant 0 : i32
    %c0_i32_0 = arith.constant 0 : i32
    %c0_i32_1 = arith.constant 0 : i32
    return %c0_i32, %c0_i32_0 : i32, i32
  }
  func.func @transform_21(%arg0: i32) -> (i32, i32) {
    %c0_i32 = arith.constant 0 : i32
    %c0_i32_0 = arith.constant 0 : i32
    %c0_i32_1 = arith.constant 0 : i32
    return %c0_i32, %c0_i32_0 : i32, i32
  }
  func.func @transform_22(%arg0: i32) -> (i32, i32) {
    %c0_i32 = arith.constant 0 : i32
    %c0_i32_0 = arith.constant 0 : i32
    %c0_i32_1 = arith.constant 0 : i32
    return %c0_i32, %c0_i32_0 : i32, i32
  }
  func.func @transform_23(%arg0: i32) -> (i32, i32) {
    %c0_i32 = arith.constant 0 : i32
    %c0_i32_0 = arith.constant 0 : i32
    %c0_i32_1 = arith.constant 0 : i32
    return %c0_i32, %c0_i32_0 : i32, i32
  }
  func.func @transform_24(%arg0: i32) -> (i32, i32, i32) {
    %c0_i32 = arith.constant 0 : i32
    %c0_i32_0 = arith.constant 0 : i32
    %c0_i32_1 = arith.constant 0 : i32
    return %arg0, %c0_i32, %c0_i32_0 : i32, i32, i32
  }
}

</mosaic_0001>

<bundles_post_ra>
// kernel: morpheme_restore_forward.9
= control target key start
LH: loop header
LB: loop body
LE: loop exit
PB: predicated region body
PF: predicated region fallthrough
CT: control target
= control target key end

     0   :  { %v111_v0 = vmov 0.0   ;;  %vm112_vm0 = vmmov 0   ;;  %vm41_vm1 = vcmask 261120   ;;  %s154_s1 = inlined_call_operand.vmem [shape: bf16[32,128], index: 1, kind: input, shape index: {}]   ;;  %s155_s0 = inlined_call_operand.vmem [shape: f32[16,32], index: 0, kind: input, shape index: {}]   ;;  %s156_s2 = inlined_call_operand.vmem [shape: f32[1,128], index: 2, kind: input, shape index: {}]   ;;  %s157_s3 = inlined_call_operand.vmem [shape: f32[16,128], index: 3, kind: output, shape index: {}]  }
   0x1   :  { %99 = vmatprep.subr.bf16.mxu0 %v111_v0  ;;  %v109_v1 = vld [vmem:[%s154_s1] sm:$0xff]   ;;  %103 = vmatprep.mubr.msk.bf16.mxu0 %vm112_vm0, %v111_v0  ;;  %v110_v2 = vld [vmem:[%s154_s1 + $0x8] sm:$0xff]  }
   0x2   :  { %100 = vmatpush3.bf16.msra.mxu0 %v109_v1  ;;  %v15_v3 = vld [vmem:[%s155_s0] sm:$0xff]  ;;  %v16_v4 = vld [vmem:[%s155_s0 + $0x8] sm:$0xff] }
   0x3   :  { %101 = vmatprep.subr.bf16.mxu0 %v111_v0  ;;  %v17_v5 = vpack.c.bf16 %v16_v4, %v15_v3  ;;  %v92_v6 = vld [vmem:[%s156_s2] ss:$0 sm:$0xff] }
   0x6   :  { %102 = vmatpush3.bf16.msra.mxu0 %v110_v2 }
   0x9   :  { %104 = vmatmul.mubr.msk.bf16.vlgmr.msra.gmra.mrb[0].mxu0 %vm41_vm1, %v17_v5 }
  0xdc   :  { %v79_v7 = vpop.f32.mrb[0].mxu0 }
  0xdd   :  { %v80_v8 = vadd.f32 %v92_v6, %v79_v7  ;;  %v105_v9 = vpop.f32.mrb[1].mxu0 }
  0xde   :  { %v82_v10 = vpop.f32.mrb[2].mxu0 }
  0xdf   :  { %86 = vst [vmem:[%s157_s3] sm:$0xff] %v80_v8  ;;  %v83_v11 = vadd.f32 %v92_v6, %v82_v10  ;;  %v106_v12 = vpop.f32.mrb[3].mxu0 }
  0xe1   :  { %87 = vst [vmem:[%s157_s3 + $0x8] sm:$0xff] %v83_v11 }

// kernel: morpheme_restore_forward.5
= control target key start
LH: loop header
LB: loop body
LE: loop exit
PB: predicated region body
PF: predicated region fallthrough
CT: control target
= control target key end

     0   :  { %s1663_s29 = smov 0   ;;  %s1836_s0 = inlined_call_operand.vmem [shape: f32[2,8,32], index: 0, kind: input, shape index: {}]   ;;  %s1837_s1 = inlined_call_operand.vmem [shape: f32[2,8,8], index: 1, kind: input, shape index: {}]   ;;  %s1838_s2 = inlined_call_operand.vmem [shape: bf16[32,96], index: 2, kind: input, shape index: {}]   ;;  %s1839_s3 = inlined_call_operand.vmem [shape: f32[1,96], index: 3, kind: input, shape index: {}]   ;;  %s1840_s4 = inlined_call_operand.vmem [shape: bf16[32,32], index: 4, kind: input, shape index: {}]   ;;  %s1841_s5 = inlined_call_operand.vmem [shape: f32[1,32], index: 5, kind: input, shape index: {}, may-alias: {5,7,11,13}]   ;;  %s1842_s6 = inlined_call_operand.vmem [shape: f32[1,32], index: 6, kind: input, shape index: {}, may-alias: {6,12}]   ;;  %s1843_s7 = inlined_call_operand.vmem [shape: f32[1,32], index: 7, kind: input, shape index: {}, may-alias: {5,7,11,13}]   ;;  %s1844_s8 = inlined_call_operand.vmem [shape: bf16[32,64], index: 8, kind: input, shape index: {}]   ;;  %s1845_s9 = inlined_call_operand.vmem [shape: f32[1,64], index: 9, kind: input, shape index: {}]   ;;  %s1846_s10 = inlined_call_operand.vmem [shape: bf16[64,32], index: 10, kind: input, shape index: {}]   ;;  %s1847_s11 = inlined_call_operand.vmem [shape: f32[1,32], index: 11, kind: input, shape index: {}, may-alias: {5,7,11,13}]   ;;  %s1848_s12 = inlined_call_operand.vmem [shape: f32[1,32], index: 12, kind: input, shape index: {}, may-alias: {6,12}]   ;;  %s1849_s13 = inlined_call_operand.vmem [shape: f32[1,32], index: 13, kind: input, shape index: {}, may-alias: {5,7,11,13}]   ;;  %s1850_s14 = inlined_call_operand.vmem [shape: f32[2,8,32], index: 14, kind: output, shape index: {}]  }
   0x1 LB: > { %s1356_s30 = sadd.s32 4294967295, %s1570_s29   ;;  %p1360_p0 = scmp.ge.s32.totalorder %s1570_s29, 1  ;;  %s1570_s29 = sphi %s1663_s29, %s24_s29  }
   0x2   : > { %p420_p1 = scmp.lt.s32.totalorder %s1570_s29, 3 }
   0x4   : > { %p421_p2 = pnand %p1360_p0, %p420_p1 }
   0x5   : > { %v1534_v0 = vld [vmem:[%s1838_s2] sm:$0xff] (!%p421_p2)   ;;  %v1572_v1 = vmov (!%p421_p2), 0.0   ;;  %v1535_v2 = vld [vmem:[%s1838_s2 + $0x8] sm:$0xff] (!%p421_p2)   ;;  %vm1573_vm0 = vmmov (!%p421_p2), 0   ;;  %p468_p3 = scmp.lt.s32.totalorder (!%p421_p2), %s1356_s30, 1  ;;  %vm507_vm1 = vcmask (!%p421_p2), 261120  }
   0x6   : > { %424 = sbr.rel (%p421_p2) target bundleno = 2559 (0x9ff), region = 76  ;;  %1426 = vmatprep.subr.bf16.mxu0 (!%p421_p2), %v1572_v1  ;;  %1434 = vmatprep.subr.bf16.mxu1 (!%p421_p2), %v1572_v1  ;;  %v1364_v5 = vld [vmem:[%s1839_s3] ss:$0 sm:$0xff] (!%p421_p2)  ;;  %s1574_s25 = smov (!%p421_p2), 120   ;;  %vm555_vm2 = vcmask (!%p421_p2), 64512   ;;  %vm619_vm3 = vcmask (!%p421_p2), 1043456  }
   0x7   : > { %1427 = vmatpush3.bf16.msra.mxu0 (!%p421_p2), %v1534_v0  ;;  %1430 = vmatprep.mubr.msk.bf16.mxu0 (!%p421_p2), %vm1573_vm0, %v1572_v1  ;;  %s1575_s26 = smov (!%p421_p2), 96   ;;  %s1576_s27 = smov (!%p421_p2), 80   ;;  %vm1006_vm4 = vcmask (!%p421_p2), 130048   ;;  %vm1008_vm5 = vcmask (!%p421_p2), 195584   ;;  %vm1216_vm6 = vcmask (!%p421_p2), 523264  }
   0x8   : > { %1428 = vmatprep.subr.bf16.mxu0 (!%p421_p2), %v1572_v1  ;;  %1436 = vmatprep.mubr.msk.bf16.mxu1 (!%p421_p2), %vm1573_vm0, %v1572_v1  ;;  %s1577_s28 = smov (!%p421_p2), 88   ;;  %s1579_s15 = smov (!%p421_p2), 112  }
   0x9   : > { %s1580_s16 = smov (!%p421_p2), 104   ;;  %s1581_s21 = smov (!%p421_p2), 56  }
   0xa   : > { %s1583_s23 = smov (!%p421_p2), 40   ;;  %s1584_s24 = smov (!%p421_p2), 48  }
   0xb   : > { %1429 = vmatpush3.bf16.msra.mxu0 (!%p421_p2), %v1535_v2 }
   0xc   : > { %1440 = vmatprep.subr.bf16.mxu0 (!%p421_p2), %v1572_v1 }
   0xd   : > { %s1852_s30 = smov (!%p468_p3, %s1356_s30), 1 }
   0xe   : > { %s1684_s19 = sshll.u32 %s1852_s30, 3  ;;  %s1578_s30 = smov 72  }
   0xf   : > { %s471_s22 = scalar_lea.vmem %s1836_s0, %s1684_s19  ;;  %s475_s20 = scalar_lea.vmem %s1837_s1, %s1684_s19 }
  0x10   : > { %v1691_v3 = vld [vmem:[%s471_s22] sm:$0xff]  ;;  %s1582_s22 = smov 64   ;;  %s479_s17 = scalar_lea.vmem %s1850_s14, %s1684_s19 }
  0x11   : > { %v488_v4 = vpack.c.bf16 %v1691_v3, %v1691_v3  ;;  %v482_v23 = vld [vmem:[%s475_s20] sm:$0xff] }
  0x13   : > { %1431 = vmatmul.mubr.msk.bf16.vlgmr.msra.gmra.mrb[0].mxu0 %vm507_vm1, %v488_v4 }
  0x14   : > { %1442 = vmatprep.mubr.msk.bf16.mxu0 %vm1573_vm0, %v1572_v1 }
  0xe6   : > { %v545_v6 = vpop.f32.mrb[0].mxu0 }
  0xe7   : > { %v546_v7 = vadd.f32 %v1364_v5, %v545_v6  ;;  %v1432_v8 = vpop.f32.mrb[1].mxu0 }
  0xe8   : > { %v548_v9 = vpop.f32.mrb[2].mxu0 }
  0xe9   : > { %v1701_v10 = vpack.c.bf16 %v546_v7, %v546_v7  ;;  %v1433_v11 = vpop.f32.mrb[3].mxu0 }
  0xeb   : > { %663 = vrot.lane.b32.xlu1 %v1701_v10, %s1574_s25  ;;  %553 = vrot.lane.b32.xlu0 %v1701_v10, %s1575_s26  ;;  %s1585_s25 = smov 8  }
  0xef   : > { %775 = vrot.lane.b32.xlu1 %v1701_v10, %s1576_s27  ;;  %665 = vrot.lane.b32.xlu0 %v1701_v10, %s1577_s28 }
  0xf3   : > { %885 = vrot.lane.b32.xlu1 %v1701_v10, %s1578_s30  ;;  %773 = vrot.lane.b32.xlu0 %v1701_v10, %s1579_s15  ;;  %s1586_s15 = smov 16  }
  0xf7   : > { %883 = vrot.lane.b32.xlu0 %v1701_v10, %s1580_s16  ;;  %s1587_s16 = smov 24  }
 0x15d   : > { %v554_v12 = vpop.permute.xlu0 %553  ;;  %v664_v15 = vpop.permute.xlu1 %663 }
 0x15e   : > { %v560_v13 = vsel %vm555_vm2, %v554_v12, 0 }
 0x15f   : > { %1435 = vmatpush3.bf16.xpose.msra.mxu1 %v560_v13 }
 0x160   : > { %1446 = vmatprep.subr.bf16.mxu1 %v1572_v1 }
 0x161   : > { %v666_v14 = vpop.permute.xlu0 %665  ;;  %v776_v17 = vpop.permute.xlu1 %775 }
 0x162   : > { %v671_v16 = vsel %vm555_vm2, %v666_v14, 0  ;;  %v781_v18 = vsel %vm555_vm2, %v776_v17, 0 }
 0x165   : > { %v886_v19 = vpop.permute.xlu1 %885  ;;  %v774_v20 = vpop.permute.xlu0 %773 }
 0x166   : > { %1437 = vmatmul.mubr.msk.bf16.vlgmr.msra.gmra.mrb[0].mxu1 %vm555_vm2, %v1701_v10  ;;  %v891_v21 = vsel %vm555_vm2, %v886_v19, 0 }
 0x167   : > { %1447 = vmatpush3.bf16.xpose.msra.mxu1 %v671_v16  ;;  %1448 = vmatprep.mubr.msk.bf16.mxu1 %vm1573_vm0, %v1572_v1 }
 0x168   : > { %1458 = vmatprep.subr.bf16.mxu1 %v1572_v1 }
 0x169   : > { %v884_v22 = vpop.permute.xlu0 %883 }
 0x16e   : > { %1449 = vmatmul.mubr.msk.bf16.vlgmr.msra.gmra.mrb[4].mxu1 %vm555_vm2, %v664_v15 }
 0x16f   : > { %1459 = vmatpush3.bf16.xpose.msra.mxu1 %v781_v18  ;;  %1460 = vmatprep.mubr.msk.bf16.mxu1 %vm1573_vm0, %v1572_v1 }
 0x170   : > { %1470 = vmatprep.subr.bf16.mxu1 %v1572_v1 }
 0x176   : > { %1461 = vmatmul.mubr.msk.bf16.vlgmr.msra.gmra.mrb[8].mxu1 %vm555_vm2, %v774_v20 }
 0x177   : > { %1471 = vmatpush3.bf16.xpose.msra.mxu1 %v891_v21  ;;  %1472 = vmatprep.mubr.msk.bf16.mxu1 %vm1573_vm0, %v1572_v1 }
 0x178   : > { %1482 = vmatprep.subr.bf16.mxu1 %v1572_v1 }
 0x17e   : > { %1473 = vmatmul.mubr.msk.bf16.vlgmr.msra.gmra.mrb[12].mxu1 %vm555_vm2, %v884_v22 }
 0x17f   : > { %1486 = vmatprep.mubr.msk.bf16.mxu1 %vm1573_vm0, %v1572_v1 }
 0x239   : > { %v596_v24 = vpop.f32.mrb[0].mxu1 }
 0x23a   : > { %v597_v25 = vadd.f32 %v596_v24, %v482_v23  ;;  %v1438_v26 = vpop.f32.mrb[1].mxu1 }
 0x23b   : > { %v599_v27 = vpop.f32.mrb[2].mxu1 }
 0x23c   : > { %v1439_v28 = vpop.f32.mrb[3].mxu1  ;;  %v602_v29 = vsel %vm555_vm2, %v597_v25, -inf }
 0x23d   : > { %603 = vmax.xlane.f32.xlu1 %v602_v29 }
 0x241   : > { %v707_v30 = vpop.f32.mrb[4].mxu1 }
 0x242   : > { %v708_v31 = vadd.f32 %v707_v30, %v482_v23  ;;  %v1450_v32 = vpop.f32.mrb[5].mxu1 }
 0x243   : > { %v710_v33 = vpop.f32.mrb[6].mxu1 }
 0x244   : > { %v1451_v34 = vpop.f32.mrb[7].mxu1  ;;  %v713_v35 = vsel %vm555_vm2, %v708_v31, -inf }
 0x245   : > { %714 = vmax.xlane.f32.xlu0 %v713_v35 }
 0x249   : > { %v817_v36 = vpop.f32.mrb[8].mxu1 }
 0x24a   : > { %v818_v37 = vadd.f32 %v817_v36, %v482_v23  ;;  %v1462_v38 = vpop.f32.mrb[9].mxu1 }
 0x24b   : > { %v820_v39 = vpop.f32.mrb[10].mxu1  ;;  %v1536_v38 = vld [vmem:[%s1840_s4] sm:$0xff]  }
 0x24c   : > { %v1463_v40 = vpop.f32.mrb[11].mxu1  ;;  %v823_v41 = vsel %vm555_vm2, %v818_v37, -inf  ;;  %1483 = vmatpush3.bf16.msra.mxu1 %v1536_v38  ;;  %v1537_v39 = vld [vmem:[%s1840_s4 + $0x8] sm:$0xff]  }
 0x24d   : > { %824 = vmax.xlane.f32.xlu0 %v823_v41  ;;  %1484 = vmatprep.subr.bf16.mxu1 %v1572_v1 }
 0x250   : > { %1485 = vmatpush3.bf16.msra.mxu1 %v1537_v39 }
 0x251   : > { %v927_v42 = vpop.f32.mrb[12].mxu1  ;;  %1498 = vmatprep.subr.bf16.mxu1 %v1572_v1 }
 0x252   : > { %v928_v43 = vadd.f32 %v927_v42, %v482_v23  ;;  %v1474_v44 = vpop.f32.mrb[13].mxu1 }
 0x253   : > { %v930_v45 = vpop.f32.mrb[14].mxu1 }
 0x254   : > { %v1475_v46 = vpop.f32.mrb[15].mxu1  ;;  %v933_v47 = vsel %vm555_vm2, %v928_v43, -inf }
 0x255   : > { %934 = vmax.xlane.f32.xlu1 %v933_v47 }
 0x2ca   : > { %v604_v48 = vpop.xlane.xlu1 %603 }
 0x2cb   : > { %v605_v49 = vsub.f32 %v597_v25, %v604_v48 }
 0x2cd   : > { %v606_v50 = vmul.f32 1.442695, %v605_v49 }
 0x2cf   : > { %1544 = vpow2.f32 %v606_v50 }
 0x2d2   : > { %v715_v51 = vpop.xlane.xlu0 %714 }
 0x2d3   : > { %v716_v52 = vsub.f32 %v708_v31, %v715_v51 }
 0x2d5   : > { %v717_v53 = vmul.f32 1.442695, %v716_v52 }
 0x2d7   : > { %1546 = vpow2.f32 %v717_v53 }
 0x2d9   : > { %v1545_v54 = vpop.eup %1544 }
 0x2da   : > { %v825_v55 = vpop.xlane.xlu0 %824  ;;  %v608_v56 = vsel %vm555_vm2, %v1545_v54, 0.0 }
 0x2db   : > { %v826_v57 = vsub.f32 %v818_v37, %v825_v55  ;;  %609 = vadd.xlane.f32.xlu0 %v608_v56  ;;  %v1376_v55 = vld [vmem:[%s1841_s5] ss:$0 sm:$0xff] }
 0x2dd   : > { %v827_v58 = vmul.f32 1.442695, %v826_v57 }
 0x2df   : > { %1548 = vpow2.f32 %v827_v58 }
 0x2e1   : > { %v1547_v59 = vpop.eup %1546 }
 0x2e2   : > { %v719_v60 = vsel %vm555_vm2, %v1547_v59, 0.0  ;;  %v935_v63 = vpop.xlane.xlu1 %934 }
 0x2e3   : > { %720 = vadd.xlane.f32.xlu1 %v719_v60  ;;  %v936_v0 = vsub.f32 %v928_v43, %v935_v63 }
 0x2e5   : > { %v937_v2 = vmul.f32 1.442695, %v936_v0 }
 0x2e7   : > { %1550 = vpow2.f32 %v937_v2 }
 0x2e9   : > { %v1549_v61 = vpop.eup %1548 }
 0x2ea   : > { %v829_v62 = vsel %vm555_vm2, %v1549_v61, 0.0 }
 0x2eb   : > { %830 = vadd.xlane.f32.xlu0 %v829_v62 }
 0x2f1   : > { %v1551_v4 = vpop.eup %1550 }
 0x2f2   : > { %v939_v5 = vsel %vm555_vm2, %v1551_v4, 0.0 }
 0x2f4   : > { %725 = vrot.lane.b32.xlu1 %v1701_v10, %s1581_s21 }
 0x301   : > { %614 = vrot.lane.b32.xlu0 %v1701_v10, %s1582_s22 }
 0x305   : > { %945 = vrot.lane.b32.xlu0 %v1701_v10, %s1583_s23 }
 0x318   : > { %940 = vadd.xlane.f32.xlu1 %v939_v5 }
 0x329   : > { %835 = vrot.lane.b32.xlu1 %v1701_v10, %s1584_s24 }
 0x368   : > { %v610_v6 = vpop.xlane.xlu0 %609 }
 0x369   : > { %1552 = vrcp.f32 %v610_v6  ;;  %v1538_v6 = vld [vmem:[%s1844_s8] sm:$0xff]  }
 0x370   : > { %v721_v7 = vpop.xlane.xlu1 %720 }
 0x371   : > { %1554 = vrcp.f32 %v721_v7  ;;  %v1540_v7 = vld [vmem:[%s1846_s10] sm:$0xff]  }
 0x373   : > { %v1553_v8 = vpop.eup %1552 }
 0x374   : > { %v612_v11 = vmul.f32 %v1553_v8, %v1545_v54  ;;  %v726_v14 = vpop.permute.xlu1 %725  ;;  %v1541_v8 = vld [vmem:[%s1846_s10 + $0x8] sm:$0xff]  }
 0x375   : > { %v731_v17 = vsel %vm619_vm3, %v726_v14, 0  ;;  %v1380_v14 = vld [vmem:[%s1842_s6] ss:$0 sm:$0xff] }
 0x376   : > { %v613_v15 = vpack.c.bf16 %v612_v11, %v612_v11 }
 0x378   : > { %v831_v9 = vpop.xlane.xlu0 %830 }
 0x379   : > { %1556 = vrcp.f32 %v831_v9 }
 0x37b   : > { %v1555_v16 = vpop.eup %1554 }
 0x37c   : > { %v615_v12 = vpop.permute.xlu0 %614  ;;  %v723_v10 = vmul.f32 %v1555_v16, %v1547_v59  ;;  %v1381_v16 = vld [vmem:[%s1843_s7] ss:$0 sm:$0xff] }
 0x37d   : > { %v621_v13 = vsel %vm619_vm3, %v615_v12, 0 }
 0x37e   : > { %1441 = vmatpush3.bf16.msra.mxu0 %v621_v13  ;;  %v724_v18 = vpack.c.bf16 %v723_v10, %v723_v10 }
 0x37f   : > { %1452 = vmatprep.subr.bf16.mxu0 %v1572_v1 }
 0x380   : > { %v946_v24 = vpop.permute.xlu0 %945 }
 0x381   : > { %1443 = vmatmul.mubr.msk.bf16.vlgmr.msra.gmra.mrb[4].mxu0 %vm555_vm2, %v613_v15  ;;  %v951_v26 = vsel %vm619_vm3, %v946_v24, 0 }
 0x382   : > { %1453 = vmatpush3.bf16.msra.mxu0 %v731_v17  ;;  %1454 = vmatprep.mubr.msk.bf16.mxu0 %vm1573_vm0, %v1572_v1 }
 0x383   : > { %1464 = vmatprep.subr.bf16.mxu0 %v1572_v1  ;;  %v1557_v19 = vpop.eup %1556 }
 0x384   : > { %v833_v21 = vmul.f32 %v1557_v19, %v1549_v61  ;;  %v1542_v19 = vld [vmem:[%s1846_s10 + $0x10] sm:$0xff]  }
 0x386   : > { %v834_v25 = vpack.c.bf16 %v833_v21, %v833_v21  ;;  %v1382_v21 = vld [vmem:[%s1845_s9] ss:$0 sm:$0xff] }
 0x389   : > { %1455 = vmatmul.mubr.msk.bf16.vlgmr.msra.gmra.mrb[8].mxu0 %vm555_vm2, %v724_v18 }
 0x38a   : > { %1466 = vmatprep.mubr.msk.bf16.mxu0 %vm1573_vm0, %v1572_v1 }
 0x3a5   : > { %v941_v20 = vpop.xlane.xlu1 %940 }
 0x3a6   : > { %1558 = vrcp.f32 %v941_v20  ;;  %v1543_v20 = vld [vmem:[%s1846_s10 + $0x18] sm:$0xff]  }
 0x3a9   : > { %v836_v22 = vpop.permute.xlu1 %835 }
 0x3aa   : > { %v841_v23 = vsel %vm619_vm3, %v836_v22, 0 }
 0x3ab   : > { %1465 = vmatpush3.bf16.msra.mxu0 %v841_v23 }
 0x3ac   : > { %1476 = vmatprep.subr.bf16.mxu0 %v1572_v1 }
 0x3ae   : > { %1467 = vmatmul.mubr.msk.bf16.vlgmr.msra.gmra.mrb[12].mxu0 %vm555_vm2, %v834_v25 }
 0x3af   : > { %1477 = vmatpush3.bf16.msra.mxu0 %v951_v26  ;;  %1478 = vmatprep.mubr.msk.bf16.mxu0 %vm1573_vm0, %v1572_v1 }
 0x3b0   : > { %v1559_v27 = vpop.eup %1558  ;;  %1490 = vmatprep.subr.bf16.mxu0 %v1572_v1 }
 0x3b1   : > { %v943_v28 = vmul.f32 %v1559_v27, %v1551_v4 }
 0x3b3   : > { %v944_v29 = vpack.c.bf16 %v943_v28, %v943_v28 }
 0x3b6   : > { %1479 = vmatmul.mubr.msk.bf16.vlgmr.msra.gmra.mrb[16].mxu0 %vm555_vm2, %v944_v29 }
 0x3b7   : > { %1494 = vmatprep.mubr.msk.bf16.mxu0 %vm1573_vm0, %v1572_v1  ;;  %1491 = vmatpush3.bf16.msra.mxu0 %v1538_v6 }
 0x3b8   : > { %1492 = vmatprep.subr.bf16.mxu0 %v1572_v1 }
 0x454   : > { %v657_v30 = vpop.f32.mrb[4].mxu0 }
 0x455   : > { %v1444_v31 = vpop.f32.mrb[5].mxu0 }
 0x456   : > { %v660_v32 = vpop.f32.mrb[6].mxu0 }
 0x457   : > { %v1445_v33 = vpop.f32.mrb[7].mxu0 }
 0x45c   : > { %v767_v34 = vpop.f32.mrb[8].mxu0 }
 0x45d   : > { %994 = vrot.lane.b32.xlu1 %v767_v34, %s1585_s25  ;;  %v1456_v35 = vpop.f32.mrb[9].mxu0 }
 0x45e   : > { %v770_v36 = vpop.f32.mrb[10].mxu0 }
 0x45f   : > { %v1457_v37 = vpop.f32.mrb[11].mxu0 }
 0x481   : > { %v877_v40 = vpop.f32.mrb[12].mxu0 }
 0x482   : > { %998 = vrot.lane.b32.xlu0 %v877_v40, %s1586_s15  ;;  %v1468_v41 = vpop.f32.mrb[13].mxu0 }
 0x483   : > { %v880_v42 = vpop.f32.mrb[14].mxu0 }
 0x484   : > { %v1469_v43 = vpop.f32.mrb[15].mxu0 }
 0x489   : > { %v987_v44 = vpop.f32.mrb[16].mxu0 }
 0x48a   : > { %1002 = vrot.lane.b32.xlu1 %v987_v44, %s1587_s16  ;;  %v1480_v45 = vpop.f32.mrb[17].mxu0 }
 0x48b   : > { %v990_v46 = vpop.f32.mrb[18].mxu0  ;;  %v1392_v45 = vld [vmem:[%s1848_s12] ss:$0 sm:$0xff] }
 0x48c   : > { %v1481_v47 = vpop.f32.mrb[19].mxu0 }
 0x48d   : > { %v1393_v47 = vld [vmem:[%s1849_s13] ss:$0 sm:$0xff] }
 0x4cf   : > { %v995_v48 = vpop.permute.xlu1 %994 }
 0x4d0   : > { %v1005_v50 = vsel %vm555_vm2, %v657_v30, %v995_v48 }
 0x4f4   : > { %v999_v49 = vpop.permute.xlu0 %998 }
 0x4f5   : > { %v1007_v51 = vsel %vm1006_vm4, %v1005_v50, %v999_v49 }
 0x4fc   : > { %v1003_v52 = vpop.permute.xlu1 %1002 }
 0x4fd   : > { %v1009_v53 = vsel %vm1008_vm5, %v1007_v51, %v1003_v52 }
 0x4fe   : > { %v1015_v54 = vpack.c.bf16 %v1009_v53, %v1009_v53 }
 0x500   : > { %1487 = vmatmul.mubr.msk.bf16.vlgmr.msra.gmra.mrb[16].mxu1 %vm507_vm1, %v1015_v54 }
 0x501   : > { %1506 = vmatprep.mubr.msk.bf16.mxu1 %vm1573_vm0, %v1572_v1  ;;  %1499 = vmatpush3.bf16.msra.mxu1 %v1540_v7 }
 0x502   : > { %1500 = vmatprep.subr.bf16.mxu1 %v1572_v1 }
 0x505   : > { %1501 = vmatpush3.bf16.msra.mxu1 %v1541_v8 }
 0x506   : > { %1502 = vmatprep.subr.bf16.mxu1 %v1572_v1 }
 0x509   : > { %1503 = vmatpush3.bf16.msra.mxu1 %v1542_v19 }
 0x50a   : > { %1504 = vmatprep.subr.bf16.mxu1 %v1572_v1  ;;  %v1386_v1 = vld [vmem:[%s1847_s11] ss:$0 sm:$0xff] }
 0x50d   : > { %1505 = vmatpush3.bf16.msra.mxu1 %v1543_v20 }
 0x5d3   : > { %v1071_v56 = vpop.f32.mrb[16].mxu1 }
 0x5d4   : > { %v1072_v57 = vadd.f32 %v1376_v55, %v1071_v56  ;;  %v1488_v58 = vpop.f32.mrb[17].mxu1 }
 0x5d5   : > { %v1074_v59 = vpop.f32.mrb[18].mxu1 }
 0x5d6   : > { %v1489_v60 = vpop.f32.mrb[19].mxu1  ;;  %v1077_v61 = vadd.f32 %v1072_v57, %v1691_v3  ;;  %v1539_v3 = vld [vmem:[%s1844_s8 + $0x8] sm:$0xff]  }
 0x5d7   : > { %1493 = vmatpush3.bf16.msra.mxu0 %v1539_v3 }
 0x5d8   : > { %v1080_v62 = vsel %vm507_vm1, %v1077_v61, 0.0 }
 0x5d9   : > { %1081 = vadd.xlane.f32.xlu0 %v1080_v62 }
 0x666   : > { %v1082_v63 = vpop.xlane.xlu0 %1081 }
 0x667   : > { %v1084_v0 = vmul.f32 0.03125, %v1082_v63 }
 0x669   : > { %v1085_v2 = vsub.f32 %v1077_v61, %v1084_v0 }
 0x66b   : > { %v1086_v4 = vmul.f32 %v1085_v2, %v1085_v2 }
 0x66d   : > { %v1087_v5 = vsel %vm507_vm1, %v1086_v4, 0.0 }
 0x66e   : > { %1088 = vadd.xlane.f32.xlu1 %v1087_v5 }
 0x6fb   : > { %v1089_v9 = vpop.xlane.xlu1 %1088 }
 0x6fc   : > { %v1090_v11 = vmul.f32 0.03125, %v1089_v9 }
 0x6fe   : > { %v1091_v12 = vadd.f32 1e-05, %v1090_v11 }
 0x700   : > { %1560 = vrsqrt.f32 %v1091_v12 }
 0x70a   : > { %v1561_v13 = vpop.eup %1560 }
 0x70b   : > { %v1093_v15 = vmul.f32 %v1561_v13, %v1085_v2 }
 0x70d   : > { %v1100_v17 = vmul.f32 %v1380_v14, %v1093_v15 }
 0x70f   : > { %v1107_v10 = vadd.f32 %v1381_v16, %v1100_v17 }
 0x711   : > { %v1113_v18 = vpack.c.bf16 %v1107_v10, %v1107_v10 }
 0x713   : > { %1495 = vmatmul.mubr.msk.bf16.vlgmr.msra.gmra.mrb[20].mxu0 %vm507_vm1, %v1113_v18 }
 0x7e6   : > { %v1169_v22 = vpop.f32.mrb[20].mxu0 }
 0x7e7   : > { %v1170_v23 = vadd.f32 %v1382_v21, %v1169_v22  ;;  %v1496_v24 = vpop.f32.mrb[21].mxu0 }
 0x7e8   : > { %v1172_v25 = vpop.f32.mrb[22].mxu0 }
 0x7e9   : > { %v1175_v26 = vmax.f32 %v1170_v23, 0.0  ;;  %v1497_v27 = vpop.f32.mrb[23].mxu0 }
 0x7eb   : > { %v1185_v28 = vpack.c.bf16 %v1175_v26, %v1175_v26 }
 0x7ed   : > { %1507 = vmatmul.mubr.msk.bf16.vlgmr.msra.gmra.mrb[20].mxu1 %vm1216_vm6, %v1185_v28 }
 0x8c0   : > { %v1254_v29 = vpop.f32.mrb[20].mxu1 }
 0x8c1   : > { %v1255_v30 = vadd.f32 %v1386_v1, %v1254_v29  ;;  %v1508_v31 = vpop.f32.mrb[21].mxu1 }
 0x8c2   : > { %v1257_v32 = vpop.f32.mrb[22].mxu1 }
 0x8c3   : > { %v1509_v33 = vpop.f32.mrb[23].mxu1  ;;  %v1260_v34 = vadd.f32 %v1255_v30, %v1107_v10 }
 0x8c5   : > { %v1263_v35 = vsel %vm507_vm1, %v1260_v34, 0.0 }
 0x8c6   : > { %1264 = vadd.xlane.f32.xlu0 %v1263_v35 }
 0x953   : > { %v1265_v36 = vpop.xlane.xlu0 %1264 }
 0x954   : > { %v1266_v37 = vmul.f32 0.03125, %v1265_v36 }
 0x956   : > { %v1267_v38 = vsub.f32 %v1260_v34, %v1266_v37 }
 0x958   : > { %v1268_v39 = vmul.f32 %v1267_v38, %v1267_v38 }
 0x95a   : > { %v1269_v40 = vsel %vm507_vm1, %v1268_v39, 0.0 }
 0x95b   : > { %1270 = vadd.xlane.f32.xlu0 %v1269_v40 }
 0x9e8   : > { %v1271_v41 = vpop.xlane.xlu0 %1270 }
 0x9e9   : > { %v1272_v42 = vmul.f32 0.03125, %v1271_v41 }
 0x9eb   : > { %v1273_v43 = vadd.f32 1e-05, %v1272_v42 }
 0x9ed   : > { %1562 = vrsqrt.f32 %v1273_v43 }
 0x9f7   : > { %v1563_v44 = vpop.eup %1562 }
 0x9f8   : > { %v1275_v46 = vmul.f32 %v1563_v44, %v1267_v38 }
 0x9fa   : > { %v1282_v48 = vmul.f32 %v1392_v45, %v1275_v46 }
 0x9fc   : > { %v1289_v49 = vadd.f32 %v1393_v47, %v1282_v48 }
 0x9fe   : > { %1290 = vst.msk [vmem:[%s479_s17] sm:$0xff] %vm507_vm1, %v1289_v49 }
 0x9ff PF: > { %s24_s29 = sadd.s32 1, %s1570_s29  }
 0xa00   : > { %p21_p4 = scmp.ge.s32.totalorder %s24_s29, 4  }
 0xa02   :  { %23 = sbr.rel (!%p21_p4) target bundleno = 1 (0x1), region = 109 }

// kernel: morpheme_restore_forward.7
= control target key start
LH: loop header
LB: loop body
LE: loop exit
PB: predicated region body
PF: predicated region fallthrough
CT: control target
= control target key end

     0   :  { %s3196_s0 = inlined_call_operand.vmem [shape: f32[2,8,32], index: 0, kind: input, shape index: {}]   ;;  %s3197_s1 = inlined_call_operand.vmem [shape: f32[2,8,32], index: 1, kind: input, shape index: {}]   ;;  %s3198_s2 = inlined_call_operand.vmem [shape: f32[2,8,8], index: 2, kind: input, shape index: {}]   ;;  %s3199_s3 = inlined_call_operand.vmem [shape: f32[2,8,8], index: 3, kind: input, shape index: {}]   ;;  %s3200_s4 = inlined_call_operand.vmem [shape: bf16[32,96], index: 4, kind: input, shape index: {}]   ;;  %s3201_s5 = inlined_call_operand.vmem [shape: f32[1,96], index: 5, kind: input, shape index: {}]   ;;  %s3202_s6 = inlined_call_operand.vmem [shape: bf16[32,32], index: 6, kind: input, shape index: {}]   ;;  %s3203_s7 = inlined_call_operand.vmem [shape: f32[1,32], index: 7, kind: input, shape index: {}, may-alias: {7,9,11,15,17,21,23}]   ;;  %s3204_s8 = inlined_call_operand.vmem [shape: f32[1,32], index: 8, kind: input, shape index: {}, may-alias: {8,16,22}]   ;;  %s3205_s9 = inlined_call_operand.vmem [shape: f32[1,32], index: 9, kind: input, shape index: {}, may-alias: {7,9,11,15,17,21,23}]   ;;  %s3206_s10 = inlined_call_operand.vmem [shape: bf16[32,32], index: 10, kind: input, shape index: {}]   ;;  %s3207_s11 = inlined_call_operand.vmem [shape: f32[1,32], index: 11, kind: input, shape index: {}, may-alias: {7,9,11,15,17,21,23}]   ;;  %s3208_s12 = inlined_call_operand.vmem [shape: bf16[32,64], index: 12, kind: input, shape index: {}]   ;;  %s3209_s13 = inlined_call_operand.vmem [shape: f32[1,64], index: 13, kind: input, shape index: {}, may-alias: {13,19}]   ;;  %s3210_s14 = inlined_call_operand.vmem [shape: bf16[32,32], index: 14, kind: input, shape index: {}]   ;;  %s3211_s15 = inlined_call_operand.vmem [shape: f32[1,32], index: 15, kind: input, shape index: {}, may-alias: {7,9,11,15,17,21,23}]   ;;  %s3212_s16 = inlined_call_operand.vmem [shape: f32[1,32], index: 16, kind: input, shape index: {}, may-alias: {8,16,22}]   ;;  %s3213_s17 = inlined_call_operand.vmem [shape: f32[1,32], index: 17, kind: input, shape index: {}, may-alias: {7,9,11,15,17,21,23}]   ;;  %s3214_s18 = inlined_call_operand.vmem [shape: bf16[32,64], index: 18, kind: input, shape index: {}]   ;;  %s3215_s19 = inlined_call_operand.vmem [shape: f32[1,64], index: 19, kind: input, shape index: {}, may-alias: {13,19}]   ;;  %s3216_s20 = inlined_call_operand.vmem [shape: bf16[64,32], index: 20, kind: input, shape index: {}]   ;;  %s3217_s21 = inlined_call_operand.vmem [shape: f32[1,32], index: 21, kind: input, shape index: {}, may-alias: {7,9,11,15,17,21,23}]   ;;  %s3218_s22 = inlined_call_operand.vmem [shape: f32[1,32], index: 22, kind: input, shape index: {}, may-alias: {8,16,22}]   ;;  %s3219_s23 = inlined_call_operand.vmem [shape: f32[1,32], index: 23, kind: input, shape index: {}, may-alias: {7,9,11,15,17,21,23}]   ;;  %s3220_s24 = inlined_call_operand.vmem [shape: f32[2,8,32], index: 24, kind: output, shape index: {}]  }
   0x1   :  { %3230 = sst [smem:[#allocation2_spill]] %s3196_s0 }
   0x2   :  { %3231 = sst [smem:[#allocation3_spill]] %s3197_s1 }
   0x3   :  { %3232 = sst [smem:[#allocation4_spill]] %s3198_s2 }
   0x4   :  { %3233 = sst [smem:[#allocation5_spill]] %s3199_s3 }
   0x5   :  { %3234 = sst [smem:[#allocation6_spill]] %s3200_s4 }
   0x6   :  { %3235 = sst [smem:[#allocation7_spill]] %s3201_s5  ;;  %s2874_s5 = smov 0  }
   0x7   :  { %3236 = sst [smem:[#allocation8_spill]] %s3202_s6 }
   0x8   :  { %3237 = sst [smem:[#allocation9_spill]] %s3203_s7 }
   0x9   :  { %3238 = sst [smem:[#allocation10_spill]] %s3204_s8 }
   0xa LB: > { %s2372_s26 = sadd.s32 4294967295, %s2731_s5   ;;  %p2376_p0 = scmp.ge.s32.totalorder %s2731_s5, 1  ;;  %s2731_s5 = sphi %s2874_s5, %s34_s5  }
   0xb   : > { %p688_p1 = scmp.lt.s32.totalorder %s2731_s5, 3 }
   0xd   : > { %p689_p2 = pnand %p2376_p0, %p688_p1 }
   0xe   : > { %s3239_s6 = sld [smem:[#allocation6_spill]] (!%p689_p2)  ;;  %v2733_v1 = vmov (!%p689_p2), 0.0   ;;  %vm2734_vm0 = vmmov (!%p689_p2), 0   ;;  %p764_p3 = scmp.lt.s32.totalorder (!%p689_p2), %s2372_s26, 1  ;;  %vm813_vm1 = vcmask (!%p689_p2), 261120   ;;  %vm861_vm2 = vcmask (!%p689_p2), 64512  }
   0xf   : > { %692 = sbr.rel (%p689_p2) target bundleno = 4315 (0x10db), region = 116  ;;  %2491 = vmatprep.subr.bf16.mxu1 (!%p689_p2), %v2733_v1  ;;  %2505 = vmatprep.subr.bf16.mxu0 (!%p689_p2), %v2733_v1  ;;  %s3240_s3 = sld [smem:[#allocation2_spill]] (!%p689_p2)  ;;  %vm925_vm3 = vcmask (!%p689_p2), 1043456   ;;  %vm1312_vm4 = vcmask (!%p689_p2), 130048   ;;  %vm1314_vm5 = vcmask (!%p689_p2), 195584   ;;  %vm2208_vm6 = vcmask (!%p689_p2), 523264  }
  0x10   : > { %2495 = vmatprep.mubr.msk.bf16.mxu1 (!%p689_p2), %vm2734_vm0, %v2733_v1  ;;  %2507 = vmatprep.mubr.msk.bf16.mxu0 (!%p689_p2), %vm2734_vm0, %v2733_v1  ;;  %s3241_s1 = sld [smem:[#allocation7_spill]] (!%p689_p2)  ;;  %s3229_s27 = smov (!%p689_p2), 96  }
  0x11   : > { %s3228_s28 = smov (!%p689_p2), 80   ;;  %s3223_s2 = smov (!%p689_p2), 88  }
  0x12   : > { %s3224_s29 = smov (!%p689_p2), 72   ;;  %s2740_s7 = smov (!%p689_p2), 112  }
  0x13   : > { %s2741_s30 = smov (!%p689_p2), 104   ;;  %s3242_s8 = sld [smem:[#allocation4_spill]] (!%p689_p2) }
  0x14   : > { %v2671_v0 = vld [vmem:[%s3239_s6] sm:$0xff] (!%p689_p2)   ;;  %v2672_v2 = vld [vmem:[%s3239_s6 + $0x8] sm:$0xff] (!%p689_p2)  }
  0x15   : > { %2492 = vmatpush3.bf16.msra.mxu1 (!%p689_p2), %v2671_v0 }
  0x16   : > { %2493 = vmatprep.subr.bf16.mxu1 %v2733_v1  ;;  %s3256_s26 = smov (!%p764_p3, %s2372_s26), 1  ;;  %v2382_v5 = vld [vmem:[%s3241_s1] ss:$0 sm:$0xff]  ;;  %s2742_s1 = smov 56  }
  0x17   : > { %s2895_s0 = sshll.u32 %s3256_s26, 3  ;;  %s2735_s26 = smov 120  }
  0x18   : > { %s767_s25 = scalar_lea.vmem %s3240_s3, %s2895_s0  ;;  %s2743_s3 = smov 64  }
  0x19   : > { %2494 = vmatpush3.bf16.msra.mxu1 %v2672_v2  ;;  %v2902_v3 = vld [vmem:[%s767_s25] sm:$0xff]  ;;  %s775_s4 = scalar_lea.vmem %s3242_s8, %s2895_s0  ;;  %s2744_s25 = smov 40  }
  0x1a   : > { %2499 = vmatprep.subr.bf16.mxu1 %v2733_v1  ;;  %v794_v4 = vpack.c.bf16 %v2902_v3, %v2902_v3  ;;  %v787_v23 = vld [vmem:[%s775_s4] sm:$0xff]  ;;  %s2745_s8 = smov 48   ;;  %s3227_s4 = smov 8  }
  0x1c   : > { %2496 = vmatmul.mubr.msk.bf16.vlgmr.msra.gmra.mrb[0].mxu1 %vm813_vm1, %v794_v4 }
  0x1d   : > { %2501 = vmatprep.mubr.msk.bf16.mxu1 %vm2734_vm0, %v2733_v1 }
  0xef   : > { %v851_v6 = vpop.f32.mrb[0].mxu1 }
  0xf0   : > { %v852_v7 = vadd.f32 %v2382_v5, %v851_v6  ;;  %v2497_v8 = vpop.f32.mrb[1].mxu1 }
  0xf1   : > { %v854_v9 = vpop.f32.mrb[2].mxu1 }
  0xf2   : > { %v2912_v10 = vpack.c.bf16 %v852_v7, %v852_v7  ;;  %v2498_v11 = vpop.f32.mrb[3].mxu1 }
  0xf4   : > { %969 = vrot.lane.b32.xlu1 %v2912_v10, %s2735_s26  ;;  %859 = vrot.lane.b32.xlu0 %v2912_v10, %s3229_s27 }
  0xf8   : > { %1081 = vrot.lane.b32.xlu1 %v2912_v10, %s3228_s28  ;;  %971 = vrot.lane.b32.xlu0 %v2912_v10, %s3223_s2  ;;  %s3245_s28 = sld [smem:[#allocation3_spill]]  ;;  %s3250_s2 = smov 72  }
  0xfc   : > { %1191 = vrot.lane.b32.xlu1 %v2912_v10, %s3224_s29  ;;  %1079 = vrot.lane.b32.xlu0 %v2912_v10, %s2740_s7  ;;  %s3226_s29 = smov 16  }
  0xfe   : > { %s771_s27 = scalar_lea.vmem %s3245_s28, %s2895_s0 }
 0x100   : > { %1189 = vrot.lane.b32.xlu0 %v2912_v10, %s2741_s30 }
 0x166   : > { %v860_v12 = vpop.permute.xlu0 %859  ;;  %v970_v15 = vpop.permute.xlu1 %969 }
 0x167   : > { %v866_v13 = vsel %vm861_vm2, %v860_v12, 0 }
 0x168   : > { %2500 = vmatpush3.bf16.xpose.msra.mxu1 %v866_v13 }
 0x169   : > { %2511 = vmatprep.subr.bf16.mxu1 %v2733_v1 }
 0x16a   : > { %v972_v14 = vpop.permute.xlu0 %971  ;;  %v1082_v17 = vpop.permute.xlu1 %1081 }
 0x16b   : > { %v977_v16 = vsel %vm861_vm2, %v972_v14, 0  ;;  %v1087_v18 = vsel %vm861_vm2, %v1082_v17, 0 }
 0x16e   : > { %v1192_v19 = vpop.permute.xlu1 %1191  ;;  %v1080_v20 = vpop.permute.xlu0 %1079 }
 0x16f   : > { %2502 = vmatmul.mubr.msk.bf16.vlgmr.msra.gmra.mrb[4].mxu1 %vm861_vm2, %v2912_v10  ;;  %v1197_v21 = vsel %vm861_vm2, %v1192_v19, 0 }
 0x170   : > { %2512 = vmatpush3.bf16.xpose.msra.mxu1 %v977_v16  ;;  %2513 = vmatprep.mubr.msk.bf16.mxu1 %vm2734_vm0, %v2733_v1 }
 0x171   : > { %2523 = vmatprep.subr.bf16.mxu1 %v2733_v1 }
 0x172   : > { %v1190_v22 = vpop.permute.xlu0 %1189 }
 0x177   : > { %2514 = vmatmul.mubr.msk.bf16.vlgmr.msra.gmra.mrb[8].mxu1 %vm861_vm2, %v970_v15 }
 0x178   : > { %2524 = vmatpush3.bf16.xpose.msra.mxu1 %v1087_v18  ;;  %2525 = vmatprep.mubr.msk.bf16.mxu1 %vm2734_vm0, %v2733_v1 }
 0x179   : > { %2535 = vmatprep.subr.bf16.mxu1 %v2733_v1 }
 0x17f   : > { %2526 = vmatmul.mubr.msk.bf16.vlgmr.msra.gmra.mrb[12].mxu1 %vm861_vm2, %v1080_v20 }
 0x180   : > { %2536 = vmatpush3.bf16.xpose.msra.mxu1 %v1197_v21  ;;  %2537 = vmatprep.mubr.msk.bf16.mxu1 %vm2734_vm0, %v2733_v1 }
 0x181   : > { %2547 = vmatprep.subr.bf16.mxu1 %v2733_v1 }
 0x187   : > { %2538 = vmatmul.mubr.msk.bf16.vlgmr.msra.gmra.mrb[16].mxu1 %vm861_vm2, %v1190_v22 }
 0x188   : > { %2551 = vmatprep.mubr.msk.bf16.mxu1 %vm2734_vm0, %v2733_v1 }
 0x242   : > { %v902_v24 = vpop.f32.mrb[4].mxu1 }
 0x243   : > { %v903_v25 = vadd.f32 %v902_v24, %v787_v23  ;;  %v2503_v26 = vpop.f32.mrb[5].mxu1 }
 0x244   : > { %v905_v27 = vpop.f32.mrb[6].mxu1 }
 0x245   : > { %v2504_v28 = vpop.f32.mrb[7].mxu1  ;;  %v908_v29 = vsel %vm861_vm2, %v903_v25, -inf }
 0x246   : > { %909 = vmax.xlane.f32.xlu1 %v908_v29 }
 0x24a   : > { %v1013_v30 = vpop.f32.mrb[8].mxu1 }
 0x24b   : > { %v1014_v31 = vadd.f32 %v1013_v30, %v787_v23  ;;  %v2515_v32 = vpop.f32.mrb[9].mxu1 }
 0x24c   : > { %v1016_v33 = vpop.f32.mrb[10].mxu1 }
 0x24d   : > { %v2516_v34 = vpop.f32.mrb[11].mxu1  ;;  %v1019_v35 = vsel %vm861_vm2, %v1014_v31, -inf }
 0x24e   : > { %1020 = vmax.xlane.f32.xlu0 %v1019_v35 }
 0x252   : > { %v1123_v36 = vpop.f32.mrb[12].mxu1 }
 0x253   : > { %v1124_v37 = vadd.f32 %v1123_v36, %v787_v23  ;;  %v2527_v38 = vpop.f32.mrb[13].mxu1 }
 0x254   : > { %v1126_v39 = vpop.f32.mrb[14].mxu1 }
 0x255   : > { %v2528_v40 = vpop.f32.mrb[15].mxu1  ;;  %v1129_v41 = vsel %vm861_vm2, %v1124_v37, -inf }
 0x256   : > { %1130 = vmax.xlane.f32.xlu0 %v1129_v41 }
 0x25a   : > { %v1233_v42 = vpop.f32.mrb[16].mxu1 }
 0x25b   : > { %v1234_v43 = vadd.f32 %v1233_v42, %v787_v23  ;;  %v2539_v44 = vpop.f32.mrb[17].mxu1 }
 0x25c   : > { %v1236_v45 = vpop.f32.mrb[18].mxu1 }
 0x25d   : > { %v2540_v46 = vpop.f32.mrb[19].mxu1  ;;  %v1239_v47 = vsel %vm861_vm2, %v1234_v43, -inf }
 0x25e   : > { %1240 = vmax.xlane.f32.xlu1 %v1239_v47 }
 0x2d3   : > { %v910_v48 = vpop.xlane.xlu1 %909 }
 0x2d4   : > { %v911_v49 = vsub.f32 %v903_v25, %v910_v48 }
 0x2d6   : > { %v912_v50 = vmul.f32 1.442695, %v911_v49 }
 0x2d8   : > { %2687 = vpow2.f32 %v912_v50 }
 0x2db   : > { %v1021_v51 = vpop.xlane.xlu0 %1020 }
 0x2dc   : > { %v1022_v52 = vsub.f32 %v1014_v31, %v1021_v51 }
 0x2de   : > { %v1023_v53 = vmul.f32 1.442695, %v1022_v52 }
 0x2e0   : > { %2689 = vpow2.f32 %v1023_v53 }
 0x2e2   : > { %v2688_v54 = vpop.eup %2687 }
 0x2e3   : > { %v1131_v55 = vpop.xlane.xlu0 %1130  ;;  %v914_v56 = vsel %vm861_vm2, %v2688_v54, 0.0 }
 0x2e4   : > { %v1132_v57 = vsub.f32 %v1124_v37, %v1131_v55  ;;  %915 = vadd.xlane.f32.xlu0 %v914_v56 }
 0x2e6   : > { %v1133_v58 = vmul.f32 1.442695, %v1132_v57 }
 0x2e8   : > { %2691 = vpow2.f32 %v1133_v58 }
 0x2ea   : > { %v2690_v59 = vpop.eup %2689 }
 0x2eb   : > { %v1025_v60 = vsel %vm861_vm2, %v2690_v59, 0.0  ;;  %v1241_v63 = vpop.xlane.xlu1 %1240 }
 0x2ec   : > { %1026 = vadd.xlane.f32.xlu1 %v1025_v60  ;;  %v1242_v0 = vsub.f32 %v1234_v43, %v1241_v63 }
 0x2ee   : > { %v1243_v2 = vmul.f32 1.442695, %v1242_v0 }
 0x2f0   : > { %2693 = vpow2.f32 %v1243_v2 }
 0x2f2   : > { %v2692_v61 = vpop.eup %2691 }
 0x2f3   : > { %v1135_v62 = vsel %vm861_vm2, %v2692_v61, 0.0 }
 0x2f4   : > { %1136 = vadd.xlane.f32.xlu0 %v1135_v62 }
 0x2fa   : > { %v2694_v4 = vpop.eup %2693 }
 0x2fb   : > { %v1245_v5 = vsel %vm861_vm2, %v2694_v4, 0.0 }
 0x2fd   : > { %1031 = vrot.lane.b32.xlu1 %v2912_v10, %s2742_s1  ;;  %s3225_s1 = smov 24  }
 0x30a   : > { %920 = vrot.lane.b32.xlu0 %v2912_v10, %s2743_s3  ;;  %s3251_s3 = smov 88  }
 0x30e   : > { %1251 = vrot.lane.b32.xlu0 %v2912_v10, %s2744_s25  ;;  %s3243_s25 = sld [smem:[#allocation8_spill]] }
 0x314   : > { %v2673_v38 = vld [vmem:[%s3243_s25] sm:$0xff]   ;;  %v2674_v39 = vld [vmem:[%s3243_s25 + $0x8] sm:$0xff]  }
 0x315   : > { %2548 = vmatpush3.bf16.msra.mxu1 %v2673_v38 }
 0x316   : > { %2549 = vmatprep.subr.bf16.mxu1 %v2733_v1 }
 0x319   : > { %2550 = vmatpush3.bf16.msra.mxu1 %v2674_v39 }
 0x31a   : > { %2563 = vmatprep.subr.bf16.mxu1 %v2733_v1 }
 0x321   : > { %1246 = vadd.xlane.f32.xlu1 %v1245_v5 }
 0x332   : > { %1141 = vrot.lane.b32.xlu1 %v2912_v10, %s2745_s8  ;;  %s3244_s8 = sld [smem:[#allocation9_spill]] }
 0x338   : > { %v2394_v55 = vld [vmem:[%s3244_s8] ss:$0 sm:$0xff]  ;;  %s3249_s8 = smov 80  }
 0x371   : > { %v916_v6 = vpop.xlane.xlu0 %915 }
 0x372   : > { %2695 = vrcp.f32 %v916_v6  ;;  %v2675_v6 = vld [vmem:[%s3208_s12] sm:$0xff]  }
 0x379   : > { %v1027_v7 = vpop.xlane.xlu1 %1026 }
 0x37a   : > { %2697 = vrcp.f32 %v1027_v7  ;;  %v786_v7 = vld [vmem:[%s771_s27] sm:$0xff]  ;;  %s3252_s27 = smov 8  }
 0x37c   : > { %v2696_v8 = vpop.eup %2695 }
 0x37d   : > { %v918_v11 = vmul.f32 %v2696_v8, %v2688_v54  ;;  %v1032_v14 = vpop.permute.xlu1 %1031  ;;  %v1486_v8 = vpack.c.bf16 %v786_v7, %v786_v7 }
 0x37e   : > { %v1037_v17 = vsel %vm925_vm3, %v1032_v14, 0 }
 0x37f   : > { %v919_v15 = vpack.c.bf16 %v918_v11, %v918_v11  ;;  %v2678_v11 = vld [vmem:[%s3206_s10 + $0x8] sm:$0xff]  }
 0x381   : > { %v1137_v9 = vpop.xlane.xlu0 %1136 }
 0x382   : > { %2699 = vrcp.f32 %v1137_v9  ;;  %v2677_v9 = vld [vmem:[%s3206_s10] sm:$0xff]  }
 0x384   : > { %v2698_v16 = vpop.eup %2697 }
 0x385   : > { %v921_v12 = vpop.permute.xlu0 %920  ;;  %v1029_v10 = vmul.f32 %v2698_v16, %v2690_v59 }
 0x386   : > { %v927_v13 = vsel %vm925_vm3, %v921_v12, 0 }
 0x387   : > { %2506 = vmatpush3.bf16.msra.mxu0 %v927_v13  ;;  %v1030_v18 = vpack.c.bf16 %v1029_v10, %v1029_v10  ;;  %v2399_v10 = vld [vmem:[%s3205_s9] ss:$0 sm:$0xff] }
 0x388   : > { %2517 = vmatprep.subr.bf16.mxu0 %v2733_v1 }
 0x389   : > { %v1252_v24 = vpop.permute.xlu0 %1251 }
 0x38a   : > { %2508 = vmatmul.mubr.msk.bf16.vlgmr.msra.gmra.mrb[0].mxu0 %vm861_vm2, %v919_v15  ;;  %v1257_v26 = vsel %vm925_vm3, %v1252_v24, 0 }
 0x38b   : > { %2518 = vmatpush3.bf16.msra.mxu0 %v1037_v17  ;;  %2519 = vmatprep.mubr.msk.bf16.mxu0 %vm2734_vm0, %v2733_v1 }
 0x38c   : > { %2529 = vmatprep.subr.bf16.mxu0 %v2733_v1  ;;  %v2700_v19 = vpop.eup %2699 }
 0x38d   : > { %v1139_v21 = vmul.f32 %v2700_v19, %v2692_v61 }
 0x38f   : > { %v1140_v25 = vpack.c.bf16 %v1139_v21, %v1139_v21  ;;  %v2404_v21 = vld [vmem:[%s3209_s13] ss:$0 sm:$0xff] }
 0x392   : > { %2520 = vmatmul.mubr.msk.bf16.vlgmr.msra.gmra.mrb[4].mxu0 %vm861_vm2, %v1030_v18 }
 0x393   : > { %2531 = vmatprep.mubr.msk.bf16.mxu0 %vm2734_vm0, %v2733_v1 }
 0x3ae   : > { %v1247_v20 = vpop.xlane.xlu1 %1246 }
 0x3af   : > { %2701 = vrcp.f32 %v1247_v20 }
 0x3b2   : > { %v1142_v22 = vpop.permute.xlu1 %1141 }
 0x3b3   : > { %v1147_v23 = vsel %vm925_vm3, %v1142_v22, 0 }
 0x3b4   : > { %2530 = vmatpush3.bf16.msra.mxu0 %v1147_v23 }
 0x3b5   : > { %2541 = vmatprep.subr.bf16.mxu0 %v2733_v1 }
 0x3b7   : > { %2532 = vmatmul.mubr.msk.bf16.vlgmr.msra.gmra.mrb[8].mxu0 %vm861_vm2, %v1140_v25 }
 0x3b8   : > { %2542 = vmatpush3.bf16.msra.mxu0 %v1257_v26  ;;  %2543 = vmatprep.mubr.msk.bf16.mxu0 %vm2734_vm0, %v2733_v1 }
 0x3b9   : > { %v2702_v27 = vpop.eup %2701  ;;  %2555 = vmatprep.subr.bf16.mxu0 %v2733_v1 }
 0x3ba   : > { %v1249_v28 = vmul.f32 %v2702_v27, %v2694_v4 }
 0x3bc   : > { %v1250_v29 = vpack.c.bf16 %v1249_v28, %v1249_v28 }
 0x3bf   : > { %2544 = vmatmul.mubr.msk.bf16.vlgmr.msra.gmra.mrb[12].mxu0 %vm861_vm2, %v1250_v29  ;;  %v2400_v29 = vld [vmem:[%s3207_s11] ss:$0 sm:$0xff] }
 0x3c0   : > { %2559 = vmatprep.mubr.msk.bf16.mxu0 %vm2734_vm0, %v2733_v1  ;;  %2556 = vmatpush3.bf16.msra.mxu0 %v2677_v9 }
 0x3c1   : > { %2557 = vmatprep.subr.bf16.mxu0 %v2733_v1 }
 0x3c4   : > { %2558 = vmatpush3.bf16.msra.mxu0 %v2678_v11 }
 0x3c5   : > { %2571 = vmatprep.subr.bf16.mxu0 %v2733_v1 }
 0x45d   : > { %v963_v30 = vpop.f32.mrb[0].mxu0 }
 0x45e   : > { %v2509_v31 = vpop.f32.mrb[1].mxu0 }
 0x45f   : > { %v966_v32 = vpop.f32.mrb[2].mxu0 }
 0x460   : > { %v2510_v33 = vpop.f32.mrb[3].mxu0 }
 0x465   : > { %v1073_v34 = vpop.f32.mrb[4].mxu0 }
 0x466   : > { %1300 = vrot.lane.b32.xlu1 %v1073_v34, %s3227_s4  ;;  %v2521_v35 = vpop.f32.mrb[5].mxu0  ;;  %s3246_s4 = sld [smem:[#allocation10_spill]] }
 0x467   : > { %v1076_v36 = vpop.f32.mrb[6].mxu0 }
 0x468   : > { %v2522_v37 = vpop.f32.mrb[7].mxu0 }
 0x46c   : > { %v2398_v16 = vld [vmem:[%s3246_s4] ss:$0 sm:$0xff]  ;;  %s3248_s4 = smov 96  }
 0x48a   : > { %v1183_v40 = vpop.f32.mrb[8].mxu0 }
 0x48b   : > { %1304 = vrot.lane.b32.xlu0 %v1183_v40, %s3226_s29  ;;  %v2533_v41 = vpop.f32.mrb[9].mxu0 }
 0x48c   : > { %v1186_v42 = vpop.f32.mrb[10].mxu0 }
 0x48d   : > { %v2534_v43 = vpop.f32.mrb[11].mxu0 }
 0x492   : > { %v1293_v44 = vpop.f32.mrb[12].mxu0 }
 0x493   : > { %1308 = vrot.lane.b32.xlu1 %v1293_v44, %s3225_s1  ;;  %v2545_v45 = vpop.f32.mrb[13].mxu0 }
 0x494   : > { %v1296_v46 = vpop.f32.mrb[14].mxu0 }
 0x495   : > { %v2546_v47 = vpop.f32.mrb[15].mxu0 }
 0x4d8   : > { %v1301_v48 = vpop.permute.xlu1 %1300 }
 0x4d9   : > { %v1311_v50 = vsel %vm861_vm2, %v963_v30, %v1301_v48 }
 0x4fd   : > { %v1305_v49 = vpop.permute.xlu0 %1304 }
 0x4fe   : > { %v1313_v51 = vsel %vm1312_vm4, %v1311_v50, %v1305_v49 }
 0x505   : > { %v1309_v52 = vpop.permute.xlu1 %1308 }
 0x506   : > { %v1315_v53 = vsel %vm1314_vm5, %v1313_v51, %v1309_v52 }
 0x507   : > { %v1321_v54 = vpack.c.bf16 %v1315_v53, %v1315_v53 }
 0x509   : > { %2552 = vmatmul.mubr.msk.bf16.vlgmr.msra.gmra.mrb[20].mxu1 %vm813_vm1, %v1321_v54 }
 0x50a   : > { %2567 = vmatprep.mubr.msk.bf16.mxu1 %vm2734_vm0, %v2733_v1  ;;  %2564 = vmatpush3.bf16.msra.mxu1 %v2675_v6 }
 0x50b   : > { %2565 = vmatprep.subr.bf16.mxu1 %v2733_v1 }
 0x5dc   : > { %v1377_v56 = vpop.f32.mrb[20].mxu1 }
 0x5dd   : > { %v1378_v57 = vadd.f32 %v2394_v55, %v1377_v56  ;;  %v2553_v58 = vpop.f32.mrb[21].mxu1 }
 0x5de   : > { %v1380_v59 = vpop.f32.mrb[22].mxu1 }
 0x5df   : > { %v2554_v60 = vpop.f32.mrb[23].mxu1  ;;  %v1383_v61 = vadd.f32 %v1378_v57, %v2902_v3  ;;  %v2676_v3 = vld [vmem:[%s3208_s12 + $0x8] sm:$0xff]  }
 0x5e0   : > { %2566 = vmatpush3.bf16.msra.mxu1 %v2676_v3 }
 0x5e1   : > { %v1386_v62 = vsel %vm813_vm1, %v1383_v61, 0.0  ;;  %2577 = vmatprep.subr.bf16.mxu1 %v2733_v1 }
 0x5e2   : > { %1387 = vadd.xlane.f32.xlu0 %v1386_v62 }
 0x5e3   : > { %2568 = vmatmul.mubr.msk.bf16.vlgmr.msra.gmra.mrb[24].mxu1 %vm813_vm1, %v1486_v8 }
 0x5e4   : > { %2579 = vmatprep.mubr.msk.bf16.mxu1 %vm2734_vm0, %v2733_v1 }
 0x66f   : > { %v1388_v63 = vpop.xlane.xlu0 %1387 }
 0x670   : > { %v1390_v0 = vmul.f32 0.03125, %v1388_v63 }
 0x672   : > { %v1391_v2 = vsub.f32 %v1383_v61, %v1390_v0 }
 0x674   : > { %v1392_v4 = vmul.f32 %v1391_v2, %v1391_v2 }
 0x676   : > { %v1393_v5 = vsel %vm813_vm1, %v1392_v4, 0.0 }
 0x677   : > { %1394 = vadd.xlane.f32.xlu1 %v1393_v5 }
 0x6b6   : > { %v1542_v22 = vpop.f32.mrb[24].mxu1 }
 0x6b7   : > { %v1543_v23 = vadd.f32 %v2404_v21, %v1542_v22  ;;  %v2569_v24 = vpop.f32.mrb[25].mxu1 }
 0x6b8   : > { %v1545_v25 = vpop.f32.mrb[26].mxu1 }
 0x6b9   : > { %v3047_v26 = vpack.c.bf16 %v1543_v23, %v1543_v23  ;;  %v2570_v27 = vpop.f32.mrb[27].mxu1 }
 0x6bb   : > { %1660 = vrot.lane.b32.xlu0 %v3047_v26, %s2735_s26  ;;  %v1554_v28 = vsel %vm861_vm2, %v3047_v26, 0 }
 0x6bf   : > { %1770 = vrot.lane.b32.xlu0 %v3047_v26, %s2740_s7 }
 0x6c3   : > { %1880 = vrot.lane.b32.xlu0 %v3047_v26, %s2741_s30 }
 0x704   : > { %v1395_v12 = vpop.xlane.xlu1 %1394 }
 0x705   : > { %v1396_v13 = vmul.f32 0.03125, %v1395_v12 }
 0x707   : > { %v1397_v14 = vadd.f32 1e-05, %v1396_v13 }
 0x709   : > { %2703 = vrsqrt.f32 %v1397_v14 }
 0x713   : > { %v2704_v15 = vpop.eup %2703 }
 0x714   : > { %v1399_v17 = vmul.f32 %v2704_v15, %v1391_v2 }
 0x716   : > { %v1406_v18 = vmul.f32 %v2398_v16, %v1399_v17 }
 0x718   : > { %v3037_v19 = vadd.f32 %v2399_v10, %v1406_v18 }
 0x71a   : > { %v1419_v20 = vpack.c.bf16 %v3037_v19, %v3037_v19 }
 0x71c   : > { %2560 = vmatmul.mubr.msk.bf16.vlgmr.msra.gmra.mrb[16].mxu0 %vm813_vm1, %v1419_v20 }
 0x71d   : > { %2573 = vmatprep.mubr.msk.bf16.mxu0 %vm2734_vm0, %v2733_v1  ;;  %2572 = vmatpush3.bf16.xpose.msra.mxu0 %v1554_v28 }
 0x71e   : > { %2583 = vmatprep.subr.bf16.mxu0 %v2733_v1 }
 0x72d   : > { %v1661_v34 = vpop.permute.xlu0 %1660 }
 0x72e   : > { %v1666_v37 = vsel %vm861_vm2, %v1661_v34, 0 }
 0x731   : > { %v1771_v38 = vpop.permute.xlu0 %1770 }
 0x732   : > { %v1776_v40 = vsel %vm861_vm2, %v1771_v38, 0 }
 0x735   : > { %v1881_v41 = vpop.permute.xlu0 %1880 }
 0x736   : > { %v1886_v43 = vsel %vm861_vm2, %v1881_v41, 0 }
 0x7ef   : > { %v1475_v30 = vpop.f32.mrb[16].mxu0 }
 0x7f0   : > { %v1476_v31 = vadd.f32 %v2400_v29, %v1475_v30  ;;  %v2561_v32 = vpop.f32.mrb[17].mxu0 }
 0x7f1   : > { %v1478_v33 = vpop.f32.mrb[18].mxu0 }
 0x7f2   : > { %v1548_v35 = vpack.c.bf16 %v1476_v31, %v1476_v31  ;;  %v2562_v36 = vpop.f32.mrb[19].mxu0 }
 0x7f4   : > { %1658 = vrot.lane.b32.xlu1 %v1548_v35, %s2735_s26  ;;  %2574 = vmatmul.mubr.msk.bf16.vlgmr.msra.gmra.mrb[20].mxu0 %vm861_vm2, %v1548_v35 }
 0x7f5   : > { %2584 = vmatpush3.bf16.xpose.msra.mxu0 %v1666_v37  ;;  %2585 = vmatprep.mubr.msk.bf16.mxu0 %vm2734_vm0, %v2733_v1 }
 0x7f6   : > { %2595 = vmatprep.subr.bf16.mxu0 %v2733_v1 }
 0x7f8   : > { %1768 = vrot.lane.b32.xlu1 %v1548_v35, %s2740_s7 }
 0x7fc   : > { %1878 = vrot.lane.b32.xlu1 %v1548_v35, %s2741_s30  ;;  %s3247_s30 = sld [smem:[#allocation5_spill]] }
 0x802   : > { %s779_s28 = scalar_lea.vmem %s3247_s30, %s2895_s0  ;;  %s3253_s30 = smov 16  }
 0x803   : > { %v788_v45 = vld [vmem:[%s779_s28] sm:$0xff]  ;;  %s3254_s28 = smov 24  }
 0x866   : > { %v1659_v39 = vpop.permute.xlu1 %1658 }
 0x867   : > { %2586 = vmatmul.mubr.msk.bf16.vlgmr.msra.gmra.mrb[24].mxu0 %vm861_vm2, %v1659_v39 }
 0x868   : > { %2596 = vmatpush3.bf16.xpose.msra.mxu0 %v1776_v40  ;;  %2597 = vmatprep.mubr.msk.bf16.mxu0 %vm2734_vm0, %v2733_v1 }
 0x869   : > { %2607 = vmatprep.subr.bf16.mxu0 %v2733_v1 }
 0x86a   : > { %v1769_v42 = vpop.permute.xlu1 %1768 }
 0x86e   : > { %v1879_v44 = vpop.permute.xlu1 %1878 }
 0x86f   : > { %2598 = vmatmul.mubr.msk.bf16.vlgmr.msra.gmra.mrb[28].mxu0 %vm861_vm2, %v1769_v42 }
 0x870   : > { %2608 = vmatpush3.bf16.xpose.msra.mxu0 %v1886_v43  ;;  %2609 = vmatprep.mubr.msk.bf16.mxu0 %vm2734_vm0, %v2733_v1 }
 0x871   : > { %2619 = vmatprep.subr.bf16.mxu0 %v2733_v1 }
 0x877   : > { %2610 = vmatmul.mubr.msk.bf16.vlgmr.msra.gmra.mrb[32].mxu0 %vm861_vm2, %v1879_v44 }
 0x878   : > { %2623 = vmatprep.mubr.msk.bf16.mxu0 %vm2734_vm0, %v2733_v1 }
 0x8c7   : > { %v1590_v46 = vpop.f32.mrb[20].mxu0 }
 0x8c8   : > { %v1591_v47 = vadd.f32 %v1590_v46, %v788_v45  ;;  %v2575_v48 = vpop.f32.mrb[21].mxu0 }
 0x8c9   : > { %v1593_v49 = vpop.f32.mrb[22].mxu0 }
 0x8ca   : > { %v2576_v50 = vpop.f32.mrb[23].mxu0  ;;  %v1596_v51 = vsel %vm861_vm2, %v1591_v47, -inf }
 0x8cb   : > { %1597 = vmax.xlane.f32.xlu0 %v1596_v51 }
 0x93a   : > { %v1702_v52 = vpop.f32.mrb[24].mxu0 }
 0x93b   : > { %v1703_v53 = vadd.f32 %v1702_v52, %v788_v45  ;;  %v2587_v54 = vpop.f32.mrb[25].mxu0 }
 0x93c   : > { %v1705_v55 = vpop.f32.mrb[26].mxu0 }
 0x93d   : > { %v2588_v56 = vpop.f32.mrb[27].mxu0  ;;  %v1708_v57 = vsel %vm861_vm2, %v1703_v53, -inf }
 0x93e   : > { %1709 = vmax.xlane.f32.xlu1 %v1708_v57  ;;  %v2679_v56 = vld [vmem:[%s3210_s14] sm:$0xff]  }
 0x93f   : > { %2620 = vmatpush3.bf16.msra.mxu0 %v2679_v56 }
 0x940   : > { %2621 = vmatprep.subr.bf16.mxu0 %v2733_v1 }
 0x942   : > { %v1812_v58 = vpop.f32.mrb[28].mxu0 }
 0x943   : > { %v1813_v59 = vadd.f32 %v1812_v58, %v788_v45  ;;  %v2599_v60 = vpop.f32.mrb[29].mxu0 }
 0x944   : > { %v1815_v61 = vpop.f32.mrb[30].mxu0 }
 0x945   : > { %v2600_v62 = vpop.f32.mrb[31].mxu0  ;;  %v1818_v63 = vsel %vm861_vm2, %v1813_v59, -inf  ;;  %v2680_v61 = vld [vmem:[%s3210_s14 + $0x8] sm:$0xff]  }
 0x946   : > { %1819 = vmax.xlane.f32.xlu0 %v1818_v63  ;;  %2622 = vmatpush3.bf16.msra.mxu0 %v2680_v61 }
 0x947   : > { %2635 = vmatprep.subr.bf16.mxu0 %v2733_v1 }
 0x94a   : > { %v1922_v0 = vpop.f32.mrb[32].mxu0 }
 0x94b   : > { %v1923_v2 = vadd.f32 %v1922_v0, %v788_v45  ;;  %v2611_v4 = vpop.f32.mrb[33].mxu0 }
 0x94c   : > { %v1925_v5 = vpop.f32.mrb[34].mxu0 }
 0x94d   : > { %v2612_v6 = vpop.f32.mrb[35].mxu0  ;;  %v1928_v3 = vsel %vm861_vm2, %v1923_v2, -inf }
 0x94e   : > { %1929 = vmax.xlane.f32.xlu0 %v1928_v3 }
 0x958   : > { %v1598_v7 = vpop.xlane.xlu0 %1597 }
 0x959   : > { %v1599_v8 = vsub.f32 %v1591_v47, %v1598_v7 }
 0x95b   : > { %v1600_v9 = vmul.f32 1.442695, %v1599_v8 }
 0x95d   : > { %2705 = vpow2.f32 %v1600_v9 }
 0x967   : > { %v2706_v11 = vpop.eup %2705 }
 0x968   : > { %v1602_v12 = vsel %vm861_vm2, %v2706_v11, 0.0 }
 0x969   : > { %1603 = vadd.xlane.f32.xlu1 %v1602_v12 }
 0x97a   : > { %1609 = vrot.lane.b32.xlu1 %v3047_v26, %s3248_s4 }
 0x9cb   : > { %v1710_v13 = vpop.xlane.xlu1 %1709 }
 0x9cc   : > { %v1711_v14 = vsub.f32 %v1703_v53, %v1710_v13 }
 0x9ce   : > { %v1712_v15 = vmul.f32 1.442695, %v1711_v14 }
 0x9d0   : > { %2707 = vpow2.f32 %v1712_v15  ;;  %v2416_v15 = vld [vmem:[%s3211_s15] ss:$0 sm:$0xff] }
 0x9d3   : > { %v1820_v16 = vpop.xlane.xlu0 %1819 }
 0x9d4   : > { %v1821_v17 = vsub.f32 %v1813_v59, %v1820_v16 }
 0x9d6   : > { %v1822_v10 = vmul.f32 1.442695, %v1821_v17 }
 0x9d8   : > { %2709 = vpow2.f32 %v1822_v10 }
 0x9da   : > { %v2708_v18 = vpop.eup %2707 }
 0x9db   : > { %v1930_v20 = vpop.xlane.xlu0 %1929  ;;  %v1714_v21 = vsel %vm861_vm2, %v2708_v18, 0.0 }
 0x9dc   : > { %v1931_v22 = vsub.f32 %v1923_v2, %v1930_v20  ;;  %1715 = vadd.xlane.f32.xlu0 %v1714_v21 }
 0x9de   : > { %v1932_v23 = vmul.f32 1.442695, %v1931_v22 }
 0x9e0   : > { %2711 = vpow2.f32 %v1932_v23 }
 0x9e2   : > { %v2710_v24 = vpop.eup %2709 }
 0x9e3   : > { %v1824_v25 = vsel %vm861_vm2, %v2710_v24, 0.0 }
 0x9e4   : > { %1825 = vadd.xlane.f32.xlu1 %v1824_v25 }
 0x9ea   : > { %v2712_v27 = vpop.eup %2711 }
 0x9eb   : > { %v1934_v28 = vsel %vm861_vm2, %v2712_v27, 0.0 }
 0x9ec   : > { %1935 = vadd.xlane.f32.xlu0 %v1934_v28 }
 0x9f5   : > { %1830 = vrot.lane.b32.xlu1 %v3047_v26, %s3249_s8 }
 0x9f6   : > { %v1604_v29 = vpop.xlane.xlu1 %1603 }
 0x9f7   : > { %2713 = vrcp.f32 %v1604_v29  ;;  %v2681_v29 = vld [vmem:[%s3214_s18] sm:$0xff]  }
 0x9f9   : > { %1940 = vrot.lane.b32.xlu1 %v3047_v26, %s3250_s2 }
 0x9fa   : > { %v1610_v30 = vpop.permute.xlu1 %1609 }
 0x9fb   : > { %v1615_v31 = vsel %vm925_vm3, %v1610_v30, 0  ;;  %v2682_v30 = vld [vmem:[%s3214_s18 + $0x8] sm:$0xff]  }
 0x9fc   : > { %2578 = vmatpush3.bf16.msra.mxu1 %v1615_v31  ;;  %v2684_v31 = vld [vmem:[%s3216_s20 + $0x8] sm:$0xff]  }
 0x9fd   : > { %2589 = vmatprep.subr.bf16.mxu1 %v2733_v1 }
 0xa01   : > { %v2714_v32 = vpop.eup %2713 }
 0xa02   : > { %v1606_v33 = vmul.f32 %v2714_v32, %v2706_v11  ;;  %1720 = vrot.lane.b32.xlu0 %v3047_v26, %s3251_s3 }
 0xa04   : > { %v1607_v34 = vpack.c.bf16 %v1606_v33, %v1606_v33 }
 0xa06   : > { %2580 = vmatmul.mubr.msk.bf16.vlgmr.msra.gmra.mrb[28].mxu1 %vm861_vm2, %v1607_v34 }
 0xa07   : > { %2591 = vmatprep.mubr.msk.bf16.mxu1 %vm2734_vm0, %v2733_v1 }
 0xa69   : > { %v1716_v35 = vpop.xlane.xlu0 %1715 }
 0xa6a   : > { %2715 = vrcp.f32 %v1716_v35 }
 0xa71   : > { %v1826_v36 = vpop.xlane.xlu1 %1825 }
 0xa72   : > { %2717 = vrcp.f32 %v1826_v36  ;;  %v2420_v36 = vld [vmem:[%s3212_s16] ss:$0 sm:$0xff] }
 0xa74   : > { %v2716_v37 = vpop.eup %2715 }
 0xa75   : > { %v1718_v39 = vmul.f32 %v2716_v37, %v2708_v18  ;;  %v1831_v42 = vpop.permute.xlu1 %1830 }
 0xa76   : > { %v1836_v44 = vsel %vm925_vm3, %v1831_v42, 0  ;;  %v2685_v42 = vld [vmem:[%s3216_s20 + $0x10] sm:$0xff]  }
 0xa77   : > { %v1719_v26 = vpack.c.bf16 %v1718_v39, %v1718_v39 }
 0xa79   : > { %v1936_v38 = vpop.xlane.xlu0 %1935  ;;  %v1941_v46 = vpop.permute.xlu1 %1940 }
 0xa7a   : > { %2719 = vrcp.f32 %v1936_v38  ;;  %v1946_v49 = vsel %vm925_vm3, %v1941_v46, 0  ;;  %v2421_v38 = vld [vmem:[%s3213_s17] ss:$0 sm:$0xff] }
 0xa7c   : > { %v2718_v43 = vpop.eup %2717 }
 0xa7d   : > { %v1721_v40 = vpop.permute.xlu0 %1720  ;;  %v1828_v45 = vmul.f32 %v2718_v43, %v2710_v24  ;;  %v2422_v43 = vld [vmem:[%s3215_s19] ss:$0 sm:$0xff] }
 0xa7e   : > { %v1726_v41 = vsel %vm925_vm3, %v1721_v40, 0 }
 0xa7f   : > { %2590 = vmatpush3.bf16.msra.mxu1 %v1726_v41  ;;  %v1829_v47 = vpack.c.bf16 %v1828_v45, %v1828_v45 }
 0xa80   : > { %2601 = vmatprep.subr.bf16.mxu1 %v2733_v1 }
 0xa82   : > { %2592 = vmatmul.mubr.msk.bf16.vlgmr.msra.gmra.mrb[32].mxu1 %vm861_vm2, %v1719_v26  ;;  %v2686_v26 = vld [vmem:[%s3216_s20 + $0x18] sm:$0xff]  }
 0xa83   : > { %2602 = vmatpush3.bf16.msra.mxu1 %v1836_v44  ;;  %2603 = vmatprep.mubr.msk.bf16.mxu1 %vm2734_vm0, %v2733_v1 }
 0xa84   : > { %2613 = vmatprep.subr.bf16.mxu1 %v2733_v1  ;;  %v2720_v48 = vpop.eup %2719 }
 0xa85   : > { %v1938_v50 = vmul.f32 %v2720_v48, %v2712_v27 }
 0xa87   : > { %v1939_v51 = vpack.c.bf16 %v1938_v50, %v1938_v50 }
 0xa8a   : > { %2604 = vmatmul.mubr.msk.bf16.vlgmr.msra.gmra.mrb[36].mxu1 %vm861_vm2, %v1829_v47 }
 0xa8b   : > { %2614 = vmatpush3.bf16.msra.mxu1 %v1946_v49  ;;  %2615 = vmatprep.mubr.msk.bf16.mxu1 %vm2734_vm0, %v2733_v1 }
 0xa8c   : > { %2627 = vmatprep.subr.bf16.mxu1 %v2733_v1 }
 0xa92   : > { %2616 = vmatmul.mubr.msk.bf16.vlgmr.msra.gmra.mrb[40].mxu1 %vm861_vm2, %v1939_v51 }
 0xa93   : > { %2631 = vmatprep.mubr.msk.bf16.mxu1 %vm2734_vm0, %v2733_v1  ;;  %2628 = vmatpush3.bf16.msra.mxu1 %v2681_v29 }
 0xa94   : > { %2629 = vmatprep.subr.bf16.mxu1 %v2733_v1 }
 0xa97   : > { %2630 = vmatpush3.bf16.msra.mxu1 %v2682_v30 }
 0xad9   : > { %v1651_v52 = vpop.f32.mrb[28].mxu1 }
 0xada   : > { %v2581_v53 = vpop.f32.mrb[29].mxu1 }
 0xadb   : > { %v1654_v54 = vpop.f32.mrb[30].mxu1 }
 0xadc   : > { %v2582_v55 = vpop.f32.mrb[31].mxu1 }
 0xb55   : > { %v1762_v57 = vpop.f32.mrb[32].mxu1 }
 0xb56   : > { %1989 = vrot.lane.b32.xlu0 %v1762_v57, %s3252_s27  ;;  %v2593_v58 = vpop.f32.mrb[33].mxu1  ;;  %s783_s27 = scalar_lea.vmem %s3220_s24, %s2895_s0 }
 0xb57   : > { %v1765_v59 = vpop.f32.mrb[34].mxu1 }
 0xb58   : > { %v2594_v60 = vpop.f32.mrb[35].mxu1 }
 0xb5d   : > { %v1872_v62 = vpop.f32.mrb[36].mxu1 }
 0xb5e   : > { %1993 = vrot.lane.b32.xlu1 %v1872_v62, %s3253_s30  ;;  %v2605_v63 = vpop.f32.mrb[37].mxu1 }
 0xb5f   : > { %v1875_v0 = vpop.f32.mrb[38].mxu1 }
 0xb60   : > { %v2606_v2 = vpop.f32.mrb[39].mxu1 }
 0xb65   : > { %v1982_v4 = vpop.f32.mrb[40].mxu1 }
 0xb66   : > { %1997 = vrot.lane.b32.xlu0 %v1982_v4, %s3254_s28  ;;  %v2617_v5 = vpop.f32.mrb[41].mxu1 }
 0xb67   : > { %v1985_v6 = vpop.f32.mrb[42].mxu1  ;;  %v2432_v5 = vld [vmem:[%s3218_s22] ss:$0 sm:$0xff] }
 0xb68   : > { %v2618_v3 = vpop.f32.mrb[43].mxu1 }
 0xb69   : > { %v2433_v3 = vld [vmem:[%s3219_s23] ss:$0 sm:$0xff] }
 0xbc8   : > { %v1990_v7 = vpop.permute.xlu0 %1989 }
 0xbc9   : > { %v2000_v9 = vsel %vm861_vm2, %v1651_v52, %v1990_v7 }
 0xbd0   : > { %v1994_v8 = vpop.permute.xlu1 %1993 }
 0xbd1   : > { %v2001_v11 = vsel %vm1312_vm4, %v2000_v9, %v1994_v8 }
 0xbd8   : > { %v1998_v12 = vpop.permute.xlu0 %1997 }
 0xbd9   : > { %v2002_v13 = vsel %vm1314_vm5, %v2001_v11, %v1998_v12 }
 0xbda   : > { %v2008_v14 = vpack.c.bf16 %v2002_v13, %v2002_v13 }
 0xbdc   : > { %2624 = vmatmul.mubr.msk.bf16.vlgmr.msra.gmra.mrb[36].mxu0 %vm813_vm1, %v2008_v14 }
 0xbdd   : > { %2643 = vmatprep.mubr.msk.bf16.mxu0 %vm2734_vm0, %v2733_v1 }
 0xcaf   : > { %v2064_v16 = vpop.f32.mrb[36].mxu0 }
 0xcb0   : > { %v2065_v17 = vadd.f32 %v2416_v15, %v2064_v16  ;;  %v2625_v10 = vpop.f32.mrb[37].mxu0 }
 0xcb1   : > { %v2067_v18 = vpop.f32.mrb[38].mxu0 }
 0xcb2   : > { %v2626_v20 = vpop.f32.mrb[39].mxu0  ;;  %v2070_v21 = vadd.f32 %v2065_v17, %v3037_v19  ;;  %v2683_v19 = vld [vmem:[%s3216_s20] sm:$0xff]  }
 0xcb3   : > { %2636 = vmatpush3.bf16.msra.mxu0 %v2683_v19 }
 0xcb4   : > { %v2073_v22 = vsel %vm813_vm1, %v2070_v21, 0.0  ;;  %2637 = vmatprep.subr.bf16.mxu0 %v2733_v1 }
 0xcb5   : > { %2074 = vadd.xlane.f32.xlu1 %v2073_v22 }
 0xcb7   : > { %2638 = vmatpush3.bf16.msra.mxu0 %v2684_v31 }
 0xcb8   : > { %2639 = vmatprep.subr.bf16.mxu0 %v2733_v1 }
 0xcbb   : > { %2640 = vmatpush3.bf16.msra.mxu0 %v2685_v42 }
 0xcbc   : > { %2641 = vmatprep.subr.bf16.mxu0 %v2733_v1  ;;  %v2426_v1 = vld [vmem:[%s3217_s21] ss:$0 sm:$0xff] }
 0xcbf   : > { %2642 = vmatpush3.bf16.msra.mxu0 %v2686_v26 }
 0xd42   : > { %v2075_v23 = vpop.xlane.xlu1 %2074 }
 0xd43   : > { %v2076_v24 = vmul.f32 0.03125, %v2075_v23 }
 0xd45   : > { %v2077_v25 = vsub.f32 %v2070_v21, %v2076_v24 }
 0xd47   : > { %v2078_v27 = vmul.f32 %v2077_v25, %v2077_v25 }
 0xd49   : > { %v2079_v28 = vsel %vm813_vm1, %v2078_v27, 0.0 }
 0xd4a   : > { %2080 = vadd.xlane.f32.xlu0 %v2079_v28 }
 0xdd7   : > { %v2081_v32 = vpop.xlane.xlu0 %2080 }
 0xdd8   : > { %v2082_v33 = vmul.f32 0.03125, %v2081_v32 }
 0xdda   : > { %v2083_v34 = vadd.f32 1e-05, %v2082_v33 }
 0xddc   : > { %2721 = vrsqrt.f32 %v2083_v34 }
 0xde6   : > { %v2722_v35 = vpop.eup %2721 }
 0xde7   : > { %v2085_v37 = vmul.f32 %v2722_v35, %v2077_v25 }
 0xde9   : > { %v2092_v39 = vmul.f32 %v2420_v36, %v2085_v37 }
 0xdeb   : > { %v2099_v40 = vadd.f32 %v2421_v38, %v2092_v39 }
 0xded   : > { %v2105_v41 = vpack.c.bf16 %v2099_v40, %v2099_v40 }
 0xdef   : > { %2632 = vmatmul.mubr.msk.bf16.vlgmr.msra.gmra.mrb[44].mxu1 %vm813_vm1, %v2105_v41 }
 0xec2   : > { %v2161_v44 = vpop.f32.mrb[44].mxu1 }
 0xec3   : > { %v2162_v45 = vadd.f32 %v2422_v43, %v2161_v44  ;;  %v2633_v46 = vpop.f32.mrb[45].mxu1 }
 0xec4   : > { %v2164_v47 = vpop.f32.mrb[46].mxu1 }
 0xec5   : > { %v2167_v48 = vmax.f32 %v2162_v45, 0.0  ;;  %v2634_v49 = vpop.f32.mrb[47].mxu1 }
 0xec7   : > { %v2177_v50 = vpack.c.bf16 %v2167_v48, %v2167_v48 }
 0xec9   : > { %2644 = vmatmul.mubr.msk.bf16.vlgmr.msra.gmra.mrb[40].mxu0 %vm2208_vm6, %v2177_v50 }
 0xf9c   : > { %v2246_v51 = vpop.f32.mrb[40].mxu0 }
 0xf9d   : > { %v2247_v52 = vadd.f32 %v2426_v1, %v2246_v51  ;;  %v2645_v53 = vpop.f32.mrb[41].mxu0 }
 0xf9e   : > { %v2249_v54 = vpop.f32.mrb[42].mxu0 }
 0xf9f   : > { %v2646_v55 = vpop.f32.mrb[43].mxu0  ;;  %v2252_v56 = vadd.f32 %v2247_v52, %v2099_v40 }
 0xfa1   : > { %v2255_v57 = vsel %vm813_vm1, %v2252_v56, 0.0 }
 0xfa2   : > { %2256 = vadd.xlane.f32.xlu0 %v2255_v57 }
0x102f   : > { %v2257_v58 = vpop.xlane.xlu0 %2256 }
0x1030   : > { %v2258_v59 = vmul.f32 0.03125, %v2257_v58 }
0x1032   : > { %v2259_v60 = vsub.f32 %v2252_v56, %v2258_v59 }
0x1034   : > { %v2260_v61 = vmul.f32 %v2259_v60, %v2259_v60 }
0x1036   : > { %v2261_v62 = vsel %vm813_vm1, %v2260_v61, 0.0 }
0x1037   : > { %2262 = vadd.xlane.f32.xlu1 %v2261_v62 }
0x10c4   : > { %v2263_v63 = vpop.xlane.xlu1 %2262 }
0x10c5   : > { %v2264_v0 = vmul.f32 0.03125, %v2263_v63 }
0x10c7   : > { %v2265_v2 = vadd.f32 1e-05, %v2264_v0 }
0x10c9   : > { %2723 = vrsqrt.f32 %v2265_v2 }
0x10d3   : > { %v2724_v4 = vpop.eup %2723 }
0x10d4   : > { %v2267_v6 = vmul.f32 %v2724_v4, %v2259_v60 }
0x10d6   : > { %v2274_v7 = vmul.f32 %v2432_v5, %v2267_v6 }
0x10d8   : > { %v2281_v8 = vadd.f32 %v2433_v3, %v2274_v7 }
0x10da   : > { %2282 = vst.msk [vmem:[%s783_s27] sm:$0xff] %vm813_vm1, %v2281_v8 }
0x10db PF: > { %s34_s5 = sadd.s32 1, %s2731_s5  }
0x10dc   : > { %p31_p4 = scmp.ge.s32.totalorder %s34_s5, 4  }
0x10de   :  { %33 = sbr.rel (!%p31_p4) target bundleno = 10 (0xa), region = 155 }

</bundles_post_ra>
